<compile_context>
chip_gen: v7x
topology: tpu7x:2x2x1
jax: 0.10.0
libtpu: 0.0.40
codegen_flags: <defaults>
</compile_context>

<pallas_src>
import jax
import jax.numpy as jnp
from jax import lax
from jax.experimental import pallas as pl
from jax.experimental.pallas import tpu as pltpu

IN_FEATURES = 196608           # from Linear(196608, 10)
OUT_FEATURES = 10
N_SPLITS = 2                   # leading parallel grid axis (2 TCs on v7x)
TILE_K = 16384                 # 196608 / (2 * 16384) = 6 reduction steps per split


def linear_kernel(x_ref, w_ref, o_ref, acc_ref):
    """One K-tile of out[b, n] = sum_k x[b, k] * w[n, k], f32 accumulation."""
    k = pl.program_id(1)

    @pl.when(k == 0)
    def _():
        acc_ref[...] = jnp.zeros_like(acc_ref)

    x = x_ref[...]                              # [B, TILE_K] f32
    w = w_ref[...]                              # [N, TILE_K] f32 (K on lanes)
    # VPU multiply + lane reduction; no MXU, no N padding of HBM traffic.
    prod = x[:, None, :] * w[None, :, :]        # [B, N, TILE_K]
    acc_ref[...] += jnp.sum(prod, axis=-1)      # [B, N]

    @pl.when(k == pl.num_programs(1) - 1)
    def _():
        o_ref[...] = acc_ref[...].astype(o_ref.dtype)


def pallas_linear_partials(x, weight):
    """x: [B, K] f32, weight: [N, K] f32 (native nn.Linear layout).

    Returns partial sums of shape [N_SPLITS, B, N]; caller sums over axis 0
    and adds the bias.
    """
    B, K = x.shape
    N, K2 = weight.shape
    assert K == K2 == IN_FEATURES
    assert K % (N_SPLITS * TILE_K) == 0
    k_steps = K // (N_SPLITS * TILE_K)          # inner reduction steps per split

    return pl.pallas_call(
        linear_kernel,
        out_shape=jax.ShapeDtypeStruct((N_SPLITS, B, N), jnp.float32),
        grid_spec=pltpu.PrefetchScalarGridSpec(
            num_scalar_prefetch=0,
            grid=(N_SPLITS, k_steps),
            in_specs=[
                # x tile: [B, TILE_K], walking K (offset by the split index).
                pl.BlockSpec((B, TILE_K), lambda p, k: (0, p * k_steps + k)),
                # w tile: [N, TILE_K], native layout, same K walk.
                pl.BlockSpec((N, TILE_K), lambda p, k: (0, p * k_steps + k)),
            ],
            # One resident [B, N] partial-sum slab per split (written on last k).
            out_specs=pl.BlockSpec((None, B, N), lambda p, k: (p, 0, 0)),
            scratch_shapes=[pltpu.VMEM((B, N), jnp.float32)],
        ),
        compiler_params=pltpu.CompilerParams(
            dimension_semantics=("parallel", "arbitrary"),
        ),
    )(x, weight)


def my_nn_forward(x, weight, bias):
    """Equivalent of myNN.forward: x [B, 196608] -> [B, 10].

    weight: [10, 196608] (PyTorch Linear convention, consumed as-is), bias: [10].
    """
    partials = pallas_linear_partials(x, weight)        # [N_SPLITS, B, 10]
    return partials.sum(axis=0) + bias[None, :]          # tiny wrapper combine


if __name__ == "__main__":
    key = jax.random.PRNGKey(0)
    k_x, k_w, k_b = jax.random.split(key, 3)

    B = 2
    # Deterministic synthetic parameters (PyTorch-style uniform(-1/sqrt(K), 1/sqrt(K))).
    bound = 1.0 / jnp.sqrt(jnp.float32(IN_FEATURES))
    weight = jax.random.uniform(
        k_w, (OUT_FEATURES, IN_FEATURES), jnp.float32, -bound, bound
    )
    bias = jax.random.uniform(k_b, (OUT_FEATURES,), jnp.float32, -bound, bound)
    x = jax.random.normal(k_x, (B, IN_FEATURES), jnp.float32)

    fwd = jax.jit(my_nn_forward)
    out = jax.block_until_ready(fwd(x, weight, bias))

    # Reference check against full-precision JAX matmul.
    ref = jnp.dot(x, weight.T, precision=lax.Precision.HIGHEST) + bias
    assert out.shape == (B, OUT_FEATURES)
    max_err = float(jnp.max(jnp.abs(out - ref)))
    assert jnp.allclose(out, ref, atol=1e-3, rtol=1e-3), max_err

    print("KERNEL_OK")
</pallas_src>

<mosaic_0001>
module attributes {stable_mosaic.version = 11 : i64} {
  func.func @linear_kernel(%arg0: i32, %arg1: i32, %arg2: memref<2x16384xf32, #tpu.memory_space<vmem>>, %arg3: memref<10x16384xf32, #tpu.memory_space<vmem>>, %arg4: memref<1x2x10xf32, #tpu.memory_space<vmem>>, %arg5: memref<2x10xf32, #tpu.memory_space<vmem>>) attributes {dimension_semantics = [#tpu.dimension_semantics<parallel>, #tpu.dimension_semantics<arbitrary>], iteration_bounds = array<i64: 2, 6>, scalar_prefetch = 0 : i64, scratch_operands = 1 : i64, tpu.core_type = #tpu.core_type<tc>, window_params = [{transform_indices = @transform_0, window_bounds = array<i64: 2, 16384>}, {transform_indices = @transform_1, window_bounds = array<i64: 10, 16384>}, {transform_indices = @transform_2, window_bounds = array<i64: 1, 2, 10>}]} {
    %c0_i32 = arith.constant 0 : i32
    %0 = arith.cmpi eq, %arg1, %c0_i32 : i32
    %1 = arith.extui %0 : i1 to i32
    %c0_i32_0 = arith.constant 0 : i32
    %2 = arith.cmpi ne, %1, %c0_i32_0 : i32
    scf.if %2 {
      %cst_9 = arith.constant 0.000000e+00 : f32
      %17 = vector.broadcast %cst_9 : f32 to vector<2x10xf32>
      %c0_10 = arith.constant 0 : index
      %c0_11 = arith.constant 0 : index
      %18 = vector.load %arg5[%c0_10, %c0_11] : memref<2x10xf32, #tpu.memory_space<vmem>>, vector<2x10xf32>
      tpu.vector_store %arg5[%c0_10, %c0_11], %17 {strides = array<i32>} : memref<2x10xf32, #tpu.memory_space<vmem>>, vector<2x10xf32>,
    } else {
    }
    %c0 = arith.constant 0 : index
    %c0_1 = arith.constant 0 : index
    %3 = vector.load %arg2[%c0, %c0_1] : memref<2x16384xf32, #tpu.memory_space<vmem>>, vector<2x16384xf32>
    %c0_2 = arith.constant 0 : index
    %c0_3 = arith.constant 0 : index
    %4 = vector.load %arg3[%c0_2, %c0_3] : memref<10x16384xf32, #tpu.memory_space<vmem>>, vector<10x16384xf32>
    %5 = vector.shape_cast %3 : vector<2x16384xf32> to vector<2x1x16384xf32>
    %6 = vector.shape_cast %4 : vector<10x16384xf32> to vector<1x10x16384xf32>
    %7 = vector.broadcast %5 : vector<2x1x16384xf32> to vector<2x10x16384xf32>
    %8 = vector.broadcast %6 : vector<1x10x16384xf32> to vector<2x10x16384xf32>
    %9 = arith.mulf %7, %8 : vector<2x10x16384xf32>
    %c0_4 = arith.constant 0 : index
    %c0_5 = arith.constant 0 : index
    %10 = vector.load %arg5[%c0_4, %c0_5] : memref<2x10xf32, #tpu.memory_space<vmem>>, vector<2x10xf32>
    %cst = arith.constant dense<0.000000e+00> : vector<2x10xf32>
    %11 = vector.multi_reduction <add>, %9, %cst [2] : vector<2x10x16384xf32> to vector<2x10xf32>
    %12 = arith.addf %10, %11 : vector<2x10xf32>
    %c0_6 = arith.constant 0 : index
    %c0_7 = arith.constant 0 : index
    %13 = vector.load %arg5[%c0_6, %c0_7] : memref<2x10xf32, #tpu.memory_space<vmem>>, vector<2x10xf32>
    tpu.vector_store %arg5[%c0_6, %c0_7], %12 {strides = array<i32>} : memref<2x10xf32, #tpu.memory_space<vmem>>, vector<2x10xf32>,
    %c5_i32 = arith.constant 5 : i32
    %14 = arith.cmpi eq, %arg1, %c5_i32 : i32
    %15 = arith.extui %14 : i1 to i32
    %c0_i32_8 = arith.constant 0 : i32
    %16 = arith.cmpi ne, %15, %c0_i32_8 : i32
    scf.if %16 {
      %c0_9 = arith.constant 0 : index
      %c0_10 = arith.constant 0 : index
      %17 = vector.load %arg5[%c0_9, %c0_10] : memref<2x10xf32, #tpu.memory_space<vmem>>, vector<2x10xf32>
      %c0_11 = arith.constant 0 : index
      %c0_12 = arith.constant 0 : index
      %c0_13 = arith.constant 0 : index
      %18 = vector.load %arg4[%c0_11, %c0_12, %c0_13] : memref<1x2x10xf32, #tpu.memory_space<vmem>>, vector<1x2x10xf32>
      %19 = vector.shape_cast %18 : vector<1x2x10xf32> to vector<2x10xf32>
      %20 = vector.shape_cast %17 : vector<2x10xf32> to vector<1x2x10xf32>
      tpu.vector_store %arg4[%c0_11, %c0_12, %c0_13], %20 {strides = array<i32>} : memref<1x2x10xf32, #tpu.memory_space<vmem>>, vector<1x2x10xf32>,
    } else {
    }
    return
  }
  func.func @transform_0(%arg0: i32, %arg1: i32) -> (i32, i32) {
    %c6_i32 = arith.constant 6 : i32
    %0 = arith.muli %arg0, %c6_i32 : i32
    %1 = arith.addi %0, %arg1 : i32
    %c0_i32 = arith.constant 0 : i32
    %c0_i32_0 = arith.constant 0 : i32
    return %c0_i32, %1 : i32, i32
  }
  func.func @transform_1(%arg0: i32, %arg1: i32) -> (i32, i32) {
    %c6_i32 = arith.constant 6 : i32
    %0 = arith.muli %arg0, %c6_i32 : i32
    %1 = arith.addi %0, %arg1 : i32
    %c0_i32 = arith.constant 0 : i32
    %c0_i32_0 = arith.constant 0 : i32
    return %c0_i32, %1 : i32, i32
  }
  func.func @transform_2(%arg0: i32, %arg1: i32) -> (i32, i32, i32) {
    %c0_i32 = arith.constant 0 : i32
    %c0_i32_0 = arith.constant 0 : i32
    %c0_i32_1 = arith.constant 0 : i32
    return %arg0, %c0_i32, %c0_i32_0 : i32, i32, i32
  }
}

</mosaic_0001>

<bundles_post_ra>
// kernel: my_nn_forward.1
= control target key start
LH: loop header
LB: loop body
LE: loop exit
PB: predicated region body
PF: predicated region fallthrough
CT: control target
= control target key end

     0   :  { %7 = vsyncpa [#allocation4], 0  ;;  %s7436_s0 = inlined_call_operand.hbm [shape: f32[2,196608], index: 0, kind: input, shape index: {}]   ;;  %s7437_s1 = inlined_call_operand.hbm [shape: f32[10,196608], index: 1, kind: input, shape index: {}]   ;;  %s7438_s2 = inlined_call_operand.vmem [shape: f32[2,2,10], index: 2, kind: output, shape index: {}]  }
   0x1   :  { %9 = vsyncpa [#allocation4 + $0x1], 0 }
   0x2   :  { %10 = vsyncpa [#allocation6], 0 }
   0x3   :  { %12 = vsyncpa [#allocation6 + $0x1], 0  ;;  %s3987_s9 = smov 0   ;;  %s3989_s10 = smov 0  }
   0x4   :  { %s3991_s11 = smov 0   ;;  %s3993_s12 = smov 0  }
   0x5   :  { %s3995_s13 = smov 0   ;;  %s3997_s14 = smov 0  }
   0x6   :  { %s3999_s15 = smov 0   ;;  %s4001_s16 = smov 0  }
   0x7 LB: > { %s3519_s17 = sadd.s32 4294967295, %s3964_s16   ;;  %s27_s18 = sadd.s32 1, %s3956_s14  ;;  %s3964_s16 = sphi %s4001_s16, %s18_s16   ;;  %s3960_s15 = sphi %s3999_s15, %s8617_s15   ;;  %s3956_s14 = sphi %s3997_s14, %s8616_s14   ;;  %s3952_s13 = sphi %s3995_s13, %s8615_s13   ;;  %s3948_s12 = sphi %s3993_s12, %s8614_s12   ;;  %s3944_s11 = sphi %s3991_s11, %s8613_s11   ;;  %s3940_s10 = sphi %s3989_s10, %s8612_s10   ;;  %s3936_s9 = sphi %s3987_s9, %s8611_s9  }
   0x8   : > { %p28_p0 = scmp.ge.s32.totalorder %s27_s18, 6  ;;  %s30_s19 = sadd.s32 1, %s3960_s15 }
   0x9   : > { %s34_s20 = smul.u32 6, %s3960_s15  ;;  %s41_s21 = sadd.s32 1, %s3944_s11 }
   0xa   : > { %s8619_s18 = smov (%p28_p0, %s27_s18), 0  ;;  %s8621_s19 = smov (!%p28_p0, %s30_s19), %s3960_s15 }
   0xb   : > { %s4034_s22 = sadd.s32 %s3956_s14, %s34_s20  ;;  %p48_p1 = scmp.ne.s32.totalorder %s3944_s11, %s3940_s10 }
   0xc   : > { %p32_p2 = scmp.ge.s32.totalorder %s8621_s19, 2  ;;  %p49_p3 = scmp.eq.s32.totalorder %s3964_s16, 0 }
   0xd   : > { %p54_p4 = scmp.ne.s32.totalorder %s3940_s10, %s3936_s9  ;;  %p55_p5 = scmp.eq.s32.totalorder %s3519_s17, 0 }
   0xe   : > { %s8623_s19 = smov (%p32_p2, %s8621_s19), 0  ;;  %p4042_p6 = por %p49_p3, %p48_p1 }
   0xf   : > { %p4046_p7 = por %p55_p5, %p54_p4  ;;  %s36_s25 = smul.u32 6, %s8623_s19 }
  0x10   : > { %p3582_p8 = scmp.lt.s32.totalorder %s3964_s16, 12  ;;  %s4053_s26 = sand.u32 1, %s3944_s11  }
  0x11   : > { %s7762_s24 = scalar_select %p4046_p7, 1, 0 }
  0x12   : > { %s37_s27 = sadd.s32 %s36_s25, %s8619_s18  ;;  %s3523_s29 = sshll.u32 %s4053_s26, 8 }
  0x13   : > { %s38_s28 = ssub.s32 %s4034_s22, %s37_s27  ;;  %s3569_s30 = sshll.u32 %s4034_s22, 12 }
  0x14   : > { %p39_p9 = scmp.eq.s32.totalorder %s38_s28, 0  ;;  %s138_s3 = scalar_lea.vmem [#allocation3], %s3523_s29 }
  0x15   : > { %s148_s4 = sshll.u32 %s138_s3, 4  ;;  %s4065_s8 = scalar_lea.hbm %s7436_s0, %s3569_s30  ;;  %s4067_s4 = int_to_ptr.vmem [resolvable:$true] %s148_s4 }
  0x16   : > { %s4060_s5 = scalar_select %p39_p9, %s3944_s11, %s41_s21  }
  0x17   : > { %p4071_p10 = pnand %p3582_p8, %p4042_p6  ;;  %s3526_s17 = sshll.u32 %s4053_s26, 11 }
  0x18   : > { %s3570_s20 = sshll.u32 %s4034_s22, 14  ;;  %s135_s21 = scalar_lea.sflag [#allocation4], %s4053_s26 }
  0x19   : > { %s3834_s25 = scalar_lea.hbm %s4065_s8, 4096  ;;  %p3836_p12 = pneg %p4071_p10 }
  0x1a   : > { %p3835_p11 = scmp.ne.s32.totalorder %s4065_s8, %s3834_s25  ;;  %s3839_s23 = scalar_lea.hbm %s7436_s0, 49152 }
  0x1b   : > { %p3840_p1 = scmp.lt.u32.totalorder %s4065_s8, %s7436_s0  ;;  %p3841_p2 = scmp.lt.u32.totalorder %s3839_s23, %s3834_s25 }
  0x1c   : > { %p3837_p13 = pnand %p3836_p12, %p3835_p11  ;;  %p3843_p4 = scmp.lt.u32.totalorder %s3834_s25, %s4065_s8 }
  0x1d   : > { %p3842_p3 = por %p3841_p2, %p3840_p1 }
  0x1e   : > { %p3838_p0 = pneg %p3837_p13 }
  0x1f   : > { %p3844_p5 = por %p3843_p4, %p3842_p3 }
  0x21   : > { %p3845_p6 = pnand %p3844_p5, %p3838_p0 }
  0x23   : > { %3848 = shalt.err (!%p3845_p6)
}
  0x24   : > { %s3849_s3 = scalar_lea.vmem %s4067_s4, 4096  ;;  %s3966_s6 = smov [#allocation3]  }
  0x25   : > { %p3850_p8 = scmp.ne.s32.totalorder %s4067_s4, %s3849_s3  ;;  %s3854_s7 = sshll.u32 %s3966_s6, 4  ;;  %s3855_s7 = int_to_ptr.vmem [resolvable:$false] %s3854_s7 }
  0x26   : > { %s3856_s27 = scalar_lea.vmem %s3855_s7, 8192  ;;  %p3857_p13 = scmp.lt.s32.totalorder %s4067_s4, %s3855_s7 }
  0x27   : > { %p3852_p9 = pnand %p3850_p8, %p3836_p12  ;;  %p3858_p1 = scmp.lt.s32.totalorder %s3856_s27, %s3849_s3 }
  0x29   : > { %p3853_p11 = pneg %p3852_p9  ;;  %p3859_p2 = por %p3858_p1, %p3857_p13 }
  0x2b   : > { %p3860_p3 = pnand %p3859_p2, %p3853_p11 }
  0x2d   : > { %3863 = shalt.err (!%p3860_p3)
}
  0x2e   : > { %3578 = dma.hbm_to_vmem [thread:$0]  (!%p4071_p10), %s4065_s8, 4096, %s4067_s4, %s135_s21  }
  0x2f   : > { %s4108_s23 = scalar_lea.hbm %s7437_s1, %s3570_s20  ;;  %p3529_p0 = scmp.ge.s32.totalorder %s3964_s16, 1 }
  0x30   : > { %p176_p4 = scmp.lt.s32.totalorder %s3964_s16, 13  ;;  %s159_s29 = scalar_lea.vmem [#allocation5], %s3526_s17 }
  0x31   : > { %s168_s30 = sshll.u32 %s159_s29, 4  ;;  %s156_s22 = scalar_lea.sflag [#allocation6], %s4053_s26  ;;  %s4114_s30 = int_to_ptr.vmem [resolvable:$true] %s168_s30 }
  0x32   : > { %p4116_p5 = pnand %p3529_p0, %p176_p4  ;;  %s3864_s4 = scalar_lea.hbm %s4108_s23, 32768 }
  0x33   : > { %p3865_p6 = scmp.ne.s32.totalorder %s4108_s23, %s3864_s4  ;;  %s3869_s21 = scalar_lea.hbm %s7437_s1, 393216 }
  0x34   : > { %p3870_p11 = scmp.lt.u32.totalorder %s4108_s23, %s7437_s1  ;;  %p3871_p13 = scmp.lt.u32.totalorder %s3869_s21, %s3864_s4 }
  0x35   : > { %p3867_p8 = pnand %p3865_p6, %p3836_p12  ;;  %p3873_p2 = scmp.lt.u32.totalorder %s3864_s4, %s4108_s23 }
  0x36   : > { %p3872_p1 = por %p3871_p13, %p3870_p11 }
  0x37   : > { %p3868_p9 = pneg %p3867_p8 }
  0x38   : > { %p3874_p3 = por %p3873_p2, %p3872_p1 }
  0x3a   : > { %p3875_p0 = pnand %p3874_p3, %p3868_p9 }
  0x3c   : > { %3878 = shalt.err (!%p3875_p0)
}
  0x3d   : > { %s3879_s7 = scalar_lea.vmem %s4114_s30, 32768  ;;  %s3967_s27 = smov [#allocation5]  }
  0x3e   : > { %p3880_p4 = scmp.ne.s32.totalorder %s4114_s30, %s3879_s7  ;;  %s3884_s25 = sshll.u32 %s3967_s27, 4  ;;  %s3885_s25 = int_to_ptr.vmem [resolvable:$false] %s3884_s25 }
  0x3f   : > { %s3886_s28 = scalar_lea.vmem %s3885_s25, 65536  ;;  %p3887_p7 = scmp.lt.s32.totalorder %s4114_s30, %s3885_s25 }
  0x40   : > { %p3882_p6 = pnand %p3880_p4, %p3836_p12  ;;  %p3888_p11 = scmp.lt.s32.totalorder %s3886_s28, %s3879_s7 }
  0x42   : > { %p3883_p8 = pneg %p3882_p6  ;;  %p3889_p13 = por %p3888_p11, %p3887_p7 }
  0x44   : > { %p3890_p1 = pnand %p3889_p13, %p3883_p8 }
  0x46   : > { %3893 = shalt.err (!%p3890_p1)
}
  0x47   : > { %s3968_s29 = smov 196608   ;;  %s3969_s4 = smov 16384  }
  0x48   : > { %s3970_s8 = smov 1024   ;;  %180 = sbr.rel (%p4116_p5) target bundleno = 814 (0x32e), region = 28 }
  0x49   : > { %3581 = dma.hbm_to_vmem [thread:$0]  (!%p4071_p10), %s4108_s23, 32768, %s4114_s30, %s156_s22, %s3968_s29, %s3969_s4, %s3970_s8  }
  0x4f   : > { %s182_s20 = sand.u32 1, %s3940_s10   ;;  %p7765_p7 = scmp.ne.s32.totalorder %s7762_s24, 0 }
  0x50   : > { %s3530_s21 = sshll.u32 %s182_s20, 8  ;;  %s183_s6 = scalar_lea.sflag [#allocation4], %s182_s20 }
  0x51   : > { %s4149_s17 = scalar_lea.vmem [#allocation3], %s3530_s21 }
  0x52   : > { %3927 = dma.done.wait (%p7765_p7), %s183_s6, 4096  }
  0x53   : > { %3929 = vsyncadd (%p7765_p7), %s183_s6, 4294963200  ;;  %s3531_s7 = sshll.u32 %s182_s20, 11  ;;  %s192_s9 = scalar_lea.sflag [#allocation6], %s182_s20 }
  0x54   : > { %s4155_s26 = scalar_lea.vmem [#allocation5], %s3531_s7 }
  0x55   : > { %3931 = dma.done.wait (%p7765_p7), %s192_s9, 32768  }
  0x56   : > { %3933 = vsyncadd (%p7765_p7), %s192_s9, 4294934528  ;;  %p226_p10 = scmp.lt.s32.totalorder %s3952_s13, 1  ;;  %p3533_p12 = scmp.ne.s32.totalorder %s3948_s12, 0 }
  0x57   : > { %vm234_vm0 = vcmask (!%p3533_p12), 74752   ;;  %v3971_v0 = vmov (!%p3533_p12), 0.0  }
  0x58   : > { %s8625_s13 = smov (!%p226_p10, %s3952_s13), 1  ;;  %233 = sbr.rel (%p3533_p12) target bundleno = 95 (0x5f), region = 40 }
  0x59   : > { %s3532_s23 = sshll.u32 %s8625_s13, 1  ;;  %235 = vst.msk [vmem:[#allocation2] sm:$0x3] (!%p3533_p12), %vm234_vm0, %v3971_v0 }
  0x5a   : > { %s4166_s22 = scalar_lea.vmem %s7438_s2, %s3532_s23 }
  0x5f PF: > { %v7440_v1 = vlaneseq  ;;  %v3534_v3 = vld.sshfl [vmem:[%s4149_s17] sm:$0xff pattern:$0x75316420]  ;;  %v3535_v4 = vld.sshfl [vmem:[%s4149_s17 + $0x8] sm:$0xff pattern:$0x75316420] }
  0x60   : > { %v4174_v5 = vcombine.high %v3534_v3, %v3535_v4  ;;  %v3536_v9 = vld.sshfl [vmem:[%s4149_s17 + $0x10] sm:$0xff pattern:$0x75316420]  ;;  %v3537_v10 = vld.sshfl [vmem:[%s4149_s17 + $0x18] sm:$0xff pattern:$0x75316420]  ;;  %v4244_v41 = vcombine.low %v3534_v3, %v3535_v4 }
  0x61   : > { %v4170_v2 = vshrl.u32 %v7440_v1, 7  ;;  %v3538_v14 = vld.sshfl [vmem:[%s4149_s17 + $0x20] sm:$0xff pattern:$0x75316420]  ;;  %v4204_v17 = vld [vmem:[%s4155_s26 + $0x8] sm:$0xff]  ;;  %v4218_v24 = vld [vmem:[%s4155_s26 + $0x10] sm:$0xff]  ;;  %v587_v40 = vcombine.high %v3536_v9, %v3537_v10  ;;  %v4246_v42 = vcombine.low %v3536_v9, %v3537_v10 }
  0x62   : > { %v3539_v15 = vld.sshfl [vmem:[%s4149_s17 + $0x28] sm:$0xff pattern:$0x75316420]  ;;  %v4201_v16 = vld [vmem:[%s4155_s26] sm:$0xff]  ;;  %v4242_v39 = vld [vmem:[%s4155_s26 + $0x18] sm:$0xff]  ;;  %vm2734_vm1 = vcmask 1041408  }
  0x63   : > { %7766 = vst [vmem:[#allocation9_spill] sm:$0xff] %v4170_v2  ;;  %v4177_v6 = vsub.s32 0, %v4170_v2  ;;  %v4180_v7 = vsub.s32 1, %v4170_v2  ;;  %v4183_v8 = vsub.s32 2, %v4170_v2  ;;  %v4188_v11 = vsub.s32 3, %v4170_v2  ;;  %7772 = vst [vmem:[#allocation15_spill] sm:$0xff] %v4246_v42 }
  0x64   : > { %v3540_v18 = vld.sshfl [vmem:[%s4149_s17 + $0x30] sm:$0xff pattern:$0x75316420]  ;;  %v3541_v19 = vld.sshfl [vmem:[%s4149_s17 + $0x38] sm:$0xff pattern:$0x75316420]  ;;  %v603_v49 = vcombine.high %v3538_v14, %v3539_v15  ;;  %v4272_v58 = vcombine.low %v3538_v14, %v3539_v15 }
  0x65   : > { %7767 = vst [vmem:[#allocation10_spill] sm:$0xff] %v4188_v11  ;;  %v4192_v12 = vrot.slane %v4174_v5, %v4177_v6  ;;  %v4196_v13 = vrot.slane %v4174_v5, %v4180_v7  ;;  %v3542_v20 = vld.sshfl [vmem:[%s4149_s17 + $0x40] sm:$0xff pattern:$0x75316420]  ;;  %v4210_v21 = vsub.s32 4, %v4170_v2  ;;  %v4214_v22 = vrot.slane %v4174_v5, %v4183_v8  ;;  %v4288_v4 = vld [vmem:[%s4155_s26 + $0x28] sm:$0xff] }
  0x66   : > { %v3543_v23 = vld.sshfl [vmem:[%s4149_s17 + $0x48] sm:$0xff pattern:$0x75316420]  ;;  %v3544_v25 = vld.sshfl [vmem:[%s4149_s17 + $0x50] sm:$0xff pattern:$0x75316420]  ;;  %v4233_v34 = vrot.slane %v4174_v5, %v4188_v11  ;;  %v4268_v56 = vcombine.high %v3540_v18, %v3541_v19  ;;  %v4274_v59 = vcombine.low %v3540_v18, %v3541_v19 }
  0x67   : > { %7768 = vst [vmem:[#allocation11_spill] sm:$0xff] %v4192_v12  ;;  %7769 = vst [vmem:[#allocation12_spill] sm:$0xff] %v4196_v13  ;;  %v3545_v26 = vld.sshfl [vmem:[%s4149_s17 + $0x58] sm:$0xff pattern:$0x75316420]  ;;  %v4229_v33 = vsub.s32 5, %v4170_v2  ;;  %v2348_v35 = vmul.f32 %v4192_v12, %v4201_v16  ;;  %v2349_v36 = vmul.f32 %v4196_v13, %v4204_v17  ;;  %v4259_v51 = vrot.slane %v4174_v5, %v4210_v21 }
  0x68   : > { %7770 = vst [vmem:[#allocation13_spill] sm:$0xff] %v4214_v22  ;;  %v3546_v27 = vld.sshfl [vmem:[%s4149_s17 + $0x60] sm:$0xff pattern:$0x75316420]  ;;  %7771 = vst [vmem:[#allocation14_spill] sm:$0xff] %v4233_v34  ;;  %v4255_v50 = vsub.s32 6, %v4170_v2  ;;  %v2350_v52 = vmul.f32 %v4214_v22, %v4218_v24  ;;  %v4270_v57 = vcombine.high %v3542_v20, %v3543_v23  ;;  %v2351_v63 = vmul.f32 %v4233_v34, %v4242_v39 }
  0x69   : > { %v3547_v28 = vld.sshfl [vmem:[%s4149_s17 + $0x68] sm:$0xff pattern:$0x75316420]  ;;  %v3548_v29 = vld.sshfl [vmem:[%s4149_s17 + $0x70] sm:$0xff pattern:$0x75316420]  ;;  %v4282_v62 = vrot.slane %v4174_v5, %v4229_v33  ;;  %v2992_v0 = vadd.f32 %v2349_v36, %v2348_v35  ;;  %v4290_v9 = vcombine.high %v3544_v25, %v3545_v26  ;;  %v4407_v34 = vrot.slane %v4268_v56, %v4183_v8 }
  0x6a   : > { %v3549_v30 = vld.sshfl [vmem:[%s4149_s17 + $0x78] sm:$0xff pattern:$0x75316420]  ;;  %v3550_v31 = vld.sshfl [vmem:[%s4149_s17 + $0x80] sm:$0xff pattern:$0x75316420]  ;;  %v4292_v10 = vcombine.high %v3546_v27, %v3547_v28  ;;  %v4428_v12 = vrot.slane %v4268_v56, %v4255_v50  ;;  %v4465_v42 = vrot.slane %v4270_v57, %v4255_v50 }
  0x6b   : > { %v3551_v32 = vld.sshfl [vmem:[%s4149_s17 + $0x88] sm:$0xff pattern:$0x75316420]  ;;  %v3552_v37 = vld.sshfl [vmem:[%s4149_s17 + $0x90] sm:$0xff pattern:$0x75316420]  ;;  %v4294_v14 = vcombine.high %v3548_v29, %v3549_v30  ;;  %v2993_v25 = vadd.f32 %v2992_v0, %v2350_v52  ;;  %v4317_v30 = vcombine.low %v3542_v20, %v3543_v23  ;;  %v2353_v36 = vmul.f32 %v4282_v62, %v4288_v4 }
  0x6c   : > { %v3553_v38 = vld.sshfl [vmem:[%s4149_s17 + $0x98] sm:$0xff pattern:$0x75316420]  ;;  %v3554_v43 = vld.sshfl [vmem:[%s4149_s17 + $0xa0] sm:$0xff pattern:$0x75316420]  ;;  %v4296_v15 = vcombine.high %v3550_v31, %v3551_v32  ;;  %v4335_v20 = vrot.slane %v587_v40, %v4177_v6  ;;  %v4338_v23 = vrot.slane %v587_v40, %v4180_v7  ;;  %v4352_v52 = vrot.slane %v587_v40, %v4210_v21 }
  0x6d   : > { %v3555_v44 = vld.sshfl [vmem:[%s4149_s17 + $0xa8] sm:$0xff pattern:$0x75316420]  ;;  %v3556_v45 = vld.sshfl [vmem:[%s4149_s17 + $0xb0] sm:$0xff pattern:$0x75316420]  ;;  %v4300_v1 = vcombine.high %v3552_v37, %v3553_v38  ;;  %v2994_v37 = vadd.f32 %v2993_v25, %v2351_v63  ;;  %v4364_v63 = vrot.slane %v603_v49, %v4177_v6  ;;  %v4367_v0 = vrot.slane %v603_v49, %v4180_v7 }
  0x6e   : > { %v3557_v46 = vld.sshfl [vmem:[%s4149_s17 + $0xb8] sm:$0xff pattern:$0x75316420]  ;;  %v3558_v47 = vld.sshfl [vmem:[%s4149_s17 + $0xc0] sm:$0xff pattern:$0x75316420]  ;;  %v4311_v27 = vcombine.high %v3554_v43, %v3555_v44  ;;  %v4378_v25 = vrot.slane %v603_v49, %v4188_v11 }
  0x6f   : > { %v3559_v48 = vld.sshfl [vmem:[%s4149_s17 + $0xc8] sm:$0xff pattern:$0x75316420]  ;;  %7773 = vst [vmem:[#allocation16_spill] sm:$0xff] %v4259_v51  ;;  %v4266_v55 = vld [vmem:[%s4155_s26 + $0x20] sm:$0xff]  ;;  %7775 = vst [vmem:[#allocation18_spill] sm:$0xff] %v4272_v58  ;;  %v4313_v28 = vcombine.high %v3556_v45, %v3557_v46  ;;  %v4344_v45 = vrot.slane %v587_v40, %v4188_v11  ;;  %v4436_v58 = vrot.slane %v4270_v57, %v4177_v6 }
  0x70   : > { %v3560_v53 = vld.sshfl [vmem:[%s4149_s17 + $0xd0] sm:$0xff pattern:$0x75316420]  ;;  %v3561_v54 = vld.sshfl [vmem:[%s4149_s17 + $0xd8] sm:$0xff pattern:$0x75316420]  ;;  %v2352_v35 = vmul.f32 %v4259_v51, %v4266_v55  ;;  %v4315_v29 = vcombine.high %v3558_v47, %v3559_v48  ;;  %v4403_v51 = vrot.slane %v4268_v56, %v4180_v7 }
  0x71   : > { %7774 = vst [vmem:[#allocation17_spill] sm:$0xff] %v4266_v55  ;;  %7776 = vst [vmem:[#allocation19_spill] sm:$0xff] %v4274_v59  ;;  %v3562_v60 = vld.sshfl [vmem:[%s4149_s17 + $0xe0] sm:$0xff pattern:$0x75316420]  ;;  %v4278_v61 = vsub.s32 7, %v4170_v2  ;;  %v4304_v2 = vrot.slane %v4174_v5, %v4255_v50  ;;  %v4319_v31 = vcombine.high %v3560_v53, %v3561_v54  ;;  %v4355_v53 = vrot.slane %v587_v40, %v4229_v33 }
  0x72   : > { %7777 = vst [vmem:[#allocation20_spill] sm:$0xff] %v4282_v62  ;;  %v3563_v3 = vld.sshfl [vmem:[%s4149_s17 + $0xe8] sm:$0xff pattern:$0x75316420]  ;;  %7778 = vst [vmem:[#allocation21_spill] sm:$0xff] %v4288_v4  ;;  %v4309_v26 = vld [vmem:[%s4155_s26 + $0x30] sm:$0xff]  ;;  %v2995_v47 = vadd.f32 %v2994_v37, %v2352_v35  ;;  %v4358_v54 = vrot.slane %v587_v40, %v4255_v50  ;;  %v4375_v35 = vrot.slane %v603_v49, %v4183_v8 }
  0x73   : > { %v3564_v18 = vld.sshfl [vmem:[%s4149_s17 + $0xf0] sm:$0xff pattern:$0x75316420]  ;;  %v3565_v19 = vld.sshfl [vmem:[%s4149_s17 + $0xf8] sm:$0xff pattern:$0x75316420]  ;;  %v4323_v32 = vrot.slane %v4174_v5, %v4278_v61  ;;  %v4330_v43 = vcombine.high %v3562_v60, %v3563_v3  ;;  %v4341_v5 = vrot.slane %v587_v40, %v4183_v8  ;;  %v2354_v46 = vmul.f32 %v4304_v2, %v4309_v26 }
  0x74   : > { %7779 = vst [vmem:[#allocation22_spill] sm:$0xff] %v4304_v2  ;;  %7780 = vst [vmem:[#allocation23_spill] sm:$0xff] %v4309_v26  ;;  %v4328_v38 = vld [vmem:[%s4155_s26 + $0x38] sm:$0xff]  ;;  %v4332_v44 = vcombine.high %v3564_v18, %v3565_v19  ;;  %v4349_v48 = vld [vmem:[%s4155_s26 + $0x40] sm:$0xff]  ;;  %v4361_v60 = vrot.slane %v587_v40, %v4278_v61  ;;  %v2996_v18 = vadd.f32 %v2995_v47, %v2353_v36  ;;  %vm3393_vm2 = vcmask 130112   ;;  %p3566_p5 = scmp.ne.s32.totalorder %s3948_s12, 5 }
  0x75   : > { %7781 = vst [vmem:[#allocation24_spill] sm:$0xff] %v4317_v30  ;;  %7782 = vst [vmem:[#allocation25_spill] sm:$0xff] %v4323_v32  ;;  %v2355_v3 = vmul.f32 %v4323_v32, %v4328_v38  ;;  %v4372_v19 = vld [vmem:[%s4155_s26 + $0x48] sm:$0xff]  ;;  %v4381_v40 = vrot.slane %v603_v49, %v4210_v21  ;;  %v4384_v37 = vrot.slane %v603_v49, %v4229_v33  ;;  %v4395_v2 = vld [vmem:[%s4155_s26 + $0x50] sm:$0xff]  ;;  %vm3404_vm3 = vcmask 1041409  }
  0x76   : > { %7783 = vst [vmem:[#allocation26_spill] sm:$0xff] %v4328_v38  ;;  %7784 = vst [vmem:[#allocation27_spill] sm:$0xff] %v4335_v20  ;;  %v4387_v30 = vrot.slane %v603_v49, %v4255_v50  ;;  %v4390_v36 = vrot.slane %v603_v49, %v4278_v61  ;;  %v2356_v47 = vmul.f32 %v4335_v20, %v4349_v48  ;;  %v4424_v13 = vld [vmem:[%s4155_s26 + $0x58] sm:$0xff]  ;;  %v4482_v55 = vld [vmem:[%s4155_s26 + $0x68] sm:$0xff]  ;;  %vm3408_vm4 = vcmask 74752  }
  0x77   : > { %7785 = vst [vmem:[#allocation28_spill] sm:$0xff] %v4338_v23  ;;  %7786 = vst [vmem:[#allocation29_spill] sm:$0xff] %v4341_v5  ;;  %v2997_v32 = vadd.f32 %v2996_v18, %v2354_v46  ;;  %v4399_v62 = vrot.slane %v4268_v56, %v4177_v6  ;;  %v4411_v49 = vrot.slane %v4268_v56, %v4188_v11 }
  0x78   : > { %7787 = vst [vmem:[#allocation30_spill] sm:$0xff] %v4344_v45  ;;  %7788 = vst [vmem:[#allocation31_spill] sm:$0xff] %v4349_v48  ;;  %v4415_v46 = vrot.slane %v4268_v56, %v4210_v21  ;;  %v4419_v18 = vrot.slane %v4268_v56, %v4229_v33  ;;  %v2357_v20 = vmul.f32 %v4338_v23, %v4372_v19 }
  0x79   : > { %7789 = vst [vmem:[#allocation32_spill] sm:$0xff] %v4352_v52  ;;  %7790 = vst [vmem:[#allocation33_spill] sm:$0xff] %v4355_v53  ;;  %v2998_v22 = vadd.f32 %v2997_v32, %v2355_v3  ;;  %v4432_v59 = vrot.slane %v4268_v56, %v4278_v61  ;;  %v4440_v48 = vrot.slane %v4270_v57, %v4180_v7 }
  0x7a   : > { %7791 = vst [vmem:[#allocation34_spill] sm:$0xff] %v4358_v54  ;;  %7792 = vst [vmem:[#allocation35_spill] sm:$0xff] %v4361_v60  ;;  %v4444_v32 = vrot.slane %v4270_v57, %v4183_v8  ;;  %v4448_v3 = vrot.slane %v4270_v57, %v4188_v11  ;;  %v2358_v56 = vmul.f32 %v4341_v5, %v4395_v2 }
  0x7b   : > { %7793 = vst [vmem:[#allocation36_spill] sm:$0xff] %v4364_v63  ;;  %7794 = vst [vmem:[#allocation37_spill] sm:$0xff] %v4367_v0  ;;  %v2999_v23 = vadd.f32 %v2998_v22, %v2356_v47  ;;  %v4457_v38 = vrot.slane %v4270_v57, %v4210_v21  ;;  %v4461_v26 = vrot.slane %v4270_v57, %v4229_v33 }
  0x7c   : > { %7795 = vst [vmem:[#allocation38_spill] sm:$0xff] %v4372_v19  ;;  %7796 = vst [vmem:[#allocation39_spill] sm:$0xff] %v4375_v35  ;;  %v4453_v19 = vld [vmem:[%s4155_s26 + $0x60] sm:$0xff]  ;;  %v4469_v4 = vrot.slane %v4270_v57, %v4278_v61  ;;  %v4473_v22 = vrot.slane %v4290_v9, %v4177_v6  ;;  %v4477_v47 = vrot.slane %v4290_v9, %v4180_v7 }
  0x7d   : > { %7797 = vst [vmem:[#allocation40_spill] sm:$0xff] %v4378_v25  ;;  %7798 = vst [vmem:[#allocation41_spill] sm:$0xff] %v4381_v40  ;;  %v2359_v5 = vmul.f32 %v4344_v45, %v4424_v13  ;;  %v4490_v57 = vrot.slane %v4290_v9, %v4188_v11  ;;  %v2360_v45 = vmul.f32 %v4352_v52, %v4453_v19 }
  0x7e   : > { %7799 = vst [vmem:[#allocation42_spill] sm:$0xff] %v4384_v37  ;;  %7800 = vst [vmem:[#allocation43_spill] sm:$0xff] %v4387_v30  ;;  %v2361_v52 = vmul.f32 %v4355_v53, %v4482_v55 }
  0x7f   : > { %7801 = vst [vmem:[#allocation44_spill] sm:$0xff] %v4390_v36  ;;  %7802 = vst [vmem:[#allocation45_spill] sm:$0xff] %v4395_v2  ;;  %v3000_v2 = vadd.f32 %v2999_v23, %v2357_v20  ;;  %v4502_v20 = vrot.slane %v4290_v9, %v4255_v50  ;;  %v4506_v23 = vrot.slane %v4290_v9, %v4278_v61 }
  0x80   : > { %7803 = vst [vmem:[#allocation46_spill] sm:$0xff] %v4399_v62  ;;  %7804 = vst [vmem:[#allocation47_spill] sm:$0xff] %v4403_v51 }
  0x81   : > { %7805 = vst [vmem:[#allocation48_spill] sm:$0xff] %v4407_v34  ;;  %7806 = vst [vmem:[#allocation49_spill] sm:$0xff] %v4411_v49 }
  0x82   : > { %7807 = vst [vmem:[#allocation50_spill] sm:$0xff] %v4415_v46  ;;  %7808 = vst [vmem:[#allocation51_spill] sm:$0xff] %v4419_v18 }
  0x83   : > { %7809 = vst [vmem:[#allocation52_spill] sm:$0xff] %v4424_v13  ;;  %7810 = vst [vmem:[#allocation53_spill] sm:$0xff] %v4428_v12  ;;  %v3001_v13 = vadd.f32 %v3000_v2, %v2358_v56  ;;  %v4531_v2 = vrot.slane %v4292_v10, %v4210_v21  ;;  %v4535_v56 = vrot.slane %v4292_v10, %v4229_v33 }
  0x84   : > { %7811 = vst [vmem:[#allocation54_spill] sm:$0xff] %v4432_v59  ;;  %7812 = vst [vmem:[#allocation55_spill] sm:$0xff] %v4436_v58 }
  0x85   : > { %7813 = vst [vmem:[#allocation56_spill] sm:$0xff] %v4440_v48  ;;  %7814 = vst [vmem:[#allocation57_spill] sm:$0xff] %v4444_v32 }
  0x86   : > { %7815 = vst [vmem:[#allocation58_spill] sm:$0xff] %v4448_v3  ;;  %7816 = vst [vmem:[#allocation59_spill] sm:$0xff] %v4453_v19  ;;  %v3002_v19 = vadd.f32 %v3001_v13, %v2359_v5  ;;  %v4560_v13 = vrot.slane %v4294_v14, %v4183_v8  ;;  %v4564_v5 = vrot.slane %v4294_v14, %v4188_v11 }
  0x87   : > { %7817 = vst [vmem:[#allocation60_spill] sm:$0xff] %v4457_v38  ;;  %7818 = vst [vmem:[#allocation61_spill] sm:$0xff] %v4461_v26 }
  0x88   : > { %7819 = vst [vmem:[#allocation62_spill] sm:$0xff] %v4465_v42  ;;  %7820 = vst [vmem:[#allocation63_spill] sm:$0xff] %v4469_v4  ;;  %v4486_v42 = vrot.slane %v4290_v9, %v4183_v8  ;;  %v3003_v53 = vadd.f32 %v3002_v19, %v2360_v45  ;;  %v4589_v45 = vrot.slane %v4296_v15, %v4177_v6 }
  0x89   : > { %7821 = vst [vmem:[#allocation64_spill] sm:$0xff] %v4473_v22  ;;  %7822 = vst [vmem:[#allocation65_spill] sm:$0xff] %v4477_v47  ;;  %v4494_v22 = vrot.slane %v4290_v9, %v4210_v21  ;;  %v4498_v47 = vrot.slane %v4290_v9, %v4229_v33  ;;  %v4527_v9 = vrot.slane %v4292_v10, %v4188_v11 }
  0x8a   : > { %7823 = vst [vmem:[#allocation66_spill] sm:$0xff] %v4482_v55  ;;  %7824 = vst [vmem:[#allocation67_spill] sm:$0xff] %v4486_v42  ;;  %v4569_v55 = vld [vmem:[%s4155_s26 + $0x80] sm:$0xff]  ;;  %v4593_v19 = vrot.slane %v4296_v15, %v4180_v7 }
  0x8b   : > { %7825 = vst [vmem:[#allocation68_spill] sm:$0xff] %v4490_v57  ;;  %7826 = vst [vmem:[#allocation69_spill] sm:$0xff] %v4494_v22  ;;  %v4511_v57 = vld [vmem:[%s4155_s26 + $0x70] sm:$0xff]  ;;  %v4515_v22 = vrot.slane %v4292_v10, %v4177_v6 }
  0x8c   : > { %7827 = vst [vmem:[#allocation70_spill] sm:$0xff] %v4498_v47  ;;  %7828 = vst [vmem:[#allocation71_spill] sm:$0xff] %v4502_v20  ;;  %v4519_v47 = vrot.slane %v4292_v10, %v4180_v7  ;;  %v4523_v20 = vrot.slane %v4292_v10, %v4183_v8 }
  0x8d   : > { %7829 = vst [vmem:[#allocation72_spill] sm:$0xff] %v4506_v23  ;;  %7830 = vst [vmem:[#allocation73_spill] sm:$0xff] %v4511_v57 }
  0x8e   : > { %7831 = vst [vmem:[#allocation74_spill] sm:$0xff] %v4515_v22  ;;  %7832 = vst [vmem:[#allocation75_spill] sm:$0xff] %v4519_v47  ;;  %v4540_v47 = vld [vmem:[%s4155_s26 + $0x78] sm:$0xff] }
  0x8f   : > { %7833 = vst [vmem:[#allocation76_spill] sm:$0xff] %v4523_v20  ;;  %7834 = vst [vmem:[#allocation77_spill] sm:$0xff] %v4527_v9  ;;  %v4544_v20 = vrot.slane %v4292_v10, %v4255_v50  ;;  %v4548_v9 = vrot.slane %v4292_v10, %v4278_v61  ;;  %v2362_v10 = vmul.f32 %v4358_v54, %v4511_v57 }
  0x90   : > { %7835 = vst [vmem:[#allocation78_spill] sm:$0xff] %v4531_v2  ;;  %7836 = vst [vmem:[#allocation79_spill] sm:$0xff] %v4535_v56  ;;  %v4552_v2 = vrot.slane %v4294_v14, %v4177_v6  ;;  %v4556_v56 = vrot.slane %v4294_v14, %v4180_v7  ;;  %v2363_v54 = vmul.f32 %v4361_v60, %v4540_v47 }
  0x91   : > { %7837 = vst [vmem:[#allocation80_spill] sm:$0xff] %v4540_v47  ;;  %7838 = vst [vmem:[#allocation81_spill] sm:$0xff] %v4544_v20  ;;  %v3004_v57 = vadd.f32 %v3003_v53, %v2361_v52  ;;  %v4618_v52 = vrot.slane %v4296_v15, %v4255_v50  ;;  %v4622_v53 = vrot.slane %v4296_v15, %v4278_v61 }
  0x92   : > { %7839 = vst [vmem:[#allocation82_spill] sm:$0xff] %v4548_v9  ;;  %7840 = vst [vmem:[#allocation83_spill] sm:$0xff] %v4552_v2  ;;  %v4573_v2 = vrot.slane %v4294_v14, %v4210_v21  ;;  %v2364_v60 = vmul.f32 %v4364_v63, %v4569_v55 }
  0x93   : > { %7841 = vst [vmem:[#allocation84_spill] sm:$0xff] %v4556_v56  ;;  %7842 = vst [vmem:[#allocation85_spill] sm:$0xff] %v4560_v13  ;;  %v4577_v56 = vrot.slane %v4294_v14, %v4229_v33  ;;  %v4581_v13 = vrot.slane %v4294_v14, %v4255_v50  ;;  %v3005_v47 = vadd.f32 %v3004_v57, %v2362_v10 }
  0x94   : > { %7843 = vst [vmem:[#allocation86_spill] sm:$0xff] %v4564_v5  ;;  %7844 = vst [vmem:[#allocation87_spill] sm:$0xff] %v4569_v55  ;;  %v4585_v5 = vrot.slane %v4294_v14, %v4278_v61  ;;  %v4606_v14 = vrot.slane %v4296_v15, %v4188_v11  ;;  %v4647_v57 = vrot.slane %v4300_v1, %v4210_v21 }
  0x95   : > { %7845 = vst [vmem:[#allocation88_spill] sm:$0xff] %v4573_v2  ;;  %7846 = vst [vmem:[#allocation89_spill] sm:$0xff] %v4577_v56  ;;  %v4598_v56 = vld [vmem:[%s4155_s26 + $0x88] sm:$0xff]  ;;  %v4651_v10 = vrot.slane %v4300_v1, %v4229_v33  ;;  %v3006_v55 = vadd.f32 %v3005_v47, %v2363_v54  ;;  %v4676_v54 = vrot.slane %v4311_v27, %v4183_v8 }
  0x96   : > { %7847 = vst [vmem:[#allocation90_spill] sm:$0xff] %v4581_v13  ;;  %7848 = vst [vmem:[#allocation91_spill] sm:$0xff] %v4585_v5  ;;  %v4602_v13 = vrot.slane %v4296_v15, %v4183_v8  ;;  %v2365_v63 = vmul.f32 %v4367_v0, %v4598_v56  ;;  %v4680_v47 = vrot.slane %v4311_v27, %v4188_v11 }
  0x97   : > { %7849 = vst [vmem:[#allocation92_spill] sm:$0xff] %v4589_v45  ;;  %7850 = vst [vmem:[#allocation93_spill] sm:$0xff] %v4593_v19  ;;  %v4610_v45 = vrot.slane %v4296_v15, %v4210_v21  ;;  %v4614_v19 = vrot.slane %v4296_v15, %v4229_v33  ;;  %v4643_v15 = vrot.slane %v4300_v1, %v4188_v11 }
  0x98   : > { %7851 = vst [vmem:[#allocation94_spill] sm:$0xff] %v4598_v56  ;;  %7852 = vst [vmem:[#allocation95_spill] sm:$0xff] %v4602_v13  ;;  %v3007_v0 = vadd.f32 %v3006_v55, %v2364_v60  ;;  %v4685_v56 = vld [vmem:[%s4155_s26 + $0xa0] sm:$0xff]  ;;  %v4705_v55 = vrot.slane %v4313_v28, %v4177_v6  ;;  %v4709_v60 = vrot.slane %v4313_v28, %v4180_v7 }
  0x99   : > { %7853 = vst [vmem:[#allocation96_spill] sm:$0xff] %v4606_v14  ;;  %7854 = vst [vmem:[#allocation97_spill] sm:$0xff] %v4610_v45  ;;  %v4627_v14 = vld [vmem:[%s4155_s26 + $0x90] sm:$0xff]  ;;  %v4631_v45 = vrot.slane %v4300_v1, %v4177_v6 }
  0x9a   : > { %7855 = vst [vmem:[#allocation98_spill] sm:$0xff] %v4614_v19  ;;  %7856 = vst [vmem:[#allocation99_spill] sm:$0xff] %v4618_v52  ;;  %v4635_v19 = vrot.slane %v4300_v1, %v4180_v7  ;;  %v4639_v52 = vrot.slane %v4300_v1, %v4183_v8 }
  0x9b   : > { %7857 = vst [vmem:[#allocation100_spill] sm:$0xff] %v4622_v53  ;;  %7858 = vst [vmem:[#allocation101_spill] sm:$0xff] %v4627_v14 }
  0x9c   : > { %7859 = vst [vmem:[#allocation102_spill] sm:$0xff] %v4631_v45  ;;  %7860 = vst [vmem:[#allocation103_spill] sm:$0xff] %v4635_v19  ;;  %v4656_v19 = vld [vmem:[%s4155_s26 + $0x98] sm:$0xff] }
  0x9d   : > { %7861 = vst [vmem:[#allocation104_spill] sm:$0xff] %v4639_v52  ;;  %7862 = vst [vmem:[#allocation105_spill] sm:$0xff] %v4643_v15  ;;  %v4660_v52 = vrot.slane %v4300_v1, %v4255_v50  ;;  %v4664_v15 = vrot.slane %v4300_v1, %v4278_v61  ;;  %v2366_v1 = vmul.f32 %v4375_v35, %v4627_v14 }
  0x9e   : > { %7863 = vst [vmem:[#allocation106_spill] sm:$0xff] %v4647_v57  ;;  %7864 = vst [vmem:[#allocation107_spill] sm:$0xff] %v4651_v10  ;;  %v4668_v57 = vrot.slane %v4311_v27, %v4177_v6  ;;  %v4672_v10 = vrot.slane %v4311_v27, %v4180_v7  ;;  %v2367_v35 = vmul.f32 %v4378_v25, %v4656_v19 }
  0x9f   : > { %7865 = vst [vmem:[#allocation108_spill] sm:$0xff] %v4656_v19  ;;  %7866 = vst [vmem:[#allocation109_spill] sm:$0xff] %v4660_v52  ;;  %v3008_v14 = vadd.f32 %v3007_v0, %v2365_v63  ;;  %v4734_v63 = vrot.slane %v4313_v28, %v4255_v50  ;;  %v4738_v0 = vrot.slane %v4313_v28, %v4278_v61 }
  0xa0   : > { %7867 = vst [vmem:[#allocation110_spill] sm:$0xff] %v4664_v15  ;;  %7868 = vst [vmem:[#allocation111_spill] sm:$0xff] %v4668_v57  ;;  %v4689_v57 = vrot.slane %v4311_v27, %v4210_v21  ;;  %v2368_v25 = vmul.f32 %v4381_v40, %v4685_v56 }
  0xa1   : > { %7869 = vst [vmem:[#allocation112_spill] sm:$0xff] %v4672_v10  ;;  %7870 = vst [vmem:[#allocation113_spill] sm:$0xff] %v4676_v54  ;;  %v4693_v10 = vrot.slane %v4311_v27, %v4229_v33  ;;  %v4697_v54 = vrot.slane %v4311_v27, %v4255_v50  ;;  %v3009_v19 = vadd.f32 %v3008_v14, %v2366_v1 }
  0xa2   : > { %7871 = vst [vmem:[#allocation114_spill] sm:$0xff] %v4680_v47  ;;  %7872 = vst [vmem:[#allocation115_spill] sm:$0xff] %v4685_v56  ;;  %v4701_v47 = vrot.slane %v4311_v27, %v4278_v61  ;;  %v4722_v27 = vrot.slane %v4313_v28, %v4188_v11  ;;  %v4763_v14 = vrot.slane %v4315_v29, %v4210_v21 }
  0xa3   : > { %7873 = vst [vmem:[#allocation116_spill] sm:$0xff] %v4689_v57  ;;  %7874 = vst [vmem:[#allocation117_spill] sm:$0xff] %v4693_v10  ;;  %v4714_v10 = vld [vmem:[%s4155_s26 + $0xa8] sm:$0xff]  ;;  %v4767_v1 = vrot.slane %v4315_v29, %v4229_v33  ;;  %v3010_v56 = vadd.f32 %v3009_v19, %v2367_v35  ;;  %v4792_v35 = vrot.slane %v4319_v31, %v4183_v8 }
  0xa4   : > { %7875 = vst [vmem:[#allocation118_spill] sm:$0xff] %v4697_v54  ;;  %7876 = vst [vmem:[#allocation119_spill] sm:$0xff] %v4701_v47  ;;  %v4718_v54 = vrot.slane %v4313_v28, %v4183_v8  ;;  %v2369_v40 = vmul.f32 %v4384_v37, %v4714_v10  ;;  %v4796_v19 = vrot.slane %v4319_v31, %v4188_v11 }
  0xa5   : > { %7877 = vst [vmem:[#allocation120_spill] sm:$0xff] %v4705_v55  ;;  %7878 = vst [vmem:[#allocation121_spill] sm:$0xff] %v4709_v60  ;;  %v4726_v55 = vrot.slane %v4313_v28, %v4210_v21  ;;  %v4730_v60 = vrot.slane %v4313_v28, %v4229_v33  ;;  %v4759_v28 = vrot.slane %v4315_v29, %v4188_v11 }
  0xa6   : > { %7879 = vst [vmem:[#allocation122_spill] sm:$0xff] %v4714_v10  ;;  %7880 = vst [vmem:[#allocation123_spill] sm:$0xff] %v4718_v54  ;;  %v3011_v37 = vadd.f32 %v3010_v56, %v2368_v25  ;;  %v4801_v10 = vld [vmem:[%s4155_s26 + $0xc0] sm:$0xff]  ;;  %v4821_v25 = vrot.slane %v4330_v43, %v4177_v6  ;;  %v4825_v56 = vrot.slane %v4330_v43, %v4180_v7 }
  0xa7   : > { %7881 = vst [vmem:[#allocation124_spill] sm:$0xff] %v4722_v27  ;;  %7882 = vst [vmem:[#allocation125_spill] sm:$0xff] %v4726_v55  ;;  %v4743_v27 = vld [vmem:[%s4155_s26 + $0xb0] sm:$0xff]  ;;  %v4747_v55 = vrot.slane %v4315_v29, %v4177_v6 }
  0xa8   : > { %7883 = vst [vmem:[#allocation126_spill] sm:$0xff] %v4730_v60  ;;  %7884 = vst [vmem:[#allocation127_spill] sm:$0xff] %v4734_v63  ;;  %v4751_v60 = vrot.slane %v4315_v29, %v4180_v7  ;;  %v4755_v63 = vrot.slane %v4315_v29, %v4183_v8 }
  0xa9   : > { %7885 = vst [vmem:[#allocation128_spill] sm:$0xff] %v4738_v0  ;;  %7886 = vst [vmem:[#allocation129_spill] sm:$0xff] %v4743_v27 }
  0xaa   : > { %7887 = vst [vmem:[#allocation130_spill] sm:$0xff] %v4747_v55  ;;  %7888 = vst [vmem:[#allocation131_spill] sm:$0xff] %v4751_v60  ;;  %v4772_v60 = vld [vmem:[%s4155_s26 + $0xb8] sm:$0xff]  ;;  %v4939_v55 = vld [vmem:[%s4155_s26 + $0x120] sm:$0xff] }
  0xab   : > { %7889 = vst [vmem:[#allocation132_spill] sm:$0xff] %v4755_v63  ;;  %7890 = vst [vmem:[#allocation133_spill] sm:$0xff] %v4759_v28  ;;  %v4776_v63 = vrot.slane %v4315_v29, %v4255_v50  ;;  %v4780_v28 = vrot.slane %v4315_v29, %v4278_v61  ;;  %v2370_v29 = vmul.f32 %v4387_v30, %v4743_v27 }
  0xac   : > { %7891 = vst [vmem:[#allocation134_spill] sm:$0xff] %v4763_v14  ;;  %7892 = vst [vmem:[#allocation135_spill] sm:$0xff] %v4767_v1  ;;  %v4784_v14 = vrot.slane %v4319_v31, %v4177_v6  ;;  %v4788_v1 = vrot.slane %v4319_v31, %v4180_v7  ;;  %v4817_v30 = vrot.slane %v4319_v31, %v4278_v61 }
  0xad   : > { %7893 = vst [vmem:[#allocation136_spill] sm:$0xff] %v4772_v60  ;;  %7894 = vst [vmem:[#allocation137_spill] sm:$0xff] %v4776_v63  ;;  %v2371_v27 = vmul.f32 %v4390_v36, %v4772_v60  ;;  %v2372_v36 = vmul.f32 %v4399_v62, %v4801_v10  ;;  %v4885_v62 = vrot.slane %v4332_v44, %v4183_v8  ;;  %v4936_v63 = vld [vmem:[%s4155_s26 + $0x118] sm:$0xff] }
  0xae   : > { %7895 = vst [vmem:[#allocation138_spill] sm:$0xff] %v4780_v28  ;;  %7896 = vst [vmem:[#allocation139_spill] sm:$0xff] %v4784_v14  ;;  %v4805_v14 = vrot.slane %v4319_v31, %v4210_v21  ;;  %v4933_v28 = vld [vmem:[%s4155_s26 + $0x110] sm:$0xff] }
  0xaf   : > { %7897 = vst [vmem:[#allocation140_spill] sm:$0xff] %v4788_v1  ;;  %7898 = vst [vmem:[#allocation141_spill] sm:$0xff] %v4792_v35  ;;  %v4809_v1 = vrot.slane %v4319_v31, %v4229_v33  ;;  %v4813_v35 = vrot.slane %v4319_v31, %v4255_v50  ;;  %v4838_v31 = vrot.slane %v4330_v43, %v4188_v11 }
  0xb0   : > { %7899 = vst [vmem:[#allocation142_spill] sm:$0xff] %v4796_v19  ;;  %7900 = vst [vmem:[#allocation143_spill] sm:$0xff] %v4801_v10  ;;  %v4894_v10 = vld [vmem:[%s4155_s26 + $0xe8] sm:$0xff] }
  0xb1   : > { %7901 = vst [vmem:[#allocation144_spill] sm:$0xff] %v4805_v14  ;;  %7902 = vst [vmem:[#allocation145_spill] sm:$0xff] %v4809_v1  ;;  %v3012_v1 = vadd.f32 %v3011_v37, %v2369_v40  ;;  %v4830_v14 = vld [vmem:[%s4155_s26 + $0xc8] sm:$0xff]  ;;  %v4850_v40 = vrot.slane %v4330_v43, %v4255_v50  ;;  %v4854_v37 = vrot.slane %v4330_v43, %v4278_v61 }
  0xb2   : > { %7903 = vst [vmem:[#allocation146_spill] sm:$0xff] %v4813_v35  ;;  %7904 = vst [vmem:[#allocation147_spill] sm:$0xff] %v4817_v30  ;;  %v4834_v35 = vrot.slane %v4330_v43, %v4183_v8  ;;  %v4900_v30 = vld [vmem:[%s4155_s26 + $0xf8] sm:$0xff] }
  0xb3   : > { %7905 = vst [vmem:[#allocation148_spill] sm:$0xff] %v4821_v25  ;;  %7906 = vst [vmem:[#allocation149_spill] sm:$0xff] %v4825_v56  ;;  %v4842_v25 = vrot.slane %v4330_v43, %v4210_v21  ;;  %v4846_v56 = vrot.slane %v4330_v43, %v4229_v33  ;;  %v3013_v60 = vadd.f32 %v3012_v1, %v2370_v29  ;;  %v4881_v29 = vld [vmem:[%s4155_s26 + $0xe0] sm:$0xff] }
  0xb4   : > { %7907 = vst [vmem:[#allocation150_spill] sm:$0xff] %v4830_v14  ;;  %7908 = vst [vmem:[#allocation151_spill] sm:$0xff] %v4834_v35  ;;  %v4874_v43 = vrot.slane %v4244_v41, %v4177_v6  ;;  %v4878_v1 = vrot.slane %v4244_v41, %v4180_v7  ;;  %v4897_v35 = vld [vmem:[%s4155_s26 + $0xf0] sm:$0xff] }
  0xb5   : > { %7909 = vst [vmem:[#allocation152_spill] sm:$0xff] %v4838_v31  ;;  %7910 = vst [vmem:[#allocation153_spill] sm:$0xff] %v4842_v25  ;;  %v4859_v25 = vld [vmem:[%s4155_s26 + $0xd0] sm:$0xff]  ;;  %v4862_v31 = vld [vmem:[%s4155_s26 + $0xd8] sm:$0xff] }
  0xb6   : > { %7911 = vst [vmem:[#allocation154_spill] sm:$0xff] %v4846_v56  ;;  %7912 = vst [vmem:[#allocation155_spill] sm:$0xff] %v4850_v40  ;;  %v4866_v56 = vrot.slane %v4332_v44, %v4177_v6  ;;  %v4870_v40 = vrot.slane %v4332_v44, %v4180_v7 }
  0xb7   : > { %7913 = vst [vmem:[#allocation156_spill] sm:$0xff] %v4854_v37  ;;  %7914 = vst [vmem:[#allocation157_spill] sm:$0xff] %v4859_v25  ;;  %v3014_v37 = vadd.f32 %v3013_v60, %v2371_v27  ;;  %v4916_v60 = vrot.slane %v4244_v41, %v4183_v8  ;;  %v4919_v27 = vld [vmem:[%s4155_s26 + $0x100] sm:$0xff] }
  0xb8   : > { %7915 = vst [vmem:[#allocation158_spill] sm:$0xff] %v4862_v31  ;;  %7916 = vst [vmem:[#allocation159_spill] sm:$0xff] %v4866_v56  ;;  %v4889_v56 = vrot.slane %v4332_v44, %v4188_v11 }
  0xb9   : > { %7917 = vst [vmem:[#allocation160_spill] sm:$0xff] %v4870_v40  ;;  %7918 = vst [vmem:[#allocation161_spill] sm:$0xff] %v4874_v43  ;;  %v2373_v40 = vmul.f32 %v4403_v51, %v4830_v14  ;;  %v4912_v51 = vrot.slane %v4332_v44, %v4255_v50  ;;  %v4922_v14 = vld [vmem:[%s4155_s26 + $0x108] sm:$0xff]  ;;  %v3015_v19 = vadd.f32 %v3014_v37, %v2372_v36 }
  0xba   : > { %7919 = vst [vmem:[#allocation162_spill] sm:$0xff] %v4878_v1  ;;  %7920 = vst [vmem:[#allocation163_spill] sm:$0xff] %v4881_v29  ;;  %v2093_v36 = vmul.f32 %v4878_v1, %v4204_v17  ;;  %v4952_v37 = vld [vmem:[%s4155_s26 + $0x128] sm:$0xff]  ;;  %v4969_v17 = vld [vmem:[%s4155_s26 + $0x140] sm:$0xff]  ;;  %v4973_v1 = vmul.f32 %v4436_v58, %v4919_v27  ;;  %v4994_v58 = vmul.f32 %v4448_v3, %v4936_v63 }
  0xbb   : > { %7921 = vst [vmem:[#allocation164_spill] sm:$0xff] %v4885_v62  ;;  %7922 = vst [vmem:[#allocation165_spill] sm:$0xff] %v4889_v56  ;;  %v4904_v62 = vrot.slane %v4332_v44, %v4210_v21  ;;  %v4908_v56 = vrot.slane %v4332_v44, %v4229_v33  ;;  %v5015_v3 = vrot.slane %v4244_v41, %v4229_v33 }
  0xbc   : > { %7923 = vst [vmem:[#allocation166_spill] sm:$0xff] %v4894_v10  ;;  %7924 = vst [vmem:[#allocation167_spill] sm:$0xff] %v4897_v35 }
  0xbd   : > { %7925 = vst [vmem:[#allocation168_spill] sm:$0xff] %v4900_v30  ;;  %7926 = vst [vmem:[#allocation169_spill] sm:$0xff] %v4904_v62  ;;  %v4926_v62 = vrot.slane %v4332_v44, %v4278_v61  ;;  %v2376_v44 = vmul.f32 %v4415_v46, %v4881_v29  ;;  %v2378_v46 = vmul.f32 %v4428_v12, %v4897_v35 }
  0xbe   : > { %7927 = vst [vmem:[#allocation170_spill] sm:$0xff] %v4908_v56  ;;  %7928 = vst [vmem:[#allocation171_spill] sm:$0xff] %v4912_v51  ;;  %v2374_v56 = vmul.f32 %v4407_v34, %v4859_v25  ;;  %v2375_v51 = vmul.f32 %v4411_v49, %v4862_v31  ;;  %v2092_v34 = vmul.f32 %v4874_v43, %v4201_v16  ;;  %v4963_v16 = vld [vmem:[%s4155_s26 + $0x130] sm:$0xff]  ;;  %v4966_v43 = vld [vmem:[%s4155_s26 + $0x138] sm:$0xff] }
  0xbf   : > { %7929 = vst [vmem:[#allocation172_spill] sm:$0xff] %v4916_v60  ;;  %7930 = vst [vmem:[#allocation173_spill] sm:$0xff] %v4919_v27  ;;  %v2377_v49 = vmul.f32 %v4419_v18, %v4894_v10  ;;  %v4960_v29 = vmul.f32 %v4432_v59, %v4900_v30  ;;  %v3016_v31 = vadd.f32 %v3015_v19, %v2373_v40  ;;  %v4986_v40 = vld [vmem:[%s4155_s26 + $0x148] sm:$0xff]  ;;  %v5001_v27 = vld [vmem:[%s4155_s26 + $0x150] sm:$0xff] }
  0xc0   : > { %7931 = vst [vmem:[#allocation174_spill] sm:$0xff] %v4922_v14  ;;  %7932 = vst [vmem:[#allocation175_spill] sm:$0xff] %v4926_v62  ;;  %v4945_v62 = vrot.slane %v4244_v41, %v4188_v11  ;;  %v4977_v12 = vmul.f32 %v4440_v48, %v4922_v14  ;;  %v4981_v59 = vrot.slane %v4244_v41, %v4210_v21  ;;  %v325_v25 = vld [vmem:[%s4155_s26 + $0x1c8] sm:$0xff] }
  0xc1   : > { %7933 = vst [vmem:[#allocation176_spill] sm:$0xff] %v4933_v28  ;;  %7934 = vst [vmem:[#allocation177_spill] sm:$0xff] %v4936_v63  ;;  %v2094_v19 = vmul.f32 %v4916_v60, %v4218_v24  ;;  %v4990_v18 = vmul.f32 %v4444_v32, %v4933_v28  ;;  %v4998_v48 = vmul.f32 %v4457_v38, %v4939_v55  ;;  %v5004_v24 = vld [vmem:[%s4155_s26 + $0x158] sm:$0xff]  ;;  %v5007_v60 = vld [vmem:[%s4155_s26 + $0x160] sm:$0xff] }
  0xc2   : > { %7935 = vst [vmem:[#allocation178_spill] sm:$0xff] %v4939_v55  ;;  %7936 = vst [vmem:[#allocation179_spill] sm:$0xff] %v4945_v62  ;;  %v3017_v14 = vadd.f32 %v3016_v31, %v2374_v56  ;;  %v5011_v32 = vmul.f32 %v4461_v26, %v4952_v37  ;;  %v2095_v38 = vmul.f32 %v4945_v62, %v4242_v39  ;;  %v5020_v56 = vld [vmem:[%s4155_s26 + $0x168] sm:$0xff]  ;;  %v5035_v39 = vld [vmem:[%s4155_s26 + $0x170] sm:$0xff] }
  0xc3   : > { %7937 = vst [vmem:[#allocation180_spill] sm:$0xff] %v4952_v37  ;;  %7938 = vst [vmem:[#allocation181_spill] sm:$0xff] %v4963_v16  ;;  %v2605_v55 = vadd.f32 %v2093_v36, %v2092_v34  ;;  %v7948_v31 = vld [vmem:[#allocation62_spill] sm:$0xff]  ;;  %v5028_v26 = vmul.f32 %v4469_v4, %v4966_v43  ;;  %v7949_v37 = vld [vmem:[#allocation64_spill] sm:$0xff]  ;;  %v5049_v4 = vrot.slane %v4244_v41, %v4255_v50 }
  0xc4   : > { %7939 = vst [vmem:[#allocation182_spill] sm:$0xff] %v4966_v43  ;;  %7940 = vst [vmem:[#allocation183_spill] sm:$0xff] %v4969_v17  ;;  %v5024_v63 = vmul.f32 %v7948_v31, %v4963_v16  ;;  %v5032_v28 = vmul.f32 %v7949_v37, %v4969_v17  ;;  %v3018_v30 = vadd.f32 %v3017_v14, %v2375_v51  ;;  %v5038_v34 = vld [vmem:[%s4155_s26 + $0x178] sm:$0xff]  ;;  %v5041_v36 = vld [vmem:[%s4155_s26 + $0x180] sm:$0xff] }
  0xc5   : > { %7941 = vst [vmem:[#allocation184_spill] sm:$0xff] %v4981_v59  ;;  %7942 = vst [vmem:[#allocation185_spill] sm:$0xff] %v4986_v40  ;;  %v7953_v62 = vld [vmem:[#allocation65_spill] sm:$0xff]  ;;  %v2606_v17 = vadd.f32 %v2605_v55, %v2094_v19  ;;  %v5054_v51 = vld [vmem:[%s4155_s26 + $0x188] sm:$0xff]  ;;  %v5058_v14 = vmul.f32 %v4486_v42, %v5001_v27 }
  0xc6   : > { %7943 = vst [vmem:[#allocation186_spill] sm:$0xff] %v5001_v27  ;;  %7944 = vst [vmem:[#allocation187_spill] sm:$0xff] %v5004_v24  ;;  %v5045_v31 = vmul.f32 %v7953_v62, %v4986_v40  ;;  %v7955_v43 = vld [vmem:[#allocation17_spill] sm:$0xff]  ;;  %v7957_v16 = vld [vmem:[#allocation68_spill] sm:$0xff]  ;;  %v3019_v10 = vadd.f32 %v3018_v30, %v2376_v44 }
  0xc7   : > { %7945 = vst [vmem:[#allocation188_spill] sm:$0xff] %v5007_v60  ;;  %7946 = vst [vmem:[#allocation189_spill] sm:$0xff] %v5015_v3  ;;  %v2096_v37 = vmul.f32 %v4981_v59, %v7955_v43  ;;  %v5062_v62 = vmul.f32 %v7957_v16, %v5004_v24  ;;  %v7958_v40 = vld [vmem:[#allocation69_spill] sm:$0xff]  ;;  %v5069_v43 = vld [vmem:[%s4155_s26 + $0x190] sm:$0xff]  ;;  %v5083_v16 = vrot.slane %v4244_v41, %v4278_v61 }
  0xc8   : > { %7947 = vst [vmem:[#allocation190_spill] sm:$0xff] %v5020_v56  ;;  %7950 = vst [vmem:[#allocation191_spill] sm:$0xff] %v5035_v39  ;;  %v5066_v35 = vmul.f32 %v7958_v40, %v5007_v60  ;;  %v5072_v55 = vld [vmem:[%s4155_s26 + $0x198] sm:$0xff]  ;;  %v5075_v19 = vld [vmem:[%s4155_s26 + $0x1a0] sm:$0xff]  ;;  %v2607_v60 = vadd.f32 %v2606_v17, %v2095_v38  ;;  %v5100_v41 = vmul.f32 %v4515_v22, %v5041_v36 }
  0xc9   : > { %7951 = vst [vmem:[#allocation192_spill] sm:$0xff] %v5038_v34  ;;  %7952 = vst [vmem:[#allocation193_spill] sm:$0xff] %v5041_v36  ;;  %v7962_v59 = vld [vmem:[#allocation70_spill] sm:$0xff]  ;;  %v7964_v24 = vld [vmem:[#allocation21_spill] sm:$0xff] }
  0xca   : > { %7954 = vst [vmem:[#allocation194_spill] sm:$0xff] %v5049_v4  ;;  %7956 = vst [vmem:[#allocation17_spill] sm:$0xff] %v5054_v51  ;;  %v5079_v42 = vmul.f32 %v7962_v59, %v5020_v56  ;;  %v2097_v40 = vmul.f32 %v5015_v3, %v7964_v24  ;;  %v5088_v30 = vld [vmem:[%s4155_s26 + $0x1a8] sm:$0xff]  ;;  %v7966_v44 = vld [vmem:[#allocation71_spill] sm:$0xff]  ;;  %v5096_v59 = vmul.f32 %v4506_v23, %v5038_v34 }
  0xcb   : > { %7959 = vst [vmem:[#allocation195_spill] sm:$0xff] %v5069_v43  ;;  %7960 = vst [vmem:[#allocation196_spill] sm:$0xff] %v5072_v55  ;;  %v5092_v27 = vmul.f32 %v7966_v44, %v5035_v39  ;;  %v3020_v56 = vadd.f32 %v3019_v10, %v2377_v49  ;;  %v5103_v24 = vld [vmem:[%s4155_s26 + $0x1b0] sm:$0xff]  ;;  %v5106_v38 = vld [vmem:[%s4155_s26 + $0x1b8] sm:$0xff]  ;;  %v2608_v36 = vadd.f32 %v2607_v60, %v2096_v37 }
  0xcc   : > { %7961 = vst [vmem:[#allocation197_spill] sm:$0xff] %v5075_v19  ;;  %7963 = vst [vmem:[#allocation198_spill] sm:$0xff] %v5083_v16  ;;  %v324_v17 = vld [vmem:[%s4155_s26 + $0x1c0] sm:$0xff]  ;;  %v7972_v3 = vld [vmem:[#allocation75_spill] sm:$0xff] }
  0xcd   : > { %7965 = vst [vmem:[#allocation21_spill] sm:$0xff] %v5088_v30  ;;  %7967 = vst [vmem:[#allocation199_spill] sm:$0xff] %v5092_v27  ;;  %v5111_v44 = vmul.f32 %v7972_v3, %v5054_v51  ;;  %v7974_v39 = vld [vmem:[#allocation15_spill] sm:$0xff]  ;;  %v7977_v49 = vld [vmem:[#allocation76_spill] sm:$0xff] }
  0xce   : > { %7968 = vst [vmem:[#allocation200_spill] sm:$0xff] %v5096_v59  ;;  %7969 = vst [vmem:[#allocation201_spill] sm:$0xff] %v5100_v41  ;;  %v5115_v23 = vrot.slane %v7974_v39, %v4177_v6  ;;  %v7976_v34 = vld [vmem:[#allocation23_spill] sm:$0xff]  ;;  %v5122_v10 = vmul.f32 %v7977_v49, %v5069_v43  ;;  %v7978_v41 = vld [vmem:[#allocation77_spill] sm:$0xff]  ;;  %v5141_v49 = vrot.slane %v7974_v39, %v4180_v7 }
  0xcf   : > { %7970 = vst [vmem:[#allocation202_spill] sm:$0xff] %v5103_v24  ;;  %7971 = vst [vmem:[#allocation203_spill] sm:$0xff] %v5106_v38  ;;  %v2098_v22 = vmul.f32 %v5049_v4, %v7976_v34  ;;  %v5126_v59 = vmul.f32 %v7978_v41, %v5072_v55  ;;  %v7979_v3 = vld [vmem:[#allocation78_spill] sm:$0xff]  ;;  %v326_v27 = vld [vmem:[%s4155_s26 + $0x1d0] sm:$0xff]  ;;  %v2609_v43 = vadd.f32 %v2608_v36, %v2097_v40 }
  0xd0   : > { %7973 = vst [vmem:[#allocation204_spill] sm:$0xff] %v5111_v44  ;;  %7975 = vst [vmem:[#allocation15_spill] sm:$0xff] %v5115_v23  ;;  %v5130_v51 = vmul.f32 %v7979_v3, %v5075_v19  ;;  %v3021_v44 = vadd.f32 %v3020_v56, %v2378_v46  ;;  %v327_v34 = vld [vmem:[%s4155_s26 + $0x1d8] sm:$0xff]  ;;  %v328_v60 = vld [vmem:[%s4155_s26 + $0x1e0] sm:$0xff]  ;;  %v5148_v46 = vmul.f32 %v4544_v20, %v5103_v24 }
  0xd1   : > { %v7980_v37 = vld [vmem:[#allocation79_spill] sm:$0xff]  ;;  %7982 = vst [vmem:[#allocation205_spill] sm:$0xff] %v5141_v49  ;;  %v7983_v41 = vld [vmem:[#allocation26_spill] sm:$0xff]  ;;  %v5152_v56 = vmul.f32 %v4548_v9, %v5106_v38  ;;  %v332_v40 = vld [vmem:[%s4155_s26 + $0x200] sm:$0xff]  ;;  %v5166_v20 = vrot.slane %v7974_v39, %v4183_v8  ;;  %v2610_v24 = vadd.f32 %v2609_v43, %v2098_v22 }
  0xd2   : > { %v5137_v4 = vmul.f32 %v7980_v37, %v5088_v30  ;;  %v2099_v55 = vmul.f32 %v5083_v16, %v7983_v41  ;;  %v329_v3 = vld [vmem:[%s4155_s26 + $0x1e8] sm:$0xff]  ;;  %7984 = vst [vmem:[#allocation26_spill] sm:$0xff] %v5148_v46  ;;  %v7986_v37 = vld [vmem:[#allocation83_spill] sm:$0xff]  ;;  %v3022_v19 = vadd.f32 %v3021_v44, %v4960_v29  ;;  %v331_v41 = vld [vmem:[%s4155_s26 + $0x1f8] sm:$0xff] }
  0xd3   : > { %7985 = vst [vmem:[#allocation206_spill] sm:$0xff] %v5152_v56  ;;  %v5155_v30 = vmul.f32 %v7986_v37, %v324_v17  ;;  %v7988_v36 = vld [vmem:[#allocation84_spill] sm:$0xff]  ;;  %7990 = vst [vmem:[#allocation209_spill] sm:$0xff] %v5166_v20  ;;  %v7991_v9 = vld [vmem:[#allocation31_spill] sm:$0xff] }
  0xd4   : > { %7981 = vst [vmem:[#allocation23_spill] sm:$0xff] %v5137_v4  ;;  %v330_v4 = vld [vmem:[%s4155_s26 + $0x1f0] sm:$0xff]  ;;  %v5162_v16 = vmul.f32 %v7988_v36, %v325_v25  ;;  %v2100_v38 = vmul.f32 %v5115_v23, %v7991_v9  ;;  %v333_v17 = vld [vmem:[%s4155_s26 + $0x208] sm:$0xff]  ;;  %v7992_v37 = vld [vmem:[#allocation85_spill] sm:$0xff]  ;;  %v5178_v25 = vmul.f32 %v4573_v2, %v328_v60  ;;  %v3023_v36 = vadd.f32 %v3022_v19, %v4973_v1 }
  0xd5   : > { %7987 = vst [vmem:[#allocation207_spill] sm:$0xff] %v5155_v30  ;;  %v5172_v30 = vmul.f32 %v7992_v37, %v326_v27  ;;  %v7993_v29 = vld [vmem:[#allocation86_spill] sm:$0xff]  ;;  %v335_v56 = vld [vmem:[%s4155_s26 + $0x218] sm:$0xff]  ;;  %v336_v46 = vld [vmem:[%s4155_s26 + $0x220] sm:$0xff]  ;;  %v5189_v27 = vrot.slane %v7974_v39, %v4188_v11  ;;  %v2611_v23 = vadd.f32 %v2610_v24, %v2099_v55  ;;  %v5198_v1 = vmul.f32 %v4585_v5, %v331_v41 }
  0xd6   : > { %7989 = vst [vmem:[#allocation208_spill] sm:$0xff] %v5162_v16  ;;  %v5175_v44 = vmul.f32 %v7993_v29, %v327_v34  ;;  %7994 = vst [vmem:[#allocation31_spill] sm:$0xff] %v5178_v25  ;;  %v334_v16 = vld [vmem:[%s4155_s26 + $0x210] sm:$0xff]  ;;  %v7995_v9 = vld [vmem:[#allocation89_spill] sm:$0xff] }
  0xd7   : > { %v5185_v22 = vmul.f32 %v7995_v9, %v329_v3  ;;  %7997 = vst [vmem:[#allocation211_spill] sm:$0xff] %v5189_v27  ;;  %v7998_v43 = vld [vmem:[#allocation38_spill] sm:$0xff]  ;;  %v8000_v19 = vld [vmem:[#allocation92_spill] sm:$0xff]  ;;  %v3024_v9 = vadd.f32 %v3023_v36, %v4977_v12  ;;  %v338_v37 = vld [vmem:[%s4155_s26 + $0x230] sm:$0xff] }
  0xd8   : > { %v2101_v34 = vmul.f32 %v5141_v49, %v7998_v43  ;;  %v337_v60 = vld [vmem:[%s4155_s26 + $0x228] sm:$0xff]  ;;  %v5201_v3 = vmul.f32 %v8000_v19, %v332_v40  ;;  %v340_v25 = vld [vmem:[%s4155_s26 + $0x240] sm:$0xff]  ;;  %v2612_v49 = vadd.f32 %v2611_v23, %v2100_v38  ;;  %v5218_v19 = vmul.f32 %v4602_v13, %v334_v16  ;;  %v8006_v12 = vld [vmem:[#allocation96_spill] sm:$0xff] }
  0xd9   : > { %7996 = vst [vmem:[#allocation210_spill] sm:$0xff] %v5185_v22  ;;  %v7999_v2 = vld [vmem:[#allocation90_spill] sm:$0xff]  ;;  %v339_v22 = vld [vmem:[%s4155_s26 + $0x238] sm:$0xff]  ;;  %v8002_v43 = vld [vmem:[#allocation93_spill] sm:$0xff]  ;;  %v5221_v36 = vmul.f32 %v8006_v12, %v335_v56  ;;  %v5235_v16 = vrot.slane %v7974_v39, %v4229_v33 }
  0xda   : > { %v5195_v29 = vmul.f32 %v7999_v2, %v330_v4  ;;  %8001 = vst [vmem:[#allocation38_spill] sm:$0xff] %v5201_v3  ;;  %v5208_v55 = vmul.f32 %v8002_v43, %v333_v17  ;;  %v5212_v4 = vrot.slane %v7974_v39, %v4210_v21  ;;  %v8005_v24 = vld [vmem:[#allocation45_spill] sm:$0xff]  ;;  %v341_v40 = vld [vmem:[%s4155_s26 + $0x248] sm:$0xff]  ;;  %v3025_v43 = vadd.f32 %v3024_v9, %v4990_v18  ;;  %v342_v2 = vld [vmem:[%s4155_s26 + $0x250] sm:$0xff] }
  0xdb   : > { %v2102_v41 = vmul.f32 %v5166_v20, %v8005_v24  ;;  %v8007_v5 = vld [vmem:[#allocation97_spill] sm:$0xff]  ;;  %v8008_v24 = vld [vmem:[#allocation98_spill] sm:$0xff]  ;;  %8010 = vst [vmem:[#allocation214_spill] sm:$0xff] %v5235_v16  ;;  %v8011_v38 = vld [vmem:[#allocation52_spill] sm:$0xff]  ;;  %v2613_v20 = vadd.f32 %v2612_v49, %v2101_v34  ;;  %v5244_v18 = vmul.f32 %v4622_v53, %v339_v22  ;;  %v5247_v9 = vmul.f32 %v4631_v45, %v340_v25 }
  0xdc   : > { %8003 = vst [vmem:[#allocation212_spill] sm:$0xff] %v5208_v55  ;;  %8004 = vst [vmem:[#allocation213_spill] sm:$0xff] %v5212_v4  ;;  %v5224_v17 = vmul.f32 %v8007_v5, %v336_v46  ;;  %v343_v55 = vld [vmem:[%s4155_s26 + $0x258] sm:$0xff]  ;;  %v344_v3 = vld [vmem:[%s4155_s26 + $0x260] sm:$0xff]  ;;  %v5231_v23 = vmul.f32 %v8008_v24, %v337_v60  ;;  %v2103_v56 = vmul.f32 %v5189_v27, %v8011_v38 }
  0xdd   : > { %v345_v46 = vld [vmem:[%s4155_s26 + $0x268] sm:$0xff]  ;;  %v8012_v5 = vld [vmem:[#allocation99_spill] sm:$0xff]  ;;  %8013 = vst [vmem:[#allocation52_spill] sm:$0xff] %v5244_v18  ;;  %8014 = vst [vmem:[#allocation215_spill] sm:$0xff] %v5247_v9  ;;  %v3026_v60 = vadd.f32 %v3025_v43, %v4994_v58  ;;  %v2614_v27 = vadd.f32 %v2613_v20, %v2102_v41 }
  0xde   : > { %8009 = vst [vmem:[#allocation45_spill] sm:$0xff] %v5231_v23  ;;  %v5241_v12 = vmul.f32 %v8012_v5, %v338_v37  ;;  %v346_v24 = vld [vmem:[%s4155_s26 + $0x270] sm:$0xff]  ;;  %v347_v13 = vld [vmem:[%s4155_s26 + $0x278] sm:$0xff]  ;;  %v348_v23 = vld [vmem:[%s4155_s26 + $0x280] sm:$0xff]  ;;  %v5258_v37 = vrot.slane %v7974_v39, %v4255_v50 }
  0xdf   : > { %v8015_v38 = vld [vmem:[#allocation103_spill] sm:$0xff]  ;;  %v349_v25 = vld [vmem:[%s4155_s26 + $0x288] sm:$0xff]  ;;  %v8019_v45 = vld [vmem:[#allocation104_spill] sm:$0xff] }
  0xe0   : > { %v5254_v49 = vmul.f32 %v8015_v38, %v341_v40  ;;  %8017 = vst [vmem:[#allocation217_spill] sm:$0xff] %v5258_v37  ;;  %v8018_v22 = vld [vmem:[#allocation59_spill] sm:$0xff]  ;;  %v5264_v53 = vmul.f32 %v8019_v45, %v342_v2  ;;  %v8020_v58 = vld [vmem:[#allocation105_spill] sm:$0xff]  ;;  %v8021_v5 = vld [vmem:[#allocation106_spill] sm:$0xff]  ;;  %v3027_v38 = vadd.f32 %v3026_v60, %v4998_v48  ;;  %v5281_v2 = vrot.slane %v7974_v39, %v4278_v61 }
  0xe1   : > { %v2104_v34 = vmul.f32 %v5212_v4, %v8018_v22  ;;  %v5267_v43 = vmul.f32 %v8020_v58, %v343_v55  ;;  %v5270_v40 = vmul.f32 %v8021_v5, %v344_v3  ;;  %v351_v9 = vld [vmem:[%s4155_s26 + $0x298] sm:$0xff]  ;;  %v352_v18 = vld [vmem:[%s4155_s26 + $0x2a0] sm:$0xff]  ;;  %v8022_v22 = vld [vmem:[#allocation107_spill] sm:$0xff]  ;;  %v2615_v4 = vadd.f32 %v2614_v27, %v2103_v56 }
  0xe2   : > { %8016 = vst [vmem:[#allocation216_spill] sm:$0xff] %v5254_v49  ;;  %v350_v49 = vld [vmem:[%s4155_s26 + $0x290] sm:$0xff]  ;;  %v5277_v20 = vmul.f32 %v8022_v22, %v345_v46  ;;  %8023 = vst [vmem:[#allocation59_spill] sm:$0xff] %v5281_v2  ;;  %v8024_v55 = vld [vmem:[#allocation66_spill] sm:$0xff]  ;;  %v5287_v5 = vmul.f32 %v4660_v52, %v346_v24  ;;  %v5290_v48 = vmul.f32 %v4664_v15, %v347_v13 }
  0xe3   : > { %v2105_v41 = vmul.f32 %v5235_v16, %v8024_v55  ;;  %v353_v3 = vld [vmem:[%s4155_s26 + $0x2a8] sm:$0xff]  ;;  %v8026_v60 = vld [vmem:[#allocation111_spill] sm:$0xff]  ;;  %v3028_v39 = vadd.f32 %v3027_v38, %v5011_v32  ;;  %v355_v58 = vld [vmem:[%s4155_s26 + $0x2b8] sm:$0xff]  ;;  %v2616_v15 = vadd.f32 %v2615_v4, %v2104_v34 }
  0xe4   : > { %8025 = vst [vmem:[#allocation66_spill] sm:$0xff] %v5290_v48  ;;  %v5293_v46 = vmul.f32 %v8026_v60, %v348_v23  ;;  %v354_v22 = vld [vmem:[%s4155_s26 + $0x2b0] sm:$0xff]  ;;  %v356_v45 = vld [vmem:[%s4155_s26 + $0x2c0] sm:$0xff]  ;;  %v8028_v55 = vld [vmem:[#allocation112_spill] sm:$0xff] }
  0xe5   : > { %v5300_v27 = vmul.f32 %v8028_v55, %v349_v25  ;;  %v8030_v24 = vld [vmem:[#allocation18_spill] sm:$0xff]  ;;  %v8032_v13 = vld [vmem:[#allocation73_spill] sm:$0xff]  ;;  %v5316_v25 = vmul.f32 %v4689_v57, %v352_v18  ;;  %v3029_v55 = vadd.f32 %v3028_v39, %v5024_v63  ;;  %v5336_v63 = vmul.f32 %v4701_v47, %v355_v58  ;;  %v8042_v39 = vld [vmem:[#allocation120_spill] sm:$0xff] }
  0xe6   : > { %8027 = vst [vmem:[#allocation218_spill] sm:$0xff] %v5293_v46  ;;  %v5304_v56 = vrot.slane %v8030_v24, %v4177_v6  ;;  %v2106_v16 = vmul.f32 %v5258_v37, %v8032_v13  ;;  %v357_v23 = vld [vmem:[%s4155_s26 + $0x2c8] sm:$0xff]  ;;  %v8033_v60 = vld [vmem:[#allocation113_spill] sm:$0xff]  ;;  %v359_v46 = vld [vmem:[%s4155_s26 + $0x2d8] sm:$0xff]  ;;  %v2617_v37 = vadd.f32 %v2616_v15, %v2105_v41 }
  0xe7   : > { %8029 = vst [vmem:[#allocation219_spill] sm:$0xff] %v5300_v27  ;;  %v5310_v52 = vmul.f32 %v8033_v60, %v350_v49  ;;  %v8034_v32 = vld [vmem:[#allocation114_spill] sm:$0xff]  ;;  %8035 = vst [vmem:[#allocation73_spill] sm:$0xff] %v5316_v25  ;;  %v358_v27 = vld [vmem:[%s4155_s26 + $0x2d0] sm:$0xff]  ;;  %v5327_v49 = vrot.slane %v8030_v24, %v4180_v7 }
  0xe8   : > { %8031 = vst [vmem:[#allocation18_spill] sm:$0xff] %v5304_v56  ;;  %v5313_v38 = vmul.f32 %v8034_v32, %v351_v9  ;;  %v360_v48 = vld [vmem:[%s4155_s26 + $0x2e0] sm:$0xff]  ;;  %v8039_v9 = vld [vmem:[#allocation80_spill] sm:$0xff]  ;;  %v361_v18 = vld [vmem:[%s4155_s26 + $0x2e8] sm:$0xff] }
  0xe9   : > { %v8036_v13 = vld [vmem:[#allocation117_spill] sm:$0xff]  ;;  %8038 = vst [vmem:[#allocation221_spill] sm:$0xff] %v5327_v49  ;;  %v2107_v34 = vmul.f32 %v5281_v2, %v8039_v9  ;;  %v8040_v57 = vld [vmem:[#allocation118_spill] sm:$0xff]  ;;  %8041 = vst [vmem:[#allocation80_spill] sm:$0xff] %v5336_v63  ;;  %v2618_v2 = vadd.f32 %v2617_v37, %v2106_v16  ;;  %v5373_v37 = vrot.slane %v8030_v24, %v4188_v11 }
  0xea   : > { %v5323_v4 = vmul.f32 %v8036_v13, %v353_v3  ;;  %v5333_v32 = vmul.f32 %v8040_v57, %v354_v22  ;;  %v5339_v3 = vmul.f32 %v8042_v39, %v356_v45  ;;  %v3030_v13 = vadd.f32 %v3029_v55, %v5028_v26  ;;  %v362_v60 = vld [vmem:[%s4155_s26 + $0x2f0] sm:$0xff]  ;;  %v364_v25 = vld [vmem:[%s4155_s26 + $0x300] sm:$0xff]  ;;  %v365_v45 = vld [vmem:[%s4155_s26 + $0x308] sm:$0xff] }
  0xeb   : > { %v8044_v9 = vld [vmem:[#allocation121_spill] sm:$0xff]  ;;  %v5350_v22 = vrot.slane %v8030_v24, %v4183_v8  ;;  %v8047_v58 = vld [vmem:[#allocation87_spill] sm:$0xff]  ;;  %v5356_v39 = vmul.f32 %v4718_v54, %v358_v27  ;;  %v8049_v26 = vld [vmem:[#allocation124_spill] sm:$0xff]  ;;  %8055 = vst [vmem:[#allocation228_spill] sm:$0xff] %v5373_v37 }
  0xec   : > { %8037 = vst [vmem:[#allocation220_spill] sm:$0xff] %v5323_v4  ;;  %8043 = vst [vmem:[#allocation222_spill] sm:$0xff] %v5339_v3  ;;  %v363_v4 = vld [vmem:[%s4155_s26 + $0x2f8] sm:$0xff]  ;;  %v5346_v15 = vmul.f32 %v8044_v9, %v357_v23  ;;  %v2108_v41 = vmul.f32 %v5304_v56, %v8047_v58  ;;  %v5359_v55 = vmul.f32 %v8049_v26, %v359_v46  ;;  %v8051_v47 = vld [vmem:[#allocation125_spill] sm:$0xff] }
  0xed   : > { %8046 = vst [vmem:[#allocation224_spill] sm:$0xff] %v5350_v22  ;;  %8048 = vst [vmem:[#allocation87_spill] sm:$0xff] %v5356_v39  ;;  %v5362_v23 = vmul.f32 %v8051_v47, %v360_v48  ;;  %v3031_v9 = vadd.f32 %v3030_v13, %v5032_v28  ;;  %v366_v57 = vld [vmem:[%s4155_s26 + $0x310] sm:$0xff]  ;;  %v368_v3 = vld [vmem:[%s4155_s26 + $0x320] sm:$0xff]  ;;  %v2619_v26 = vadd.f32 %v2618_v2, %v2107_v34 }
  0xee   : > { %8045 = vst [vmem:[#allocation223_spill] sm:$0xff] %v5346_v15  ;;  %8050 = vst [vmem:[#allocation225_spill] sm:$0xff] %v5359_v55  ;;  %v367_v15 = vld [vmem:[%s4155_s26 + $0x318] sm:$0xff]  ;;  %v8053_v58 = vld [vmem:[#allocation126_spill] sm:$0xff]  ;;  %v5382_v28 = vmul.f32 %v4738_v0, %v363_v4 }
  0xef   : > { %8052 = vst [vmem:[#allocation226_spill] sm:$0xff] %v5362_v23  ;;  %v5369_v16 = vmul.f32 %v8053_v58, %v361_v18  ;;  %v8056_v46 = vld [vmem:[#allocation94_spill] sm:$0xff]  ;;  %v8057_v47 = vld [vmem:[#allocation127_spill] sm:$0xff]  ;;  %v3032_v58 = vadd.f32 %v3031_v9, %v5045_v31  ;;  %v372_v23 = vld [vmem:[%s4155_s26 + $0x340] sm:$0xff]  ;;  %v2620_v0 = vadd.f32 %v2619_v26, %v2108_v41 }
  0xf0   : > { %v2109_v27 = vmul.f32 %v5327_v49, %v8056_v46  ;;  %v369_v48 = vld [vmem:[%s4155_s26 + $0x328] sm:$0xff]  ;;  %v5379_v54 = vmul.f32 %v8057_v47, %v362_v60  ;;  %8059 = vst [vmem:[#allocation229_spill] sm:$0xff] %v5382_v28  ;;  %v370_v56 = vld [vmem:[%s4155_s26 + $0x330] sm:$0xff]  ;;  %v5396_v60 = vrot.slane %v8030_v24, %v4210_v21  ;;  %v8065_v4 = vld [vmem:[#allocation101_spill] sm:$0xff] }
  0xf1   : > { %8054 = vst [vmem:[#allocation227_spill] sm:$0xff] %v5369_v16  ;;  %v8060_v13 = vld [vmem:[#allocation130_spill] sm:$0xff]  ;;  %v371_v16 = vld [vmem:[%s4155_s26 + $0x338] sm:$0xff]  ;;  %v8062_v46 = vld [vmem:[#allocation131_spill] sm:$0xff]  ;;  %v2110_v34 = vmul.f32 %v5350_v22, %v8065_v4 }
  0xf2   : > { %8058 = vst [vmem:[#allocation94_spill] sm:$0xff] %v5379_v54  ;;  %v5385_v18 = vmul.f32 %v8060_v13, %v364_v25  ;;  %v5392_v2 = vmul.f32 %v8062_v46, %v365_v45  ;;  %8064 = vst [vmem:[#allocation232_spill] sm:$0xff] %v5396_v60  ;;  %v373_v25 = vld [vmem:[%s4155_s26 + $0x348] sm:$0xff]  ;;  %v8066_v13 = vld [vmem:[#allocation132_spill] sm:$0xff]  ;;  %v3033_v46 = vadd.f32 %v3032_v58, %v5058_v14 }
  0xf3   : > { %v5402_v47 = vmul.f32 %v8066_v13, %v366_v57  ;;  %v8068_v31 = vld [vmem:[#allocation133_spill] sm:$0xff]  ;;  %v8070_v49 = vld [vmem:[#allocation134_spill] sm:$0xff]  ;;  %v8072_v4 = vld [vmem:[#allocation135_spill] sm:$0xff]  ;;  %v5419_v57 = vrot.slane %v8030_v24, %v4229_v33 }
  0xf4   : > { %8061 = vst [vmem:[#allocation230_spill] sm:$0xff] %v5385_v18  ;;  %8063 = vst [vmem:[#allocation231_spill] sm:$0xff] %v5392_v2  ;;  %v5405_v9 = vmul.f32 %v8068_v31, %v367_v15  ;;  %v5408_v45 = vmul.f32 %v8070_v49, %v368_v3  ;;  %v374_v2 = vld [vmem:[%s4155_s26 + $0x350] sm:$0xff]  ;;  %v375_v18 = vld [vmem:[%s4155_s26 + $0x358] sm:$0xff]  ;;  %v5415_v41 = vmul.f32 %v8072_v4, %v369_v48 }
  0xf5   : > { %8067 = vst [vmem:[#allocation101_spill] sm:$0xff] %v5402_v47  ;;  %v376_v28 = vld [vmem:[%s4155_s26 + $0x360] sm:$0xff]  ;;  %8074 = vst [vmem:[#allocation236_spill] sm:$0xff] %v5419_v57  ;;  %v8075_v15 = vld [vmem:[#allocation108_spill] sm:$0xff]  ;;  %v2621_v3 = vadd.f32 %v2620_v0, %v2109_v27  ;;  %v3034_v4 = vadd.f32 %v3033_v46, %v5062_v62 }
  0xf6   : > { %8069 = vst [vmem:[#allocation233_spill] sm:$0xff] %v5405_v9  ;;  %8071 = vst [vmem:[#allocation234_spill] sm:$0xff] %v5408_v45  ;;  %v2111_v26 = vmul.f32 %v5373_v37, %v8075_v15  ;;  %v377_v49 = vld [vmem:[%s4155_s26 + $0x368] sm:$0xff]  ;;  %v8076_v31 = vld [vmem:[#allocation137_spill] sm:$0xff] }
  0xf7   : > { %8073 = vst [vmem:[#allocation235_spill] sm:$0xff] %v5415_v41  ;;  %v5425_v13 = vmul.f32 %v8076_v31, %v370_v56  ;;  %v8078_v14 = vld [vmem:[#allocation138_spill] sm:$0xff]  ;;  %v8080_v22 = vld [vmem:[#allocation139_spill] sm:$0xff]  ;;  %v379_v45 = vld [vmem:[%s4155_s26 + $0x378] sm:$0xff]  ;;  %v5442_v56 = vrot.slane %v8030_v24, %v4255_v50  ;;  %v3035_v37 = vadd.f32 %v3034_v4, %v5066_v35 }
  0xf8   : > { %v5428_v58 = vmul.f32 %v8078_v14, %v371_v16  ;;  %v5431_v48 = vmul.f32 %v8080_v22, %v372_v23  ;;  %v378_v41 = vld [vmem:[%s4155_s26 + $0x370] sm:$0xff]  ;;  %v380_v9 = vld [vmem:[%s4155_s26 + $0x380] sm:$0xff]  ;;  %v8082_v15 = vld [vmem:[#allocation140_spill] sm:$0xff]  ;;  %v2622_v14 = vadd.f32 %v2621_v3, %v2110_v34 }
  0xf9   : > { %8077 = vst [vmem:[#allocation108_spill] sm:$0xff] %v5425_v13  ;;  %v5438_v0 = vmul.f32 %v8082_v15, %v373_v25  ;;  %8084 = vst [vmem:[#allocation240_spill] sm:$0xff] %v5442_v56  ;;  %v8085_v16 = vld [vmem:[#allocation115_spill] sm:$0xff]  ;;  %v381_v23 = vld [vmem:[%s4155_s26 + $0x388] sm:$0xff] }
  0xfa   : > { %8079 = vst [vmem:[#allocation237_spill] sm:$0xff] %v5428_v58  ;;  %8081 = vst [vmem:[#allocation238_spill] sm:$0xff] %v5431_v48  ;;  %v2112_v27 = vmul.f32 %v5396_v60, %v8085_v16  ;;  %v8086_v22 = vld [vmem:[#allocation141_spill] sm:$0xff]  ;;  %v8088_v46 = vld [vmem:[#allocation142_spill] sm:$0xff] }
  0xfb   : > { %8083 = vst [vmem:[#allocation239_spill] sm:$0xff] %v5438_v0  ;;  %v5448_v62 = vmul.f32 %v8086_v22, %v374_v2  ;;  %v5451_v31 = vmul.f32 %v8088_v46, %v375_v18  ;;  %v8090_v25 = vld [vmem:[#allocation144_spill] sm:$0xff]  ;;  %v382_v0 = vld [vmem:[%s4155_s26 + $0x390] sm:$0xff]  ;;  %v8092_v34 = vld [vmem:[#allocation145_spill] sm:$0xff]  ;;  %v5464_v2 = vrot.slane %v8030_v24, %v4278_v61  ;;  %v2623_v46 = vadd.f32 %v2622_v14, %v2111_v26 }
  0xfc   : > { %v5454_v15 = vmul.f32 %v8090_v25, %v376_v28  ;;  %v383_v16 = vld [vmem:[%s4155_s26 + $0x398] sm:$0xff]  ;;  %v5460_v3 = vmul.f32 %v8092_v34, %v377_v49  ;;  %v8095_v22 = vld [vmem:[#allocation122_spill] sm:$0xff]  ;;  %v8098_v28 = vld [vmem:[#allocation147_spill] sm:$0xff]  ;;  %v3036_v49 = vadd.f32 %v3035_v37, %v5079_v42 }
  0xfd   : > { %8087 = vst [vmem:[#allocation115_spill] sm:$0xff] %v5448_v62  ;;  %8089 = vst [vmem:[#allocation241_spill] sm:$0xff] %v5451_v31  ;;  %v2113_v18 = vmul.f32 %v5419_v57, %v8095_v22  ;;  %v8096_v60 = vld [vmem:[#allocation146_spill] sm:$0xff]  ;;  %v5472_v25 = vmul.f32 %v8098_v28, %v379_v45  ;;  %v8100_v35 = vld [vmem:[#allocation148_spill] sm:$0xff] }
  0xfe   : > { %8091 = vst [vmem:[#allocation242_spill] sm:$0xff] %v5454_v15  ;;  %8093 = vst [vmem:[#allocation243_spill] sm:$0xff] %v5460_v3  ;;  %v5469_v31 = vmul.f32 %v8096_v60, %v378_v41  ;;  %v5475_v4 = vmul.f32 %v8100_v35, %v380_v9  ;;  %v396_v34 = vld [vmem:[%s4155_s26 + $0x400] sm:$0x3]  ;;  %v397_v24 = vld [vmem:[%s4155_s26 + $0x408] sm:$0x3]  ;;  %v2624_v35 = vadd.f32 %v2623_v46, %v2112_v27 }
  0xff   : > { %8094 = vst [vmem:[#allocation244_spill] sm:$0xff] %v5464_v2  ;;  %8099 = vst [vmem:[#allocation245_spill] sm:$0xff] %v5472_v25  ;;  %v384_v3 = vld [vmem:[%s4155_s26 + $0x3a0] sm:$0xff]  ;;  %v385_v15 = vld [vmem:[%s4155_s26 + $0x3a8] sm:$0xff] }
 0x100   : > { %8097 = vst [vmem:[#allocation122_spill] sm:$0xff] %v5469_v31  ;;  %8101 = vst [vmem:[#allocation246_spill] sm:$0xff] %v5475_v4  ;;  %v386_v22 = vld [vmem:[%s4155_s26 + $0x3b0] sm:$0xff]  ;;  %v8102_v26 = vld [vmem:[#allocation149_spill] sm:$0xff]  ;;  %v2625_v27 = vadd.f32 %v2624_v35, %v2113_v18 }
 0x101   : > { %v5484_v14 = vmul.f32 %v8102_v26, %v381_v23  ;;  %v8104_v41 = vld [vmem:[#allocation19_spill] sm:$0xff]  ;;  %v8106_v28 = vld [vmem:[#allocation129_spill] sm:$0xff]  ;;  %v8109_v37 = vld [vmem:[#allocation152_spill] sm:$0xff] }
 0x102   : > { %v5488_v45 = vrot.slane %v8104_v41, %v4177_v6  ;;  %v2114_v9 = vmul.f32 %v5442_v56, %v8106_v28  ;;  %v8107_v60 = vld [vmem:[#allocation151_spill] sm:$0xff]  ;;  %v5496_v57 = vmul.f32 %v8109_v37, %v383_v16  ;;  %v5501_v23 = vrot.slane %v8104_v41, %v4180_v7  ;;  %v8113_v31 = vld [vmem:[#allocation136_spill] sm:$0xff]  ;;  %v8116_v37 = vld [vmem:[#allocation153_spill] sm:$0xff] }
 0x103   : > { %8103 = vst [vmem:[#allocation247_spill] sm:$0xff] %v5484_v14  ;;  %v5493_v42 = vmul.f32 %v8107_v60, %v382_v0  ;;  %v8111_v4 = vld [vmem:[#allocation199_spill] sm:$0xff]  ;;  %v387_v14 = vld [vmem:[%s4155_s26 + $0x3b8] sm:$0xff]  ;;  %v2115_v28 = vmul.f32 %v5464_v2, %v8113_v31  ;;  %v388_v31 = vld [vmem:[%s4155_s26 + $0x3c0] sm:$0xff]  ;;  %v5523_v18 = vrot.slane %v8104_v41, %v4183_v8 }
 0x104   : > { %8105 = vst [vmem:[#allocation19_spill] sm:$0xff] %v5488_v45  ;;  %8110 = vst [vmem:[#allocation248_spill] sm:$0xff] %v5496_v57  ;;  %v3037_v25 = vadd.f32 %v3036_v49, %v8111_v4  ;;  %v398_v26 = vld [vmem:[%s4155_s26 + $0x410] sm:$0x3]  ;;  %v399_v46 = vld [vmem:[%s4155_s26 + $0x418] sm:$0x3]  ;;  %v5511_v57 = vmul.f32 %v8116_v37, %v384_v3 }
 0x105   : > { %8108 = vst [vmem:[#allocation129_spill] sm:$0xff] %v5493_v42  ;;  %8112 = vst [vmem:[#allocation199_spill] sm:$0xff] %v5501_v23  ;;  %v8114_v56 = vld [vmem:[#allocation11_spill] sm:$0xff]  ;;  %v8115_v60 = vld [vmem:[#allocation12_spill] sm:$0xff] }
 0x106   : > { %v2476_v0 = vmul.f32 %v8114_v56, %v396_v34  ;;  %v2477_v16 = vmul.f32 %v8115_v60, %v397_v24  ;;  %8117 = vst [vmem:[#allocation136_spill] sm:$0xff] %v5511_v57  ;;  %v8118_v4 = vld [vmem:[#allocation154_spill] sm:$0xff]  ;;  %v8120_v42 = vld [vmem:[#allocation155_spill] sm:$0xff]  ;;  %v8122_v48 = vld [vmem:[#allocation200_spill] sm:$0xff]  ;;  %v2626_v34 = vadd.f32 %v2625_v27, %v2114_v9 }
 0x107   : > { %v5514_v49 = vmul.f32 %v8118_v4, %v385_v15  ;;  %v5517_v62 = vmul.f32 %v8120_v42, %v386_v22  ;;  %v3038_v58 = vadd.f32 %v3037_v25, %v8122_v48  ;;  %8123 = vst [vmem:[#allocation200_spill] sm:$0xff] %v5523_v18  ;;  %v8124_v56 = vld [vmem:[#allocation143_spill] sm:$0xff]  ;;  %v400_v3 = vld [vmem:[%s4155_s26 + $0x420] sm:$0x3]  ;;  %v8126_v24 = vld [vmem:[#allocation156_spill] sm:$0xff]  ;;  %v5535_v48 = vrot.slane %v8104_v41, %v4188_v11 }
 0x108   : > { %v2116_v60 = vmul.f32 %v5488_v45, %v8124_v56  ;;  %v8125_v35 = vld [vmem:[#allocation13_spill] sm:$0xff]  ;;  %v5530_v4 = vmul.f32 %v8126_v24, %v387_v14  ;;  %v8130_v25 = vld [vmem:[#allocation14_spill] sm:$0xff]  ;;  %v2627_v27 = vadd.f32 %v2626_v34, %v2115_v28  ;;  %v3122_v14 = vsel %vm2734_vm1, %v2477_v16, 0.0  ;;  %v8226_v54 = vld [vmem:[#allocation187_spill] sm:$0xff] }
 0x109   : > { %8119 = vst [vmem:[#allocation11_spill] sm:$0xff] %v5514_v49  ;;  %8121 = vst [vmem:[#allocation12_spill] sm:$0xff] %v5517_v62  ;;  %v2478_v15 = vmul.f32 %v8125_v35, %v398_v26  ;;  %v8128_v22 = vld [vmem:[#allocation201_spill] sm:$0xff]  ;;  %v2479_v37 = vmul.f32 %v8130_v25, %v399_v46  ;;  %v389_v2 = vld [vmem:[%s4155_s26 + $0x3c8] sm:$0xff]  ;;  %v3121_v26 = vsel %vm2734_vm1, %v2476_v0, 0.0  ;;  %v5550_v45 = vrot.slane %v8104_v41, %v4210_v21 }
 0x10a   : > { %8127 = vst [vmem:[#allocation143_spill] sm:$0xff] %v5530_v4  ;;  %v3039_v42 = vadd.f32 %v3038_v58, %v8128_v22  ;;  %8129 = vst [vmem:[#allocation13_spill] sm:$0xff] %v5535_v48  ;;  %v8131_v62 = vld [vmem:[#allocation150_spill] sm:$0xff]  ;;  %v8132_v35 = vld [vmem:[#allocation159_spill] sm:$0xff]  ;;  %v2628_v0 = vadd.f32 %v2627_v27, %v2116_v60  ;;  %v3123_v4 = vadd.f32 %v3122_v14, %v3121_v26 }
 0x10b   : > { %v2117_v9 = vmul.f32 %v5501_v23, %v8131_v62  ;;  %v401_v56 = vld [vmem:[%s4155_s26 + $0x428] sm:$0x3]  ;;  %v5545_v58 = vmul.f32 %v8132_v35, %v388_v31  ;;  %v8134_v22 = vld [vmem:[#allocation204_spill] sm:$0xff]  ;;  %8135 = vst [vmem:[#allocation14_spill] sm:$0xff] %v5550_v45  ;;  %v390_v62 = vld [vmem:[%s4155_s26 + $0x3d0] sm:$0xff]  ;;  %v3124_v16 = vsel %vm2734_vm1, %v2478_v15, 0.0 }
 0x10c   : > { %v3040_v24 = vadd.f32 %v3039_v42, %v8134_v22  ;;  %v8136_v46 = vld [vmem:[#allocation16_spill] sm:$0xff]  ;;  %v8137_v28 = vld [vmem:[#allocation157_spill] sm:$0xff]  ;;  %v402_v23 = vld [vmem:[%s4155_s26 + $0x430] sm:$0x3] }
 0x10d   : > { %8133 = vst [vmem:[#allocation201_spill] sm:$0xff] %v5545_v58  ;;  %v2480_v25 = vmul.f32 %v8136_v46, %v400_v3  ;;  %v2118_v34 = vmul.f32 %v5523_v18, %v8137_v28  ;;  %v8138_v31 = vld [vmem:[#allocation160_spill] sm:$0xff]  ;;  %v3126_v3 = vsel %vm2734_vm1, %v2479_v37, 0.0  ;;  %v5567_v28 = vrot.slane %v8104_v41, %v4229_v33  ;;  %v8142_v60 = vld [vmem:[#allocation158_spill] sm:$0xff]  ;;  %v8249_v39 = vld [vmem:[#allocation193_spill] sm:$0xff] }
 0x10e   : > { %v5559_v35 = vmul.f32 %v8138_v31, %v389_v2  ;;  %v3041_v42 = vadd.f32 %v3040_v24, %v5122_v10  ;;  %v8140_v22 = vld [vmem:[#allocation20_spill] sm:$0xff]  ;;  %v2119_v27 = vmul.f32 %v5535_v48, %v8142_v60  ;;  %v2629_v26 = vadd.f32 %v2628_v0, %v2117_v9  ;;  %v8145_v24 = vld [vmem:[#allocation22_spill] sm:$0xff]  ;;  %v8147_v60 = vld [vmem:[#allocation163_spill] sm:$0xff] }
 0x10f   : > { %v2481_v58 = vmul.f32 %v8140_v22, %v401_v56  ;;  %v391_v46 = vld [vmem:[%s4155_s26 + $0x3d8] sm:$0xff]  ;;  %8141 = vst [vmem:[#allocation204_spill] sm:$0xff] %v5567_v28  ;;  %v3125_v2 = vadd.f32 %v3124_v16, %v3123_v4  ;;  %v2482_v56 = vmul.f32 %v8145_v24, %v402_v23  ;;  %v3128_v37 = vsel %vm2734_vm1, %v2480_v25, 0.0  ;;  %v392_v22 = vld [vmem:[%s4155_s26 + $0x3e0] sm:$0xff]  ;;  %v393_v24 = vld [vmem:[%s4155_s26 + $0x3e8] sm:$0xff] }
 0x110   : > { %8139 = vst [vmem:[#allocation150_spill] sm:$0xff] %v5559_v35  ;;  %v403_v15 = vld [vmem:[%s4155_s26 + $0x438] sm:$0x3]  ;;  %v3042_v10 = vadd.f32 %v3041_v42, %v5126_v59  ;;  %v5581_v18 = vrot.slane %v8104_v41, %v4255_v50  ;;  %v2120_v9 = vmul.f32 %v5550_v45, %v8147_v60  ;;  %v2630_v0 = vadd.f32 %v2629_v26, %v2118_v34  ;;  %v404_v4 = vld [vmem:[%s4155_s26 + $0x440] sm:$0x3]  ;;  %v8152_v60 = vld [vmem:[#allocation166_spill] sm:$0xff] }
 0x111   : > { %v8143_v14 = vld [vmem:[#allocation164_spill] sm:$0xff]  ;;  %v8148_v16 = vld [vmem:[#allocation165_spill] sm:$0xff]  ;;  %v3130_v25 = vsel %vm2734_vm1, %v2481_v58, 0.0  ;;  %v5595_v48 = vrot.slane %v8104_v41, %v4278_v61  ;;  %v2121_v34 = vmul.f32 %v5567_v28, %v8152_v60  ;;  %v3132_v58 = vsel %vm2734_vm1, %v2482_v56, 0.0  ;;  %v394_v45 = vld [vmem:[%s4155_s26 + $0x3f0] sm:$0xff] }
 0x112   : > { %v5573_v31 = vmul.f32 %v8143_v14, %v390_v62  ;;  %8146 = vst [vmem:[#allocation157_spill] sm:$0xff] %v5581_v18  ;;  %v3127_v62 = vadd.f32 %v3126_v3, %v3125_v2  ;;  %v5587_v14 = vmul.f32 %v8148_v16, %v391_v46  ;;  %v3043_v59 = vadd.f32 %v3042_v10, %v5130_v51  ;;  %v8150_v23 = vld [vmem:[#allocation25_spill] sm:$0xff]  ;;  %v405_v3 = vld [vmem:[%s4155_s26 + $0x448] sm:$0x3]  ;;  %v8155_v51 = vld [vmem:[#allocation23_spill] sm:$0xff] }
 0x113   : > { %v2483_v42 = vmul.f32 %v8150_v23, %v403_v15  ;;  %8151 = vst [vmem:[#allocation158_spill] sm:$0xff] %v5595_v48  ;;  %v2631_v26 = vadd.f32 %v2630_v0, %v2119_v27  ;;  %v8153_v2 = vld [vmem:[#allocation169_spill] sm:$0xff]  ;;  %v8156_v10 = vld [vmem:[#allocation27_spill] sm:$0xff]  ;;  %v8157_v41 = vld [vmem:[#allocation24_spill] sm:$0xff] }
 0x114   : > { %8144 = vst [vmem:[#allocation16_spill] sm:$0xff] %v5573_v31  ;;  %8149 = vst [vmem:[#allocation20_spill] sm:$0xff] %v5587_v14  ;;  %v3129_v46 = vadd.f32 %v3128_v37, %v3127_v62  ;;  %v5601_v16 = vmul.f32 %v8153_v2, %v392_v22  ;;  %v3044_v15 = vadd.f32 %v3043_v59, %v8155_v51  ;;  %v8159_v60 = vld [vmem:[#allocation167_spill] sm:$0xff]  ;;  %v8160_v22 = vld [vmem:[#allocation170_spill] sm:$0xff] }
 0x115   : > { %v2484_v23 = vmul.f32 %v8156_v10, %v404_v4  ;;  %v5609_v14 = vrot.slane %v8157_v41, %v4177_v6  ;;  %v2122_v27 = vmul.f32 %v5581_v18, %v8159_v60  ;;  %v2632_v0 = vadd.f32 %v2631_v26, %v2120_v9  ;;  %v406_v37 = vld [vmem:[%s4155_s26 + $0x450] sm:$0x3]  ;;  %v8162_v59 = vld [vmem:[#allocation26_spill] sm:$0xff]  ;;  %v8163_v4 = vld [vmem:[#allocation28_spill] sm:$0xff] }
 0x116   : > { %8154 = vst [vmem:[#allocation22_spill] sm:$0xff] %v5601_v16  ;;  %v3131_v62 = vadd.f32 %v3130_v25, %v3129_v46  ;;  %v5615_v2 = vmul.f32 %v8160_v22, %v393_v24  ;;  %v3045_v51 = vadd.f32 %v3044_v15, %v8162_v59  ;;  %v2485_v10 = vmul.f32 %v8163_v4, %v405_v3  ;;  %v395_v28 = vld [vmem:[%s4155_s26 + $0x3f8] sm:$0xff]  ;;  %v8166_v24 = vld [vmem:[#allocation171_spill] sm:$0xff]  ;;  %v8168_v15 = vld [vmem:[#allocation206_spill] sm:$0xff] }
 0x117   : > { %8158 = vst [vmem:[#allocation163_spill] sm:$0xff] %v5609_v14  ;;  %v3134_v56 = vsel %vm2734_vm1, %v2483_v42, 0.0  ;;  %v5623_v16 = vrot.slane %v8157_v41, %v4180_v7  ;;  %v8165_v31 = vld [vmem:[#allocation168_spill] sm:$0xff]  ;;  %v2633_v26 = vadd.f32 %v2632_v0, %v2121_v34  ;;  %v5629_v60 = vmul.f32 %v8166_v24, %v394_v45  ;;  %v8169_v3 = vld [vmem:[#allocation29_spill] sm:$0xff]  ;;  %v8172_v0 = vld [vmem:[#allocation175_spill] sm:$0xff] }
 0x118   : > { %8161 = vst [vmem:[#allocation25_spill] sm:$0xff] %v5615_v2  ;;  %v2123_v9 = vmul.f32 %v5595_v48, %v8165_v31  ;;  %v407_v25 = vld [vmem:[%s4155_s26 + $0x458] sm:$0x3]  ;;  %v3133_v46 = vadd.f32 %v3132_v58, %v3131_v62  ;;  %v3046_v59 = vadd.f32 %v3045_v51, %v8168_v15  ;;  %v2486_v4 = vmul.f32 %v8169_v3, %v406_v37  ;;  %v8171_v18 = vld [vmem:[#allocation173_spill] sm:$0xff]  ;;  %v8174_v51 = vld [vmem:[#allocation207_spill] sm:$0xff] }
 0x119   : > { %8164 = vst [vmem:[#allocation166_spill] sm:$0xff] %v5623_v16  ;;  %8167 = vst [vmem:[#allocation23_spill] sm:$0xff] %v5629_v60  ;;  %v3136_v42 = vsel %vm2734_vm1, %v2484_v23, 0.0  ;;  %v5636_v22 = vrot.slane %v8157_v41, %v4183_v8  ;;  %v2124_v31 = vmul.f32 %v5609_v14, %v8171_v18  ;;  %v2634_v34 = vadd.f32 %v2633_v26, %v2122_v27  ;;  %v408_v58 = vld [vmem:[%s4155_s26 + $0x460] sm:$0x3]  ;;  %v8175_v37 = vld [vmem:[#allocation30_spill] sm:$0xff] }
 0x11a   : > { %v3135_v45 = vadd.f32 %v3134_v56, %v3133_v46  ;;  %v5642_v62 = vmul.f32 %v8172_v0, %v395_v28  ;;  %v3047_v15 = vadd.f32 %v3046_v59, %v8174_v51  ;;  %v2487_v3 = vmul.f32 %v8175_v37, %v407_v25  ;;  %v8177_v48 = vld [vmem:[#allocation174_spill] sm:$0xff]  ;;  %v8178_v26 = vld [vmem:[#allocation208_spill] sm:$0xff]  ;;  %v3651_v59 = vld.sshfl [vmem:[%s4149_s17 + $0x50] sm:$0xff pattern:$0x75316420] }
 0x11b   : > { %8170 = vst [vmem:[#allocation27_spill] sm:$0xff] %v5636_v22  ;;  %v3138_v23 = vsel %vm2734_vm1, %v2485_v10, 0.0  ;;  %v5649_v24 = vrot.slane %v8157_v41, %v4188_v11  ;;  %v2125_v18 = vmul.f32 %v5623_v16, %v8177_v48  ;;  %v2635_v27 = vadd.f32 %v2634_v34, %v2123_v9  ;;  %v409_v56 = vld [vmem:[%s4155_s26 + $0x468] sm:$0x3]  ;;  %v8179_v37 = vld [vmem:[#allocation32_spill] sm:$0xff]  ;;  %v8254_v63 = vld [vmem:[#allocation17_spill] sm:$0xff] }
 0x11c   : > { %8173 = vst [vmem:[#allocation24_spill] sm:$0xff] %v5642_v62  ;;  %v3137_v28 = vadd.f32 %v3136_v42, %v3135_v45  ;;  %v3048_v46 = vadd.f32 %v3047_v15, %v8178_v26  ;;  %v3652_v51 = vld.sshfl [vmem:[%s4149_s17 + $0x58] sm:$0xff pattern:$0x75316420]  ;;  %v2488_v0 = vmul.f32 %v8179_v37, %v408_v58  ;;  %v3140_v10 = vsel %vm2734_vm1, %v2486_v4, 0.0  ;;  %v8182_v58 = vld [vmem:[#allocation33_spill] sm:$0xff] }
 0x11d   : > { %8176 = vst [vmem:[#allocation167_spill] sm:$0xff] %v5649_v24  ;;  %v650_v25 = vcombine.low %v3651_v59, %v3652_v51  ;;  %v5661_v14 = vrot.slane %v8157_v41, %v4210_v21  ;;  %v8181_v62 = vld [vmem:[#allocation176_spill] sm:$0xff]  ;;  %v2636_v9 = vadd.f32 %v2635_v27, %v2124_v31  ;;  %v410_v42 = vld [vmem:[%s4155_s26 + $0x470] sm:$0x3]  ;;  %v2489_v4 = vmul.f32 %v8182_v58, %v409_v56  ;;  %v8222_v13 = vld [vmem:[#allocation186_spill] sm:$0xff] }
 0x11e   : > { %v2126_v48 = vmul.f32 %v5636_v22, %v8181_v62  ;;  %v3139_v34 = vadd.f32 %v3138_v23, %v3137_v28  ;;  %v3049_v45 = vadd.f32 %v3048_v46, %v5172_v30  ;;  %v3653_v15 = vld.sshfl [vmem:[%s4149_s17 + $0x60] sm:$0xff pattern:$0x75316420]  ;;  %v3654_v26 = vld.sshfl [vmem:[%s4149_s17 + $0x68] sm:$0xff pattern:$0x75316420]  ;;  %v5675_v37 = vrot.slane %v8157_v41, %v4229_v33 }
 0x11f   : > { %8180 = vst [vmem:[#allocation26_spill] sm:$0xff] %v5661_v14  ;;  %v5669_v59 = vcombine.low %v3653_v15, %v3654_v26  ;;  %v3142_v51 = vsel %vm2734_vm1, %v2487_v3, 0.0  ;;  %v8184_v62 = vld [vmem:[#allocation177_spill] sm:$0xff]  ;;  %v2637_v23 = vadd.f32 %v2636_v9, %v2125_v18  ;;  %v3655_v28 = vld.sshfl [vmem:[%s4149_s17 + $0x70] sm:$0xff pattern:$0x75316420]  ;;  %v5688_v58 = vrot.slane %v8157_v41, %v4255_v50 }
 0x120   : > { %8183 = vst [vmem:[#allocation28_spill] sm:$0xff] %v5675_v37  ;;  %v2127_v31 = vmul.f32 %v5649_v24, %v8184_v62  ;;  %v3141_v30 = vadd.f32 %v3140_v10, %v3139_v34  ;;  %v3050_v27 = vadd.f32 %v3049_v45, %v5175_v44  ;;  %v3656_v46 = vld.sshfl [vmem:[%s4149_s17 + $0x78] sm:$0xff pattern:$0x75316420]  ;;  %v8185_v3 = vld [vmem:[#allocation34_spill] sm:$0xff]  ;;  %v3144_v26 = vsel %vm2734_vm1, %v2488_v0, 0.0 }
 0x121   : > { %v5682_v56 = vcombine.low %v3655_v28, %v3656_v46  ;;  %v2490_v15 = vmul.f32 %v8185_v3, %v410_v42  ;;  %8186 = vst [vmem:[#allocation168_spill] sm:$0xff] %v5688_v58  ;;  %v8187_v62 = vld [vmem:[#allocation178_spill] sm:$0xff]  ;;  %v2638_v10 = vadd.f32 %v2637_v23, %v2126_v48  ;;  %v411_v9 = vld [vmem:[%s4155_s26 + $0x478] sm:$0x3]  ;;  %v8188_v44 = vld [vmem:[#allocation31_spill] sm:$0xff]  ;;  %v3146_v3 = vsel %vm2734_vm1, %v2489_v4, 0.0 }
 0x122   : > { %v2128_v18 = vmul.f32 %v5661_v14, %v8187_v62  ;;  %v3143_v34 = vadd.f32 %v3142_v51, %v3141_v30  ;;  %v3051_v45 = vadd.f32 %v3050_v27, %v8188_v44  ;;  %v3657_v24 = vld.sshfl [vmem:[%s4149_s17 + $0x80] sm:$0xff pattern:$0x75316420]  ;;  %v3658_v22 = vld.sshfl [vmem:[%s4149_s17 + $0x88] sm:$0xff pattern:$0x75316420]  ;;  %v5705_v16 = vrot.slane %v8157_v41, %v4278_v61 }
 0x123   : > { %v5696_v28 = vcombine.low %v3657_v24, %v3658_v22  ;;  %v3659_v42 = vld.sshfl [vmem:[%s4149_s17 + $0x90] sm:$0xff pattern:$0x75316420]  ;;  %v3660_v46 = vld.sshfl [vmem:[%s4149_s17 + $0x98] sm:$0xff pattern:$0x75316420]  ;;  %v2639_v23 = vadd.f32 %v2638_v10, %v2127_v31  ;;  %v5711_v22 = vrot.slane %v650_v25, %v4177_v6  ;;  %v5716_v4 = vrot.slane %v650_v25, %v4180_v7 }
 0x124   : > { %v5700_v0 = vcombine.low %v3659_v42, %v3660_v46  ;;  %8189 = vst [vmem:[#allocation206_spill] sm:$0xff] %v5705_v16  ;;  %v8190_v48 = vld [vmem:[#allocation180_spill] sm:$0xff]  ;;  %v3145_v30 = vadd.f32 %v3144_v26, %v3143_v34  ;;  %v8191_v27 = vld [vmem:[#allocation210_spill] sm:$0xff]  ;;  %v8193_v24 = vld [vmem:[#allocation35_spill] sm:$0xff]  ;;  %v3148_v42 = vsel %vm2734_vm1, %v2490_v15, 0.0  ;;  %v5723_v10 = vrot.slane %v650_v25, %v4183_v8 }
 0x125   : > { %v2129_v51 = vmul.f32 %v5675_v37, %v8190_v48  ;;  %v3052_v62 = vadd.f32 %v3051_v45, %v8191_v27  ;;  %8192 = vst [vmem:[#allocation29_spill] sm:$0xff] %v5711_v22  ;;  %v2491_v44 = vmul.f32 %v8193_v24, %v411_v9  ;;  %8194 = vst [vmem:[#allocation173_spill] sm:$0xff] %v5716_v4  ;;  %v8195_v41 = vld [vmem:[#allocation181_spill] sm:$0xff]  ;;  %v8202_v27 = vld [vmem:[#allocation36_spill] sm:$0xff] }
 0x126   : > { %v2130_v46 = vmul.f32 %v5688_v58, %v8195_v41  ;;  %v2640_v14 = vadd.f32 %v2639_v23, %v2128_v18  ;;  %v412_v48 = vld [vmem:[%s4155_s26 + $0x480] sm:$0x3]  ;;  %v3147_v31 = vadd.f32 %v3146_v3, %v3145_v30  ;;  %8196 = vst [vmem:[#allocation207_spill] sm:$0xff] %v5723_v10  ;;  %v5726_v34 = vrot.slane %v650_v25, %v4188_v11  ;;  %v413_v3 = vld [vmem:[%s4155_s26 + $0x488] sm:$0x3] }
 0x127   : > { %v3053_v26 = vadd.f32 %v3052_v62, %v5195_v29  ;;  %v5729_v15 = vrot.slane %v650_v25, %v4210_v21  ;;  %v5732_v9 = vrot.slane %v650_v25, %v4229_v33  ;;  %v5735_v45 = vrot.slane %v650_v25, %v4255_v50  ;;  %v8235_v55 = vld [vmem:[#allocation190_spill] sm:$0xff] }
 0x128   : > { %8197 = vst [vmem:[#allocation30_spill] sm:$0xff] %v5726_v34  ;;  %v2641_v18 = vadd.f32 %v2640_v14, %v2129_v51  ;;  %v3149_v23 = vadd.f32 %v3148_v42, %v3147_v31  ;;  %v5740_v30 = vrot.slane %v650_v25, %v4278_v61  ;;  %v2492_v62 = vmul.f32 %v8202_v27, %v412_v48  ;;  %v8205_v14 = vld [vmem:[#allocation182_spill] sm:$0xff]  ;;  %v414_v42 = vld [vmem:[%s4155_s26 + $0x490] sm:$0x3] }
 0x129   : > { %8198 = vst [vmem:[#allocation174_spill] sm:$0xff] %v5729_v15  ;;  %8199 = vst [vmem:[#allocation208_spill] sm:$0xff] %v5732_v9  ;;  %v3054_v29 = vadd.f32 %v3053_v26, %v5198_v1  ;;  %v3150_v24 = vsel %vm2734_vm1, %v2491_v44, 0.0  ;;  %v5746_v41 = vrot.slane %v5669_v59, %v4177_v6  ;;  %v5750_v58 = vrot.slane %v5669_v59, %v4180_v7  ;;  %v8206_v31 = vld [vmem:[#allocation38_spill] sm:$0xff]  ;;  %v8209_v26 = vld [vmem:[#allocation37_spill] sm:$0xff] }
 0x12a   : > { %8200 = vst [vmem:[#allocation32_spill] sm:$0xff] %v5735_v45  ;;  %8201 = vst [vmem:[#allocation176_spill] sm:$0xff] %v5740_v30  ;;  %v2131_v51 = vmul.f32 %v5705_v16, %v8205_v14  ;;  %v2642_v1 = vadd.f32 %v2641_v18, %v2130_v46  ;;  %v5758_v48 = vrot.slane %v5669_v59, %v4183_v8  ;;  %v8212_v18 = vld [vmem:[#allocation183_spill] sm:$0xff]  ;;  %v415_v14 = vld [vmem:[%s4155_s26 + $0x498] sm:$0x3]  ;;  %v3152_v35 = vsel %vm2734_vm1, %v2492_v62, 0.0 }
 0x12b   : > { %8203 = vst [vmem:[#allocation33_spill] sm:$0xff] %v5746_v41  ;;  %8204 = vst [vmem:[#allocation177_spill] sm:$0xff] %v5750_v58  ;;  %v3055_v25 = vadd.f32 %v3054_v29, %v8206_v31  ;;  %v5762_v44 = vrot.slane %v5669_v59, %v4188_v11  ;;  %v2493_v27 = vmul.f32 %v8209_v26, %v413_v3  ;;  %v8213_v16 = vld [vmem:[#allocation212_spill] sm:$0xff]  ;;  %v8215_v3 = vld [vmem:[#allocation39_spill] sm:$0xff] }
 0x12c   : > { %8207 = vst [vmem:[#allocation34_spill] sm:$0xff] %v5758_v48  ;;  %v5767_v37 = vrot.slane %v5669_v59, %v4210_v21  ;;  %v5771_v46 = vrot.slane %v5669_v59, %v4229_v33  ;;  %v2132_v29 = vmul.f32 %v5711_v22, %v8212_v18  ;;  %v3151_v31 = vadd.f32 %v3150_v24, %v3149_v23  ;;  %v8218_v23 = vld [vmem:[#allocation185_spill] sm:$0xff]  ;;  %v8220_v62 = vld [vmem:[#allocation40_spill] sm:$0xff] }
 0x12d   : > { %8208 = vst [vmem:[#allocation178_spill] sm:$0xff] %v5762_v44  ;;  %v3056_v60 = vadd.f32 %v3055_v25, %v8213_v16  ;;  %v5779_v2 = vrot.slane %v5669_v59, %v4255_v50  ;;  %v2494_v26 = vmul.f32 %v8215_v3, %v414_v42  ;;  %v5785_v49 = vrot.slane %v5669_v59, %v4278_v61  ;;  %v416_v25 = vld [vmem:[%s4155_s26 + $0x4a0] sm:$0x3] }
 0x12e   : > { %8210 = vst [vmem:[#allocation31_spill] sm:$0xff] %v5767_v37  ;;  %8211 = vst [vmem:[#allocation180_spill] sm:$0xff] %v5771_v46  ;;  %v5789_v18 = vrot.slane %v5682_v56, %v4177_v6  ;;  %v2133_v16 = vmul.f32 %v5716_v4, %v8218_v23  ;;  %v2643_v24 = vadd.f32 %v2642_v1, %v2131_v51  ;;  %v3154_v59 = vsel %vm2734_vm1, %v2493_v27, 0.0  ;;  %v417_v1 = vld [vmem:[%s4155_s26 + $0x4a8] sm:$0x3] }
 0x12f   : > { %8214 = vst [vmem:[#allocation210_spill] sm:$0xff] %v5779_v2  ;;  %8216 = vst [vmem:[#allocation35_spill] sm:$0xff] %v5785_v49  ;;  %v3057_v22 = vadd.f32 %v3056_v60, %v5218_v19  ;;  %v5797_v42 = vrot.slane %v5682_v56, %v4180_v7  ;;  %v2495_v3 = vmul.f32 %v8220_v62, %v415_v14  ;;  %v8224_v14 = vld [vmem:[#allocation41_spill] sm:$0xff]  ;;  %v3156_v27 = vsel %vm2734_vm1, %v2494_v26, 0.0 }
 0x130   : > { %8217 = vst [vmem:[#allocation181_spill] sm:$0xff] %v5789_v18  ;;  %v5803_v57 = vrot.slane %v5682_v56, %v4183_v8  ;;  %v2134_v23 = vmul.f32 %v5723_v10, %v8222_v13  ;;  %v2644_v51 = vadd.f32 %v2643_v24, %v2132_v29  ;;  %v3153_v4 = vadd.f32 %v3152_v35, %v3151_v31  ;;  %v418_v35 = vld [vmem:[%s4155_s26 + $0x4b0] sm:$0x3]  ;;  %v8228_v24 = vld [vmem:[#allocation42_spill] sm:$0xff]  ;;  %v8230_v10 = vld [vmem:[#allocation188_spill] sm:$0xff] }
 0x131   : > { %8219 = vst [vmem:[#allocation36_spill] sm:$0xff] %v5797_v42  ;;  %v3058_v19 = vadd.f32 %v3057_v22, %v5221_v36  ;;  %v5811_v60 = vrot.slane %v5682_v56, %v4188_v11  ;;  %v2496_v62 = vmul.f32 %v8224_v14, %v416_v25  ;;  %v5817_v47 = vrot.slane %v5682_v56, %v4210_v21 }
 0x132   : > { %8221 = vst [vmem:[#allocation182_spill] sm:$0xff] %v5803_v57  ;;  %v2135_v13 = vmul.f32 %v5726_v34, %v8226_v54  ;;  %v2645_v29 = vadd.f32 %v2644_v51, %v2133_v16  ;;  %v3155_v31 = vadd.f32 %v3154_v59, %v3153_v4  ;;  %v5825_v22 = vrot.slane %v5682_v56, %v4229_v33  ;;  %v419_v4 = vld [vmem:[%s4155_s26 + $0x4b8] sm:$0x3] }
 0x133   : > { %8223 = vst [vmem:[#allocation38_spill] sm:$0xff] %v5811_v60  ;;  %8225 = vst [vmem:[#allocation37_spill] sm:$0xff] %v5817_v47  ;;  %v3059_v36 = vadd.f32 %v3058_v19, %v5224_v17  ;;  %v2497_v25 = vmul.f32 %v8228_v24, %v417_v1  ;;  %v3158_v26 = vsel %vm2734_vm1, %v2495_v3, 0.0  ;;  %v5831_v14 = vrot.slane %v5682_v56, %v4255_v50  ;;  %v8231_v17 = vld [vmem:[#allocation45_spill] sm:$0xff]  ;;  %v8233_v1 = vld [vmem:[#allocation43_spill] sm:$0xff] }
 0x134   : > { %8227 = vst [vmem:[#allocation183_spill] sm:$0xff] %v5825_v22  ;;  %v2136_v54 = vmul.f32 %v5729_v15, %v8230_v10  ;;  %v2646_v16 = vadd.f32 %v2645_v29, %v2134_v23  ;;  %v3157_v59 = vadd.f32 %v3156_v27, %v3155_v31  ;;  %v5839_v19 = vrot.slane %v5682_v56, %v4278_v61  ;;  %v420_v27 = vld [vmem:[%s4155_s26 + $0x4c0] sm:$0x3]  ;;  %v8244_v15 = vld [vmem:[#allocation192_spill] sm:$0xff] }
 0x135   : > { %8229 = vst [vmem:[#allocation212_spill] sm:$0xff] %v5831_v14  ;;  %v3060_v51 = vadd.f32 %v3059_v36, %v8231_v17  ;;  %v2498_v24 = vmul.f32 %v8233_v1, %v418_v35  ;;  %v3160_v3 = vsel %vm2734_vm1, %v2496_v62, 0.0  ;;  %v5845_v34 = vrot.slane %v5696_v28, %v4177_v6  ;;  %v8237_v35 = vld [vmem:[#allocation44_spill] sm:$0xff]  ;;  %v8239_v1 = vld [vmem:[#allocation191_spill] sm:$0xff] }
 0x136   : > { %8232 = vst [vmem:[#allocation39_spill] sm:$0xff] %v5839_v19  ;;  %v2137_v10 = vmul.f32 %v5732_v9, %v8235_v55  ;;  %v2647_v23 = vadd.f32 %v2646_v16, %v2135_v13  ;;  %v3159_v29 = vadd.f32 %v3158_v26, %v3157_v59  ;;  %v5853_v56 = vrot.slane %v5696_v28, %v4180_v7  ;;  %v421_v26 = vld [vmem:[%s4155_s26 + $0x4c8] sm:$0x3] }
 0x137   : > { %8234 = vst [vmem:[#allocation185_spill] sm:$0xff] %v5845_v34  ;;  %v3061_v31 = vadd.f32 %v3060_v51, %v5241_v12  ;;  %v2499_v36 = vmul.f32 %v8237_v35, %v419_v4  ;;  %v3162_v62 = vsel %vm2734_vm1, %v2497_v25, 0.0  ;;  %v5859_v17 = vrot.slane %v5696_v28, %v4183_v8  ;;  %v8240_v12 = vld [vmem:[#allocation52_spill] sm:$0xff]  ;;  %v8242_v4 = vld [vmem:[#allocation46_spill] sm:$0xff] }
 0x138   : > { %8236 = vst [vmem:[#allocation40_spill] sm:$0xff] %v5853_v56  ;;  %v2138_v55 = vmul.f32 %v5735_v45, %v8239_v1  ;;  %v2648_v13 = vadd.f32 %v2647_v23, %v2136_v54  ;;  %v3161_v16 = vadd.f32 %v3160_v3, %v3159_v29  ;;  %v5867_v51 = vrot.slane %v5696_v28, %v4188_v11  ;;  %v422_v3 = vld [vmem:[%s4155_s26 + $0x4d0] sm:$0x3] }
 0x139   : > { %8238 = vst [vmem:[#allocation186_spill] sm:$0xff] %v5859_v17  ;;  %v3062_v59 = vadd.f32 %v3061_v31, %v8240_v12  ;;  %v2500_v35 = vmul.f32 %v8242_v4, %v420_v27  ;;  %v3164_v25 = vsel %vm2734_vm1, %v2498_v24, 0.0  ;;  %v5873_v9 = vrot.slane %v5696_v28, %v4210_v21  ;;  %v8245_v31 = vld [vmem:[#allocation215_spill] sm:$0xff] }
 0x13a   : > { %8241 = vst [vmem:[#allocation41_spill] sm:$0xff] %v5867_v51  ;;  %v2139_v54 = vmul.f32 %v5740_v30, %v8244_v15  ;;  %v2649_v23 = vadd.f32 %v2648_v13, %v2137_v10  ;;  %v3163_v29 = vadd.f32 %v3162_v62, %v3161_v16  ;;  %v5881_v12 = vrot.slane %v5696_v28, %v4229_v33  ;;  %v8247_v27 = vld [vmem:[#allocation47_spill] sm:$0xff]  ;;  %v423_v62 = vld [vmem:[%s4155_s26 + $0x4d8] sm:$0x3] }
 0x13b   : > { %8243 = vst [vmem:[#allocation187_spill] sm:$0xff] %v5873_v9  ;;  %v3063_v1 = vadd.f32 %v3062_v59, %v8245_v31  ;;  %v2501_v4 = vmul.f32 %v8247_v27, %v421_v26  ;;  %v3166_v24 = vsel %vm2734_vm1, %v2499_v36, 0.0  ;;  %v5887_v45 = vrot.slane %v5696_v28, %v4255_v50  ;;  %v8250_v16 = vld [vmem:[#allocation216_spill] sm:$0xff] }
 0x13c   : > { %8246 = vst [vmem:[#allocation42_spill] sm:$0xff] %v5881_v12  ;;  %v2140_v15 = vmul.f32 %v5746_v41, %v8249_v39  ;;  %v2650_v10 = vadd.f32 %v2649_v23, %v2138_v55  ;;  %v3165_v13 = vadd.f32 %v3164_v25, %v3163_v29  ;;  %v5895_v31 = vrot.slane %v5696_v28, %v4278_v61  ;;  %v8252_v26 = vld [vmem:[#allocation48_spill] sm:$0xff]  ;;  %v424_v25 = vld [vmem:[%s4155_s26 + $0x4e0] sm:$0x3] }
 0x13d   : > { %8248 = vst [vmem:[#allocation188_spill] sm:$0xff] %v5887_v45  ;;  %v3064_v59 = vadd.f32 %v3063_v1, %v8250_v16  ;;  %v2502_v27 = vmul.f32 %v8252_v26, %v422_v3  ;;  %v3168_v36 = vsel %vm2734_vm1, %v2500_v35, 0.0  ;;  %v5901_v30 = vrot.slane %v5700_v0, %v4177_v6  ;;  %v8256_v3 = vld [vmem:[#allocation49_spill] sm:$0xff] }
 0x13e   : > { %8251 = vst [vmem:[#allocation45_spill] sm:$0xff] %v5895_v31  ;;  %v2141_v39 = vmul.f32 %v5750_v58, %v8254_v63  ;;  %v2651_v55 = vadd.f32 %v2650_v10, %v2139_v54  ;;  %v3167_v23 = vadd.f32 %v3166_v24, %v3165_v13  ;;  %v5909_v28 = vrot.slane %v5700_v0, %v4180_v7  ;;  %v8258_v63 = vld [vmem:[#allocation195_spill] sm:$0xff]  ;;  %v425_v24 = vld [vmem:[%s4155_s26 + $0x4e8] sm:$0x3] }
 0x13f   : > { %8253 = vst [vmem:[#allocation43_spill] sm:$0xff] %v5901_v30  ;;  %v3065_v29 = vadd.f32 %v3064_v59, %v5264_v53  ;;  %v2503_v35 = vmul.f32 %v8256_v3, %v423_v62  ;;  %v3170_v1 = vsel %vm2734_vm1, %v2501_v4, 0.0  ;;  %v5915_v16 = vrot.slane %v5700_v0, %v4183_v8  ;;  %v8260_v62 = vld [vmem:[#allocation50_spill] sm:$0xff]  ;;  %v3661_v3 = vld.sshfl [vmem:[%s4149_s17 + $0xa0] sm:$0xff pattern:$0x75316420] }
 0x140   : > { %8255 = vst [vmem:[#allocation190_spill] sm:$0xff] %v5909_v28  ;;  %v2142_v54 = vmul.f32 %v5758_v48, %v8258_v63  ;;  %v2652_v10 = vadd.f32 %v2651_v55, %v2140_v15  ;;  %v3169_v13 = vadd.f32 %v3168_v36, %v3167_v23  ;;  %v5923_v59 = vrot.slane %v5700_v0, %v4188_v11  ;;  %v3662_v58 = vld.sshfl [vmem:[%s4149_s17 + $0xa8] sm:$0xff pattern:$0x75316420]  ;;  %v426_v36 = vld [vmem:[%s4155_s26 + $0x4f0] sm:$0x3] }
 0x141   : > { %8257 = vst [vmem:[#allocation44_spill] sm:$0xff] %v5915_v16  ;;  %v3066_v53 = vadd.f32 %v3065_v29, %v5267_v43  ;;  %v2504_v26 = vmul.f32 %v8260_v62, %v424_v25  ;;  %v3172_v4 = vsel %vm2734_vm1, %v2502_v27, 0.0  ;;  %v5929_v41 = vcombine.low %v3661_v3, %v3662_v58  ;;  %v8261_v16 = vld [vmem:[#allocation196_spill] sm:$0xff]  ;;  %v8263_v25 = vld [vmem:[#allocation51_spill] sm:$0xff]  ;;  %v8265_v62 = vld [vmem:[#allocation197_spill] sm:$0xff] }
 0x142   : > { %8259 = vst [vmem:[#allocation191_spill] sm:$0xff] %v5923_v59  ;;  %v2143_v15 = vmul.f32 %v5762_v44, %v8261_v16  ;;  %v2653_v55 = vadd.f32 %v2652_v10, %v2141_v39  ;;  %v3171_v23 = vadd.f32 %v3170_v1, %v3169_v13  ;;  %v5937_v29 = vrot.slane %v5700_v0, %v4210_v21  ;;  %v427_v1 = vld [vmem:[%s4155_s26 + $0x4f8] sm:$0x3] }
 0x143   : > { %v3067_v43 = vadd.f32 %v3066_v53, %v5270_v40  ;;  %v2505_v63 = vmul.f32 %v8263_v25, %v425_v24  ;;  %v3174_v27 = vsel %vm2734_vm1, %v2503_v35, 0.0  ;;  %v5943_v58 = vrot.slane %v5700_v0, %v4229_v33  ;;  %v8267_v24 = vld [vmem:[#allocation53_spill] sm:$0xff] }
 0x144   : > { %8262 = vst [vmem:[#allocation52_spill] sm:$0xff] %v5937_v29  ;;  %v2144_v39 = vmul.f32 %v5767_v37, %v8265_v62  ;;  %v2654_v16 = vadd.f32 %v2653_v55, %v2142_v54  ;;  %v3173_v10 = vadd.f32 %v3172_v4, %v3171_v23  ;;  %v5951_v13 = vrot.slane %v5700_v0, %v4255_v50  ;;  %v8269_v25 = vld [vmem:[#allocation21_spill] sm:$0xff]  ;;  %v3664_v37 = vld.sshfl [vmem:[%s4149_s17 + $0xb8] sm:$0xff pattern:$0x75316420] }
 0x145   : > { %8264 = vst [vmem:[#allocation46_spill] sm:$0xff] %v5943_v58  ;;  %v3068_v40 = vadd.f32 %v3067_v43, %v5277_v20  ;;  %v2506_v53 = vmul.f32 %v8267_v24, %v426_v36  ;;  %v3176_v35 = vsel %vm2734_vm1, %v2504_v26, 0.0  ;;  %v5957_v3 = vrot.slane %v5700_v0, %v4278_v61  ;;  %v428_v4 = vld [vmem:[%s4155_s26 + $0x500] sm:$0x3]  ;;  %v8271_v36 = vld [vmem:[#allocation54_spill] sm:$0xff] }
 0x146   : > { %8266 = vst [vmem:[#allocation192_spill] sm:$0xff] %v5951_v13  ;;  %v2145_v54 = vmul.f32 %v5771_v46, %v8269_v25  ;;  %v2655_v55 = vadd.f32 %v2654_v16, %v2143_v15  ;;  %v3175_v23 = vadd.f32 %v3174_v27, %v3173_v10  ;;  %v5965_v43 = vrot.slane %v5929_v41, %v4177_v6  ;;  %v8273_v24 = vld [vmem:[#allocation202_spill] sm:$0xff] }
 0x147   : > { %8268 = vst [vmem:[#allocation215_spill] sm:$0xff] %v5957_v3  ;;  %v3069_v20 = vadd.f32 %v3068_v40, %v5287_v5  ;;  %v2507_v62 = vmul.f32 %v8271_v36, %v427_v1  ;;  %v3178_v26 = vsel %vm2734_vm1, %v2505_v63, 0.0  ;;  %v5971_v0 = vrot.slane %v5929_v41, %v4180_v7  ;;  %v429_v5 = vld [vmem:[%s4155_s26 + $0x508] sm:$0x3]  ;;  %v8276_v63 = vld [vmem:[#allocation55_spill] sm:$0xff] }
 0x148   : > { %8270 = vst [vmem:[#allocation47_spill] sm:$0xff] %v5965_v43  ;;  %v2146_v15 = vmul.f32 %v5779_v2, %v8273_v24  ;;  %v2656_v27 = vadd.f32 %v2655_v55, %v2144_v39  ;;  %v3177_v16 = vadd.f32 %v3176_v35, %v3175_v23  ;;  %v8274_v10 = vld [vmem:[#allocation66_spill] sm:$0xff]  ;;  %v5979_v1 = vrot.slane %v5929_v41, %v4183_v8  ;;  %v8278_v24 = vld [vmem:[#allocation203_spill] sm:$0xff] }
 0x149   : > { %8272 = vst [vmem:[#allocation193_spill] sm:$0xff] %v5971_v0  ;;  %v3070_v40 = vadd.f32 %v3069_v20, %v8274_v10  ;;  %v2508_v25 = vmul.f32 %v8276_v63, %v428_v4  ;;  %v3180_v36 = vsel %vm2734_vm1, %v2506_v53, 0.0  ;;  %v5985_v46 = vrot.slane %v5929_v41, %v4188_v11  ;;  %v430_v55 = vld [vmem:[%s4155_s26 + $0x510] sm:$0x3]  ;;  %v8279_v20 = vld [vmem:[#allocation218_spill] sm:$0xff]  ;;  %v8280_v53 = vld [vmem:[#allocation56_spill] sm:$0xff] }
 0x14a   : > { %8275 = vst [vmem:[#allocation216_spill] sm:$0xff] %v5979_v1  ;;  %v2147_v39 = vmul.f32 %v5785_v49, %v8278_v24  ;;  %v2657_v35 = vadd.f32 %v2656_v27, %v2145_v54  ;;  %v3179_v23 = vadd.f32 %v3178_v26, %v3177_v16  ;;  %v3663_v2 = vld.sshfl [vmem:[%s4149_s17 + $0xb0] sm:$0xff pattern:$0x75316420]  ;;  %v2509_v63 = vmul.f32 %v8280_v53, %v429_v5  ;;  %v3665_v54 = vld [vmem:[%s4155_s26 + $0x1c0] sm:$0xff]  ;;  %v3666_v53 = vld [vmem:[%s4155_s26 + $0x1c8] sm:$0xff] }
 0x14b   : > { %8277 = vst [vmem:[#allocation48_spill] sm:$0xff] %v5985_v46  ;;  %v3071_v10 = vadd.f32 %v3070_v40, %v8279_v20  ;;  %v5993_v4 = vcombine.low %v3663_v2, %v3664_v37  ;;  %v3182_v44 = vsel %vm2734_vm1, %v2507_v62, 0.0  ;;  %v5999_v48 = vrot.slane %v5929_v41, %v4210_v21  ;;  %v431_v16 = vld [vmem:[%s4155_s26 + $0x518] sm:$0x3]  ;;  %v8282_v24 = vld [vmem:[#allocation219_spill] sm:$0xff]  ;;  %v8284_v37 = vld [vmem:[#allocation57_spill] sm:$0xff] }
 0x14c   : > { %v2148_v26 = vmul.f32 %v3665_v54, %v5789_v18  ;;  %v2658_v27 = vadd.f32 %v2657_v35, %v2146_v15  ;;  %v3181_v40 = vadd.f32 %v3180_v36, %v3179_v23  ;;  %v6007_v2 = vrot.slane %v5929_v41, %v4229_v33  ;;  %v3667_v54 = vld [vmem:[%s4155_s26 + $0x1d0] sm:$0xff]  ;;  %v432_v35 = vld [vmem:[%s4155_s26 + $0x520] sm:$0x3] }
 0x14d   : > { %8281 = vst [vmem:[#allocation17_spill] sm:$0xff] %v5999_v48  ;;  %v3072_v20 = vadd.f32 %v3071_v10, %v8282_v24  ;;  %v2510_v62 = vmul.f32 %v8284_v37, %v430_v55  ;;  %v3184_v5 = vsel %vm2734_vm1, %v2508_v25, 0.0  ;;  %v2149_v49 = vmul.f32 %v3666_v53, %v5797_v42  ;;  %v8286_v55 = vld [vmem:[#allocation58_spill] sm:$0xff]  ;;  %v3668_v53 = vld [vmem:[%s4155_s26 + $0x1d8] sm:$0xff]  ;;  %v3671_v18 = vld [vmem:[%s4155_s26 + $0x1f0] sm:$0xff] }
 0x14e   : > { %8283 = vst [vmem:[#allocation49_spill] sm:$0xff] %v6007_v2  ;;  %v2150_v15 = vmul.f32 %v3667_v54, %v5803_v57  ;;  %v2659_v36 = vadd.f32 %v2658_v27, %v2147_v39  ;;  %v3183_v23 = vadd.f32 %v3182_v44, %v3181_v40  ;;  %v6019_v24 = vrot.slane %v5929_v41, %v4255_v50  ;;  %v3669_v54 = vld [vmem:[%s4155_s26 + $0x1e0] sm:$0xff] }
 0x14f   : > { %v3073_v10 = vadd.f32 %v3072_v20, %v5310_v52  ;;  %v2511_v25 = vmul.f32 %v8286_v55, %v431_v16  ;;  %v3186_v37 = vsel %vm2734_vm1, %v2509_v63, 0.0  ;;  %v2151_v42 = vmul.f32 %v3668_v53, %v5811_v60  ;;  %v433_v52 = vld [vmem:[%s4155_s26 + $0x528] sm:$0x3]  ;;  %v8287_v16 = vld [vmem:[#allocation60_spill] sm:$0xff] }
 0x150   : > { %8285 = vst [vmem:[#allocation195_spill] sm:$0xff] %v6019_v24  ;;  %v2152_v39 = vmul.f32 %v3669_v54, %v5817_v47  ;;  %v2660_v44 = vadd.f32 %v2659_v36, %v2148_v26  ;;  %v3185_v27 = vadd.f32 %v3184_v5, %v3183_v23  ;;  %v3670_v20 = vld [vmem:[%s4155_s26 + $0x1e8] sm:$0xff]  ;;  %v2512_v55 = vmul.f32 %v8287_v16, %v432_v35  ;;  %v3672_v60 = vld [vmem:[%s4155_s26 + $0x1f8] sm:$0xff]  ;;  %v434_v36 = vld [vmem:[%s4155_s26 + $0x530] sm:$0x3] }
 0x151   : > { %v3074_v40 = vadd.f32 %v3073_v10, %v5313_v38  ;;  %v2153_v57 = vmul.f32 %v3670_v20, %v5825_v22  ;;  %v3188_v63 = vsel %vm2734_vm1, %v2510_v62, 0.0  ;;  %v2154_v53 = vmul.f32 %v3671_v18, %v5831_v14  ;;  %v8288_v23 = vld [vmem:[#allocation73_spill] sm:$0xff]  ;;  %v8291_v16 = vld [vmem:[#allocation220_spill] sm:$0xff]  ;;  %v8333_v14 = vld [vmem:[#allocation78_spill] sm:$0xff] }
 0x152   : > { %v6037_v26 = vmul.f32 %v3672_v60, %v5839_v19  ;;  %v2661_v5 = vadd.f32 %v2660_v44, %v2149_v49  ;;  %v3187_v38 = vadd.f32 %v3186_v37, %v3185_v27  ;;  %v3673_v54 = vld [vmem:[%s4155_s26 + $0x200] sm:$0xff]  ;;  %v3190_v18 = vsel %vm2734_vm1, %v2511_v25, 0.0  ;;  %v3674_v49 = vld [vmem:[%s4155_s26 + $0x208] sm:$0xff]  ;;  %v435_v27 = vld [vmem:[%s4155_s26 + $0x538] sm:$0x3] }
 0x153   : > { %v3075_v10 = vadd.f32 %v3074_v40, %v8288_v23  ;;  %v6043_v35 = vmul.f32 %v3673_v54, %v5845_v34  ;;  %v8289_v62 = vld [vmem:[#allocation61_spill] sm:$0xff]  ;;  %v6049_v60 = vrot.slane %v5929_v41, %v4278_v61  ;;  %v6053_v37 = vmul.f32 %v3674_v49, %v5853_v56  ;;  %v3675_v54 = vld [vmem:[%s4155_s26 + $0x210] sm:$0xff]  ;;  %v8292_v25 = vld [vmem:[#allocation62_spill] sm:$0xff] }
 0x154   : > { %v2513_v20 = vmul.f32 %v8289_v62, %v433_v52  ;;  %v2662_v44 = vadd.f32 %v2661_v5, %v2150_v15  ;;  %v3189_v40 = vadd.f32 %v3188_v63, %v3187_v38  ;;  %v6059_v52 = vmul.f32 %v3675_v54, %v5859_v17  ;;  %v3676_v34 = vld [vmem:[%s4155_s26 + $0x218] sm:$0xff]  ;;  %v3677_v15 = vld [vmem:[%s4155_s26 + $0x220] sm:$0xff]  ;;  %v3678_v54 = vld [vmem:[%s4155_s26 + $0x228] sm:$0xff] }
 0x155   : > { %8290 = vst [vmem:[#allocation50_spill] sm:$0xff] %v6049_v60  ;;  %v3076_v23 = vadd.f32 %v3075_v10, %v8291_v16  ;;  %v2514_v62 = vmul.f32 %v8292_v25, %v434_v36  ;;  %v3192_v41 = vsel %vm2734_vm1, %v2512_v55, 0.0  ;;  %v6065_v49 = vmul.f32 %v3676_v34, %v5867_v51  ;;  %v436_v38 = vld [vmem:[%s4155_s26 + $0x540] sm:$0x3]  ;;  %v8293_v55 = vld [vmem:[#allocation63_spill] sm:$0xff] }
 0x156   : > { %v6069_v5 = vmul.f32 %v3677_v15, %v5873_v9  ;;  %v2663_v63 = vadd.f32 %v2662_v44, %v2151_v42  ;;  %v3191_v10 = vadd.f32 %v3190_v18, %v3189_v40  ;;  %v6075_v36 = vmul.f32 %v3678_v54, %v5881_v12  ;;  %v3679_v42 = vld [vmem:[%s4155_s26 + $0x230] sm:$0xff]  ;;  %v437_v44 = vld [vmem:[%s4155_s26 + $0x548] sm:$0x3]  ;;  %v3680_v12 = vld [vmem:[%s4155_s26 + $0x238] sm:$0xff] }
 0x157   : > { %v3077_v16 = vadd.f32 %v3076_v23, %v5333_v32  ;;  %v2515_v25 = vmul.f32 %v8293_v55, %v435_v27  ;;  %v3194_v34 = vsel %vm2734_vm1, %v2513_v20, 0.0  ;;  %v6081_v15 = vrot.slane %v5993_v4, %v4177_v6  ;;  %v8295_v23 = vld [vmem:[#allocation80_spill] sm:$0xff]  ;;  %v3681_v51 = vld [vmem:[%s4155_s26 + $0x240] sm:$0xff]  ;;  %v454_v22 = vld [vmem:[%s4155_s26 + $0x5d0] sm:$0x3] }
 0x158   : > { %v6085_v18 = vmul.f32 %v3679_v42, %v5887_v45  ;;  %v2664_v32 = vadd.f32 %v2663_v63, %v2152_v39  ;;  %v3193_v40 = vadd.f32 %v3192_v41, %v3191_v10  ;;  %v6091_v27 = vmul.f32 %v3680_v12, %v5895_v31  ;;  %v8296_v20 = vld [vmem:[#allocation64_spill] sm:$0xff]  ;;  %v3682_v39 = vld [vmem:[%s4155_s26 + $0x248] sm:$0xff]  ;;  %v438_v10 = vld [vmem:[%s4155_s26 + $0x550] sm:$0x3] }
 0x159   : > { %8294 = vst [vmem:[#allocation196_spill] sm:$0xff] %v6081_v15  ;;  %v3078_v54 = vadd.f32 %v3077_v16, %v8295_v23  ;;  %v2516_v55 = vmul.f32 %v8296_v20, %v436_v38  ;;  %v3196_v9 = vsel %vm2734_vm1, %v2514_v62, 0.0  ;;  %v6097_v42 = vmul.f32 %v3681_v51, %v5901_v30  ;;  %v8297_v23 = vld [vmem:[#allocation222_spill] sm:$0xff]  ;;  %v3683_v31 = vld [vmem:[%s4155_s26 + $0x250] sm:$0xff]  ;;  %v8298_v38 = vld [vmem:[#allocation44_spill] sm:$0xff] }
 0x15a   : > { %v6101_v41 = vmul.f32 %v3682_v39, %v5909_v28  ;;  %v2665_v63 = vadd.f32 %v2664_v32, %v2153_v57  ;;  %v3195_v16 = vadd.f32 %v3194_v34, %v3193_v40  ;;  %v6107_v20 = vmul.f32 %v3683_v31, %v8298_v38  ;;  %v8299_v62 = vld [vmem:[#allocation65_spill] sm:$0xff]  ;;  %v3684_v30 = vld [vmem:[%s4155_s26 + $0x258] sm:$0xff]  ;;  %v8337_v47 = vld [vmem:[#allocation79_spill] sm:$0xff] }
 0x15b   : > { %v3079_v12 = vadd.f32 %v3078_v54, %v8297_v23  ;;  %v2517_v45 = vmul.f32 %v8299_v62, %v437_v44  ;;  %v3198_v51 = vsel %vm2734_vm1, %v2515_v25, 0.0  ;;  %v6113_v39 = vmul.f32 %v3684_v30, %v5923_v59  ;;  %v3685_v57 = vld [vmem:[%s4155_s26 + $0x260] sm:$0xff]  ;;  %v439_v40 = vld [vmem:[%s4155_s26 + $0x558] sm:$0x3]  ;;  %v8300_v23 = vld [vmem:[#allocation223_spill] sm:$0xff] }
 0x15c   : > { %v6117_v34 = vmul.f32 %v3685_v57, %v5937_v29  ;;  %v2666_v32 = vadd.f32 %v2665_v63, %v2154_v53  ;;  %v3197_v54 = vadd.f32 %v3196_v9, %v3195_v16  ;;  %v6123_v44 = vrot.slane %v5993_v4, %v4180_v7  ;;  %v8302_v25 = vld [vmem:[#allocation67_spill] sm:$0xff]  ;;  %v3686_v30 = vld [vmem:[%s4155_s26 + $0x268] sm:$0xff]  ;;  %v440_v63 = vld [vmem:[%s4155_s26 + $0x560] sm:$0x3] }
 0x15d   : > { %v3080_v31 = vadd.f32 %v3079_v12, %v8300_v23  ;;  %v2518_v62 = vmul.f32 %v8302_v25, %v438_v10  ;;  %v3200_v38 = vsel %vm2734_vm1, %v2516_v55, 0.0  ;;  %v6129_v59 = vmul.f32 %v3686_v30, %v5943_v58  ;;  %v3687_v57 = vld [vmem:[%s4155_s26 + $0x270] sm:$0xff]  ;;  %v8305_v10 = vld [vmem:[#allocation68_spill] sm:$0xff]  ;;  %v3689_v58 = vld [vmem:[%s4155_s26 + $0x280] sm:$0xff] }
 0x15e   : > { %8301 = vst [vmem:[#allocation51_spill] sm:$0xff] %v6123_v44  ;;  %v6133_v9 = vmul.f32 %v3687_v57, %v5951_v13  ;;  %v2667_v53 = vadd.f32 %v2666_v32, %v6037_v26  ;;  %v3199_v16 = vadd.f32 %v3198_v51, %v3197_v54  ;;  %v8303_v12 = vld [vmem:[#allocation87_spill] sm:$0xff]  ;;  %v6140_v55 = vrot.slane %v5993_v4, %v4183_v8  ;;  %v3688_v26 = vld [vmem:[%s4155_s26 + $0x278] sm:$0xff]  ;;  %v441_v54 = vld [vmem:[%s4155_s26 + $0x568] sm:$0x3] }
 0x15f   : > { %v3081_v23 = vadd.f32 %v3080_v31, %v8303_v12  ;;  %v2519_v25 = vmul.f32 %v8305_v10, %v439_v40  ;;  %v3202_v30 = vsel %vm2734_vm1, %v2517_v45, 0.0  ;;  %v6146_v57 = vrot.slane %v5993_v4, %v4188_v11  ;;  %v8307_v12 = vld [vmem:[#allocation225_spill] sm:$0xff] }
 0x160   : > { %8304 = vst [vmem:[#allocation197_spill] sm:$0xff] %v6140_v55  ;;  %v6150_v51 = vmul.f32 %v3688_v26, %v5957_v3  ;;  %v2668_v32 = vadd.f32 %v2667_v53, %v6043_v35  ;;  %v3201_v31 = vadd.f32 %v3200_v38, %v3199_v16  ;;  %v6157_v40 = vmul.f32 %v3689_v58, %v5965_v43  ;;  %v8308_v45 = vld [vmem:[#allocation69_spill] sm:$0xff]  ;;  %v3691_v26 = vld.sshfl [vmem:[%s4149_s17 + $0xc8] sm:$0xff pattern:$0x75316420]  ;;  %v3693_v43 = vld [vmem:[%s4155_s26 + $0x290] sm:$0xff] }
 0x161   : > { %8306 = vst [vmem:[#allocation53_spill] sm:$0xff] %v6146_v57  ;;  %v3082_v13 = vadd.f32 %v3081_v23, %v8307_v12  ;;  %v2520_v10 = vmul.f32 %v8308_v45, %v440_v63  ;;  %v3204_v29 = vsel %vm2734_vm1, %v2518_v62, 0.0  ;;  %v3690_v28 = vld.sshfl [vmem:[%s4149_s17 + $0xc0] sm:$0xff pattern:$0x75316420]  ;;  %v6167_v35 = vrot.slane %v5993_v4, %v4210_v21  ;;  %v8310_v58 = vld [vmem:[#allocation226_spill] sm:$0xff] }
 0x162   : > { %v6163_v3 = vcombine.low %v3690_v28, %v3691_v26  ;;  %v2669_v38 = vadd.f32 %v2668_v32, %v6053_v37  ;;  %v442_v53 = vld [vmem:[%s4155_s26 + $0x570] sm:$0x3]  ;;  %v3203_v16 = vadd.f32 %v3202_v30, %v3201_v31  ;;  %v3692_v12 = vld [vmem:[%s4155_s26 + $0x288] sm:$0xff]  ;;  %v3206_v28 = vsel %vm2734_vm1, %v2519_v25, 0.0  ;;  %v443_v30 = vld [vmem:[%s4155_s26 + $0x578] sm:$0x3] }
 0x163   : > { %8309 = vst [vmem:[#allocation21_spill] sm:$0xff] %v6167_v35  ;;  %v3083_v23 = vadd.f32 %v3082_v13, %v8310_v58  ;;  %v6174_v63 = vmul.f32 %v3692_v12, %v5971_v0  ;;  %v8311_v62 = vld [vmem:[#allocation70_spill] sm:$0xff]  ;;  %v6180_v26 = vrot.slane %v5993_v4, %v4229_v33  ;;  %v6184_v37 = vmul.f32 %v3693_v43, %v5979_v1  ;;  %v8313_v31 = vld [vmem:[#allocation227_spill] sm:$0xff]  ;;  %v3694_v1 = vld [vmem:[%s4155_s26 + $0x298] sm:$0xff] }
 0x164   : > { %v2521_v45 = vmul.f32 %v8311_v62, %v441_v54  ;;  %v2670_v13 = vadd.f32 %v2669_v38, %v6059_v52  ;;  %v3205_v32 = vadd.f32 %v3204_v29, %v3203_v16  ;;  %v6191_v54 = vrot.slane %v5993_v4, %v4255_v50  ;;  %v8315_v25 = vld [vmem:[#allocation71_spill] sm:$0xff]  ;;  %v444_v38 = vld [vmem:[%s4155_s26 + $0x580] sm:$0x3] }
 0x165   : > { %8312 = vst [vmem:[#allocation54_spill] sm:$0xff] %v6180_v26  ;;  %v3084_v58 = vadd.f32 %v3083_v23, %v8313_v31  ;;  %v2522_v12 = vmul.f32 %v8315_v25, %v442_v53  ;;  %v3208_v62 = vsel %vm2734_vm1, %v2520_v10, 0.0  ;;  %v6197_v43 = vrot.slane %v5993_v4, %v4278_v61  ;;  %v8317_v23 = vld [vmem:[#allocation94_spill] sm:$0xff]  ;;  %v3695_v0 = vld [vmem:[%s4155_s26 + $0x2a0] sm:$0xff]  ;;  %v8318_v10 = vld [vmem:[#allocation72_spill] sm:$0xff] }
 0x166   : > { %8314 = vst [vmem:[#allocation202_spill] sm:$0xff] %v6191_v54  ;;  %v6201_v52 = vmul.f32 %v3694_v1, %v5985_v46  ;;  %v2671_v29 = vadd.f32 %v2670_v13, %v6065_v49  ;;  %v3207_v16 = vadd.f32 %v3206_v28, %v3205_v32  ;;  %v6208_v53 = vmul.f32 %v3695_v0, %v5999_v48  ;;  %v3696_v46 = vld [vmem:[%s4155_s26 + $0x2a8] sm:$0xff]  ;;  %v8320_v0 = vld [vmem:[#allocation229_spill] sm:$0xff] }
 0x167   : > { %8316 = vst [vmem:[#allocation66_spill] sm:$0xff] %v6197_v43  ;;  %v3085_v31 = vadd.f32 %v3084_v58, %v8317_v23  ;;  %v2523_v25 = vmul.f32 %v8318_v10, %v443_v30  ;;  %v3210_v4 = vsel %vm2734_vm1, %v2521_v45, 0.0  ;;  %v6214_v1 = vrot.slane %v6163_v3, %v4177_v6  ;;  %v445_v13 = vld [vmem:[%s4155_s26 + $0x588] sm:$0x3]  ;;  %v452_v19 = vld [vmem:[%s4155_s26 + $0x5c0] sm:$0x3] }
 0x168   : > { %v6218_v49 = vmul.f32 %v3696_v46, %v6007_v2  ;;  %v2672_v28 = vadd.f32 %v2671_v29, %v6069_v5  ;;  %v3209_v32 = vadd.f32 %v3208_v62, %v3207_v16  ;;  %v6225_v30 = vrot.slane %v6163_v3, %v4180_v7  ;;  %v8322_v45 = vld [vmem:[#allocation74_spill] sm:$0xff]  ;;  %v3697_v2 = vld [vmem:[%s4155_s26 + $0x2b0] sm:$0xff] }
 0x169   : > { %8319 = vst [vmem:[#allocation55_spill] sm:$0xff] %v6214_v1  ;;  %v3086_v58 = vadd.f32 %v3085_v31, %v8320_v0  ;;  %v2524_v23 = vmul.f32 %v8322_v45, %v444_v38  ;;  %v3212_v10 = vsel %vm2734_vm1, %v2522_v12, 0.0  ;;  %v6231_v46 = vrot.slane %v6163_v3, %v4183_v8  ;;  %v446_v29 = vld [vmem:[%s4155_s26 + $0x590] sm:$0x3]  ;;  %v8324_v31 = vld [vmem:[#allocation230_spill] sm:$0xff]  ;;  %v3698_v38 = vld [vmem:[%s4155_s26 + $0x2b8] sm:$0xff] }
 0x16a   : > { %8321 = vst [vmem:[#allocation203_spill] sm:$0xff] %v6225_v30  ;;  %v6235_v5 = vmul.f32 %v3697_v2, %v6019_v24  ;;  %v2673_v62 = vadd.f32 %v2672_v28, %v6075_v36  ;;  %v3211_v16 = vadd.f32 %v3210_v4, %v3209_v32  ;;  %v6242_v12 = vmul.f32 %v3698_v38, %v6049_v60  ;;  %v8325_v45 = vld [vmem:[#allocation75_spill] sm:$0xff]  ;;  %v3699_v36 = vld [vmem:[%s4155_s26 + $0x2c0] sm:$0xff]  ;;  %v447_v32 = vld [vmem:[%s4155_s26 + $0x598] sm:$0x3] }
 0x16b   : > { %8323 = vst [vmem:[#allocation218_spill] sm:$0xff] %v6231_v46  ;;  %v3087_v0 = vadd.f32 %v3086_v58, %v8324_v31  ;;  %v2525_v48 = vmul.f32 %v8325_v45, %v445_v13  ;;  %v3214_v17 = vsel %vm2734_vm1, %v2523_v25, 0.0  ;;  %v6248_v2 = vrot.slane %v6163_v3, %v4188_v11  ;;  %v8327_v31 = vld [vmem:[#allocation231_spill] sm:$0xff]  ;;  %v3701_v13 = vld.sshfl [vmem:[%s4149_s17 + $0xd8] sm:$0xff pattern:$0x75316420] }
 0x16c   : > { %v6252_v28 = vmul.f32 %v3699_v36, %v6081_v15  ;;  %v2674_v4 = vadd.f32 %v2673_v62, %v6085_v18  ;;  %v3213_v58 = vadd.f32 %v3212_v10, %v3211_v16  ;;  %v3700_v60 = vld.sshfl [vmem:[%s4149_s17 + $0xd0] sm:$0xff pattern:$0x75316420]  ;;  %v8328_v25 = vld [vmem:[#allocation76_spill] sm:$0xff]  ;;  %v3216_v56 = vsel %vm2734_vm1, %v2524_v23, 0.0  ;;  %v3702_v18 = vld [vmem:[%s4155_s26 + $0x2c8] sm:$0xff] }
 0x16d   : > { %8326 = vst [vmem:[#allocation56_spill] sm:$0xff] %v6248_v2  ;;  %v3088_v38 = vadd.f32 %v3087_v0, %v8327_v31  ;;  %v6259_v45 = vcombine.low %v3700_v60, %v3701_v13  ;;  %v2526_v24 = vmul.f32 %v8328_v25, %v446_v29  ;;  %v6265_v36 = vrot.slane %v6163_v3, %v4210_v21  ;;  %v448_v16 = vld [vmem:[%s4155_s26 + $0x5a0] sm:$0x3]  ;;  %v451_v15 = vld [vmem:[%s4155_s26 + $0x5b8] sm:$0x3] }
 0x16e   : > { %v6269_v10 = vmul.f32 %v3702_v18, %v6123_v44  ;;  %v2675_v62 = vadd.f32 %v2674_v4, %v6091_v27  ;;  %v3215_v60 = vadd.f32 %v3214_v17, %v3213_v58  ;;  %v8329_v0 = vld [vmem:[#allocation101_spill] sm:$0xff]  ;;  %v6276_v23 = vrot.slane %v6163_v3, %v4229_v33  ;;  %v3703_v27 = vld [vmem:[%s4155_s26 + $0x2d0] sm:$0xff]  ;;  %v449_v58 = vld [vmem:[%s4155_s26 + $0x5a8] sm:$0x3] }
 0x16f   : > { %v3089_v29 = vadd.f32 %v3088_v38, %v8329_v0  ;;  %v8330_v31 = vld [vmem:[#allocation77_spill] sm:$0xff]  ;;  %v3218_v25 = vsel %vm2734_vm1, %v2525_v48, 0.0  ;;  %v6282_v18 = vrot.slane %v6163_v3, %v4255_v50  ;;  %v6286_v4 = vmul.f32 %v3703_v27, %v6140_v55  ;;  %v450_v38 = vld [vmem:[%s4155_s26 + $0x5b0] sm:$0x3] }
 0x170   : > { %v2527_v13 = vmul.f32 %v8330_v31, %v447_v32  ;;  %v2676_v17 = vadd.f32 %v2675_v62, %v6097_v42  ;;  %v3217_v0 = vadd.f32 %v3216_v56, %v3215_v60  ;;  %v8332_v44 = vld [vmem:[#allocation233_spill] sm:$0xff]  ;;  %v3704_v31 = vld [vmem:[%s4155_s26 + $0x2d8] sm:$0xff]  ;;  %v2528_v27 = vmul.f32 %v8333_v14, %v448_v16 }
 0x171   : > { %8331 = vst [vmem:[#allocation219_spill] sm:$0xff] %v6282_v18  ;;  %v3090_v32 = vadd.f32 %v3089_v29, %v8332_v44  ;;  %v6294_v48 = vmul.f32 %v3704_v31, %v6146_v57  ;;  %v3220_v55 = vsel %vm2734_vm1, %v2526_v24, 0.0  ;;  %v6302_v42 = vrot.slane %v6163_v3, %v4278_v61  ;;  %v3705_v62 = vld [vmem:[%s4155_s26 + $0x2e0] sm:$0xff]  ;;  %v8336_v29 = vld [vmem:[#allocation234_spill] sm:$0xff] }
 0x172   : > { %v6306_v56 = vmul.f32 %v3705_v62, %v6167_v35  ;;  %v2677_v44 = vadd.f32 %v2676_v17, %v6101_v41  ;;  %v3219_v60 = vadd.f32 %v3218_v25, %v3217_v0  ;;  %v453_v57 = vld [vmem:[%s4155_s26 + $0x5c8] sm:$0x3]  ;;  %v2529_v14 = vmul.f32 %v8337_v47, %v449_v58  ;;  %v8338_v24 = vld [vmem:[#allocation81_spill] sm:$0xff]  ;;  %v455_v62 = vld [vmem:[%s4155_s26 + $0x5d8] sm:$0x3] }
 0x173   : > { %8334 = vst [vmem:[#allocation57_spill] sm:$0xff] %v6302_v42  ;;  %v3091_v31 = vadd.f32 %v3090_v32, %v8336_v29  ;;  %v2530_v16 = vmul.f32 %v8338_v24, %v450_v38  ;;  %v3222_v3 = vsel %vm2734_vm1, %v2527_v13, 0.0  ;;  %v456_v35 = vld [vmem:[%s4155_s26 + $0x5e0] sm:$0x3]  ;;  %v8340_v25 = vld [vmem:[#allocation83_spill] sm:$0xff]  ;;  %v6323_v47 = vrot.slane %v6259_v45, %v4177_v6  ;;  %v3706_v58 = vld [vmem:[%s4155_s26 + $0x2e8] sm:$0xff] }
 0x174   : > { %8335 = vst [vmem:[#allocation58_spill] sm:$0xff] %v6306_v56  ;;  %v2678_v42 = vadd.f32 %v2677_v44, %v6107_v20  ;;  %v8339_v56 = vld [vmem:[#allocation82_spill] sm:$0xff]  ;;  %v2532_v17 = vmul.f32 %v8340_v25, %v452_v19  ;;  %v3221_v0 = vadd.f32 %v3220_v55, %v3219_v60  ;;  %v8341_v32 = vld [vmem:[#allocation235_spill] sm:$0xff]  ;;  %v6327_v13 = vmul.f32 %v3706_v58, %v6180_v26  ;;  %v8343_v44 = vld [vmem:[#allocation84_spill] sm:$0xff] }
 0x175   : > { %v2531_v41 = vmul.f32 %v8339_v56, %v451_v15  ;;  %v3092_v29 = vadd.f32 %v3091_v31, %v8341_v32  ;;  %8342 = vst [vmem:[#allocation60_spill] sm:$0xff] %v6323_v47  ;;  %v3224_v20 = vsel %vm2734_vm1, %v2528_v27, 0.0  ;;  %v457_v15 = vld [vmem:[%s4155_s26 + $0x5e8] sm:$0x3]  ;;  %v458_v56 = vld [vmem:[%s4155_s26 + $0x5f0] sm:$0x3]  ;;  %v2533_v19 = vmul.f32 %v8343_v44, %v453_v57 }
 0x176   : > { %v2679_v38 = vadd.f32 %v2678_v42, %v6113_v39  ;;  %v8344_v55 = vld [vmem:[#allocation85_spill] sm:$0xff]  ;;  %v3223_v31 = vadd.f32 %v3222_v3, %v3221_v0  ;;  %v8345_v24 = vld [vmem:[#allocation108_spill] sm:$0xff]  ;;  %v8346_v18 = vld [vmem:[#allocation86_spill] sm:$0xff]  ;;  %v3226_v42 = vsel %vm2734_vm1, %v2529_v14, 0.0  ;;  %v6347_v57 = vrot.slane %v6259_v45, %v4180_v7 }
 0x177   : > { %v2534_v60 = vmul.f32 %v8344_v55, %v454_v22  ;;  %v3093_v25 = vadd.f32 %v3092_v29, %v8345_v24  ;;  %v459_v32 = vld [vmem:[%s4155_s26 + $0x5f8] sm:$0x3]  ;;  %v460_v47 = vld [vmem:[%s4155_s26 + $0x600] sm:$0x3]  ;;  %v6339_v58 = vmul.f32 %v8346_v18, %v455_v62  ;;  %v3707_v22 = vld [vmem:[%s4155_s26 + $0x2f0] sm:$0xff]  ;;  %v3228_v26 = vsel %vm2734_vm1, %v2530_v16, 0.0 }
 0x178   : > { %v8347_v27 = vld [vmem:[#allocation88_spill] sm:$0xff]  ;;  %8348 = vst [vmem:[#allocation73_spill] sm:$0xff] %v6347_v57  ;;  %v6351_v3 = vmul.f32 %v3707_v22, %v6191_v54  ;;  %v2680_v0 = vadd.f32 %v2679_v38, %v6117_v34  ;;  %v3225_v29 = vadd.f32 %v3224_v20, %v3223_v31  ;;  %v8349_v18 = vld [vmem:[#allocation237_spill] sm:$0xff]  ;;  %v461_v44 = vld [vmem:[%s4155_s26 + $0x608] sm:$0x3] }
 0x179   : > { %v6342_v39 = vmul.f32 %v8347_v27, %v456_v35  ;;  %v3094_v62 = vadd.f32 %v3093_v25, %v8349_v18  ;;  %v462_v55 = vld [vmem:[%s4155_s26 + $0x610] sm:$0x3]  ;;  %v8350_v35 = vld [vmem:[#allocation89_spill] sm:$0xff]  ;;  %v8351_v14 = vld [vmem:[#allocation90_spill] sm:$0xff] }
 0x17a   : > { %v6358_v24 = vmul.f32 %v8350_v35, %v457_v15  ;;  %v6361_v27 = vmul.f32 %v8351_v14, %v458_v56  ;;  %v2681_v57 = vadd.f32 %v2680_v0, %v6129_v59  ;;  %v463_v22 = vld [vmem:[%s4155_s26 + $0x618] sm:$0x3]  ;;  %v464_v34 = vld [vmem:[%s4155_s26 + $0x620] sm:$0x3]  ;;  %v8352_v38 = vld [vmem:[#allocation91_spill] sm:$0xff]  ;;  %v3227_v18 = vadd.f32 %v3226_v42, %v3225_v29 }
 0x17b   : > { %v6368_v20 = vmul.f32 %v8352_v38, %v459_v32  ;;  %v8353_v31 = vld [vmem:[#allocation92_spill] sm:$0xff]  ;;  %v8354_v15 = vld [vmem:[#allocation238_spill] sm:$0xff]  ;;  %v6376_v56 = vrot.slane %v6259_v45, %v4183_v8  ;;  %v3230_v0 = vsel %vm2734_vm1, %v2531_v41, 0.0  ;;  %v8357_v42 = vld [vmem:[#allocation95_spill] sm:$0xff] }
 0x17c   : > { %v6371_v25 = vmul.f32 %v8353_v31, %v460_v47  ;;  %v3095_v35 = vadd.f32 %v3094_v62, %v8354_v15  ;;  %v3708_v16 = vld [vmem:[%s4155_s26 + $0x2f8] sm:$0xff]  ;;  %v2682_v32 = vadd.f32 %v2681_v57, %v6133_v9  ;;  %v8356_v47 = vld [vmem:[#allocation93_spill] sm:$0xff]  ;;  %v6388_v29 = vmul.f32 %v8357_v42, %v462_v55  ;;  %v8358_v38 = vld [vmem:[#allocation239_spill] sm:$0xff] }
 0x17d   : > { %8355 = vst [vmem:[#allocation61_spill] sm:$0xff] %v6376_v56  ;;  %v6380_v59 = vmul.f32 %v3708_v16, %v6197_v43  ;;  %v6385_v14 = vmul.f32 %v8356_v47, %v461_v44  ;;  %v3229_v62 = vadd.f32 %v3228_v26, %v3227_v18  ;;  %v465_v15 = vld [vmem:[%s4155_s26 + $0x628] sm:$0x3]  ;;  %v466_v54 = vld [vmem:[%s4155_s26 + $0x630] sm:$0x3]  ;;  %v8359_v16 = vld [vmem:[#allocation96_spill] sm:$0xff]  ;;  %v6402_v57 = vrot.slane %v6259_v45, %v4188_v11 }
 0x17e   : > { %v3096_v31 = vadd.f32 %v3095_v35, %v8358_v38  ;;  %v6394_v43 = vmul.f32 %v8359_v16, %v463_v22  ;;  %v8360_v41 = vld [vmem:[#allocation97_spill] sm:$0xff]  ;;  %v3232_v9 = vsel %vm2734_vm1, %v2532_v17, 0.0  ;;  %v2683_v44 = vadd.f32 %v2682_v32, %v6150_v51  ;;  %v467_v26 = vld [vmem:[%s4155_s26 + $0x638] sm:$0x3]  ;;  %v8363_v38 = vld [vmem:[#allocation115_spill] sm:$0xff] }
 0x17f   : > { %v6397_v56 = vmul.f32 %v8360_v41, %v464_v34  ;;  %8361 = vst [vmem:[#allocation220_spill] sm:$0xff] %v6402_v57  ;;  %v468_v55 = vld [vmem:[%s4155_s26 + $0x640] sm:$0x3]  ;;  %v3231_v18 = vadd.f32 %v3230_v0, %v3229_v62  ;;  %v3234_v17 = vsel %vm2734_vm1, %v2533_v19, 0.0  ;;  %v3711_v41 = vld [vmem:[%s4155_s26 + $0x408] sm:$0x3] }
 0x180   : > { %v3709_v35 = vld [vmem:[%s4155_s26 + $0x400] sm:$0x3]  ;;  %v3097_v22 = vadd.f32 %v3096_v31, %v8363_v38  ;;  %v8365_v57 = vld [vmem:[#allocation162_spill] sm:$0xff]  ;;  %v2684_v51 = vadd.f32 %v2683_v44, %v6157_v40  ;;  %v8367_v62 = vld [vmem:[#allocation99_spill] sm:$0xff] }
 0x181   : > { %v8362_v47 = vld [vmem:[#allocation161_spill] sm:$0xff]  ;;  %v2221_v11 = vmul.f32 %v3711_v41, %v8365_v57  ;;  %v8366_v0 = vld [vmem:[#allocation98_spill] sm:$0xff]  ;;  %v3233_v31 = vadd.f32 %v3232_v9, %v3231_v18  ;;  %v3236_v57 = vsel %vm2734_vm1, %v2534_v60, 0.0  ;;  %v8371_v41 = vld [vmem:[#allocation172_spill] sm:$0xff]  ;;  %v3238_v60 = vsel %vm2734_vm1, %v6339_v58, 0.0 }
 0x182   : > { %v2220_v42 = vmul.f32 %v3709_v35, %v8362_v47  ;;  %v3710_v16 = vld [vmem:[%s4155_s26 + $0x300] sm:$0xff]  ;;  %v6419_v32 = vmul.f32 %v8366_v0, %v465_v15  ;;  %v6422_v35 = vmul.f32 %v8367_v62, %v466_v54  ;;  %v8370_v19 = vld [vmem:[#allocation102_spill] sm:$0xff]  ;;  %v2685_v40 = vadd.f32 %v2684_v51, %v6174_v63  ;;  %v3712_v54 = vld [vmem:[%s4155_s26 + $0x410] sm:$0x3] }
 0x183   : > { %v6412_v34 = vmul.f32 %v3710_v16, %v6214_v1  ;;  %v8368_v47 = vld [vmem:[#allocation241_spill] sm:$0xff]  ;;  %v8369_v16 = vld [vmem:[#allocation100_spill] sm:$0xff]  ;;  %v469_v15 = vld [vmem:[%s4155_s26 + $0x648] sm:$0x3]  ;;  %v3235_v44 = vadd.f32 %v3234_v17, %v3233_v31  ;;  %v2222_v9 = vmul.f32 %v3712_v54, %v8371_v41  ;;  %v2736_v63 = vsel %vm2734_vm1, %v2221_v11, 0.0 }
 0x184   : > { %v3098_v38 = vadd.f32 %v3097_v22, %v8368_v47  ;;  %v6426_v1 = vmul.f32 %v8369_v16, %v467_v26  ;;  %v2735_v18 = vsel %vm2734_vm1, %v2220_v42, 0.0  ;;  %v8372_v22 = vld [vmem:[#allocation242_spill] sm:$0xff]  ;;  %v3713_v0 = vld.sshfl [vmem:[%s4149_s17 + $0xe0] sm:$0xff pattern:$0x75316420]  ;;  %v6447_v17 = vrot.slane %v6259_v45, %v4210_v21  ;;  %v8375_v58 = vld [vmem:[#allocation103_spill] sm:$0xff] }
 0x185   : > { %8364 = vst [vmem:[#allocation62_spill] sm:$0xff] %v6412_v34  ;;  %v6429_v34 = vmul.f32 %v8370_v19, %v468_v55  ;;  %v3714_v62 = vld.sshfl [vmem:[%s4149_s17 + $0xe8] sm:$0xff pattern:$0x75316420]  ;;  %v2686_v31 = vadd.f32 %v2685_v40, %v6184_v37  ;;  %v470_v47 = vld [vmem:[%s4155_s26 + $0x650] sm:$0x3]  ;;  %v3237_v16 = vadd.f32 %v3236_v57, %v3235_v44  ;;  %v6458_v41 = vmul.f32 %v8375_v58, %v469_v15 }
 0x186   : > { %v3099_v26 = vadd.f32 %v3098_v38, %v8372_v22  ;;  %v6440_v55 = vcombine.low %v3713_v0, %v3714_v62  ;;  %8373 = vst [vmem:[#allocation63_spill] sm:$0xff] %v6447_v17  ;;  %v3715_v51 = vld [vmem:[%s4155_s26 + $0x308] sm:$0xff]  ;;  %v471_v38 = vld [vmem:[%s4155_s26 + $0x658] sm:$0x3]  ;;  %v8374_v19 = vld [vmem:[#allocation243_spill] sm:$0xff]  ;;  %v3240_v11 = vsel %vm2734_vm1, %v6342_v39, 0.0  ;;  %v2737_v22 = vadd.f32 %v2736_v63, %v2735_v18 }
 0x187   : > { %v6451_v42 = vmul.f32 %v3715_v51, %v6225_v30  ;;  %v2687_v0 = vadd.f32 %v2686_v31, %v6201_v52  ;;  %v472_v62 = vld [vmem:[%s4155_s26 + $0x660] sm:$0x3]  ;;  %v3239_v51 = vadd.f32 %v3238_v60, %v3237_v16  ;;  %v3716_v37 = vld [vmem:[%s4155_s26 + $0x418] sm:$0x3]  ;;  %v8376_v40 = vld [vmem:[#allocation179_spill] sm:$0xff]  ;;  %v2738_v44 = vsel %vm2734_vm1, %v2222_v9, 0.0 }
 0x188   : > { %v3100_v54 = vadd.f32 %v3099_v26, %v8374_v19  ;;  %v2223_v57 = vmul.f32 %v3716_v37, %v8376_v40  ;;  %v8377_v26 = vld [vmem:[#allocation122_spill] sm:$0xff]  ;;  %v8378_v15 = vld [vmem:[#allocation104_spill] sm:$0xff]  ;;  %v8379_v30 = vld [vmem:[#allocation105_spill] sm:$0xff]  ;;  %v3242_v52 = vsel %vm2734_vm1, %v6358_v24, 0.0  ;;  %v6478_v18 = vrot.slane %v6259_v45, %v4229_v33 }
 0x189   : > { %v6469_v58 = vmul.f32 %v8378_v15, %v470_v47  ;;  %v6472_v39 = vmul.f32 %v8379_v30, %v471_v38  ;;  %v3717_v60 = vld [vmem:[%s4155_s26 + $0x310] sm:$0xff]  ;;  %v2688_v9 = vadd.f32 %v2687_v0, %v6208_v53  ;;  %v473_v31 = vld [vmem:[%s4155_s26 + $0x668] sm:$0x3]  ;;  %v3241_v16 = vadd.f32 %v3240_v11, %v3239_v51  ;;  %v475_v38 = vld [vmem:[%s4155_s26 + $0x678] sm:$0x3] }
 0x18a   : > { %v3101_v19 = vadd.f32 %v3100_v54, %v8377_v26  ;;  %8380 = vst [vmem:[#allocation80_spill] sm:$0xff] %v6478_v18  ;;  %v6482_v63 = vmul.f32 %v3717_v60, %v6231_v46  ;;  %v474_v47 = vld [vmem:[%s4155_s26 + $0x670] sm:$0x3]  ;;  %v8381_v54 = vld [vmem:[#allocation245_spill] sm:$0xff]  ;;  %v8382_v37 = vld [vmem:[#allocation106_spill] sm:$0xff]  ;;  %v3244_v40 = vsel %vm2734_vm1, %v6361_v27, 0.0  ;;  %v2739_v26 = vadd.f32 %v2738_v44, %v2737_v22 }
 0x18b   : > { %v6490_v24 = vmul.f32 %v8382_v37, %v472_v62  ;;  %v2689_v15 = vadd.f32 %v2688_v9, %v6218_v49  ;;  %v3243_v60 = vadd.f32 %v3242_v52, %v3241_v16  ;;  %v3718_v53 = vld [vmem:[%s4155_s26 + $0x420] sm:$0x3]  ;;  %v8383_v0 = vld [vmem:[#allocation184_spill] sm:$0xff]  ;;  %v2740_v51 = vsel %vm2734_vm1, %v2223_v57, 0.0  ;;  %v8385_v46 = vld [vmem:[#allocation107_spill] sm:$0xff] }
 0x18c   : > { %v3102_v30 = vadd.f32 %v3101_v19, %v8381_v54  ;;  %v2224_v11 = vmul.f32 %v3718_v53, %v8383_v0  ;;  %v8384_v19 = vld [vmem:[#allocation246_spill] sm:$0xff]  ;;  %v6500_v62 = vmul.f32 %v8385_v46, %v473_v31  ;;  %v8386_v37 = vld [vmem:[#allocation109_spill] sm:$0xff]  ;;  %v3246_v49 = vsel %vm2734_vm1, %v6368_v20, 0.0  ;;  %v8389_v31 = vld [vmem:[#allocation247_spill] sm:$0xff] }
 0x18d   : > { %v6503_v18 = vmul.f32 %v8386_v37, %v474_v47  ;;  %v6509_v27 = vrot.slane %v6259_v45, %v4255_v50  ;;  %v2690_v22 = vadd.f32 %v2689_v15, %v6235_v5  ;;  %v476_v44 = vld [vmem:[%s4155_s26 + $0x680] sm:$0x3]  ;;  %v477_v57 = vld [vmem:[%s4155_s26 + $0x688] sm:$0x3]  ;;  %v3245_v46 = vadd.f32 %v3244_v40, %v3243_v60  ;;  %v3719_v47 = vld [vmem:[%s4155_s26 + $0x318] sm:$0xff] }
 0x18e   : > { %v3103_v54 = vadd.f32 %v3102_v30, %v8384_v19  ;;  %v8388_v52 = vld [vmem:[#allocation110_spill] sm:$0xff]  ;;  %v6520_v30 = vmul.f32 %v3719_v47, %v6248_v2  ;;  %v478_v20 = vld [vmem:[%s4155_s26 + $0x690] sm:$0x3]  ;;  %v479_v53 = vld [vmem:[%s4155_s26 + $0x698] sm:$0x3]  ;;  %v3248_v0 = vsel %vm2734_vm1, %v6371_v25, 0.0  ;;  %v2741_v19 = vadd.f32 %v2740_v51, %v2739_v26 }
 0x18f   : > { %8387 = vst [vmem:[#allocation64_spill] sm:$0xff] %v6509_v27  ;;  %v6515_v9 = vmul.f32 %v8388_v52, %v475_v38  ;;  %v2691_v5 = vadd.f32 %v2690_v22, %v6242_v12  ;;  %v3247_v15 = vadd.f32 %v3246_v49, %v3245_v46  ;;  %v3720_v38 = vld [vmem:[%s4155_s26 + $0x428] sm:$0x3]  ;;  %v8390_v37 = vld [vmem:[#allocation189_spill] sm:$0xff]  ;;  %v2742_v60 = vsel %vm2734_vm1, %v2224_v11, 0.0  ;;  %v8393_v2 = vld [vmem:[#allocation112_spill] sm:$0xff] }
 0x190   : > { %v3104_v16 = vadd.f32 %v3103_v54, %v8389_v31  ;;  %v2225_v40 = vmul.f32 %v3720_v38, %v8390_v37  ;;  %v8391_v54 = vld [vmem:[#allocation129_spill] sm:$0xff]  ;;  %v8392_v31 = vld [vmem:[#allocation111_spill] sm:$0xff]  ;;  %v6535_v27 = vmul.f32 %v8393_v2, %v477_v57  ;;  %v3250_v25 = vsel %vm2734_vm1, %v6385_v14, 0.0  ;;  %v8395_v11 = vld [vmem:[#allocation114_spill] sm:$0xff] }
 0x191   : > { %v6532_v47 = vmul.f32 %v8392_v31, %v476_v44  ;;  %v2692_v12 = vadd.f32 %v2691_v5, %v6252_v28  ;;  %v480_v26 = vld [vmem:[%s4155_s26 + $0x6a0] sm:$0x3]  ;;  %v6545_v22 = vmul.f32 %v8395_v11, %v479_v53  ;;  %v3249_v46 = vadd.f32 %v3248_v0, %v3247_v15  ;;  %v481_v57 = vld [vmem:[%s4155_s26 + $0x6a8] sm:$0x3]  ;;  %v3721_v38 = vld [vmem:[%s4155_s26 + $0x430] sm:$0x3] }
 0x192   : > { %v3105_v52 = vadd.f32 %v3104_v16, %v8391_v54  ;;  %v8394_v51 = vld [vmem:[#allocation113_spill] sm:$0xff]  ;;  %v8396_v16 = vld [vmem:[#allocation248_spill] sm:$0xff]  ;;  %v6550_v2 = vrot.slane %v6259_v45, %v4278_v61  ;;  %v3252_v28 = vsel %vm2734_vm1, %v6388_v29, 0.0  ;;  %v2743_v14 = vadd.f32 %v2742_v60, %v2741_v19  ;;  %v8397_v53 = vld [vmem:[#allocation194_spill] sm:$0xff] }
 0x193   : > { %v6542_v49 = vmul.f32 %v8394_v51, %v478_v20  ;;  %v2693_v5 = vadd.f32 %v2692_v12, %v6269_v10  ;;  %v3251_v20 = vadd.f32 %v3250_v25, %v3249_v46  ;;  %v2226_v37 = vmul.f32 %v3721_v38, %v8397_v53  ;;  %v8398_v15 = vld [vmem:[#allocation136_spill] sm:$0xff]  ;;  %v3722_v45 = vld [vmem:[%s4155_s26 + $0x320] sm:$0xff]  ;;  %v482_v60 = vld [vmem:[%s4155_s26 + $0x6b0] sm:$0x3] }
 0x194   : > { %v3106_v44 = vadd.f32 %v3105_v52, %v8396_v16  ;;  %v2744_v0 = vsel %vm2734_vm1, %v2225_v40, 0.0  ;;  %v6562_v52 = vmul.f32 %v3722_v45, %v6265_v36  ;;  %v8399_v31 = vld [vmem:[#allocation116_spill] sm:$0xff]  ;;  %v3254_v10 = vsel %vm2734_vm1, %v6394_v43, 0.0  ;;  %v8400_v25 = vld [vmem:[#allocation117_spill] sm:$0xff]  ;;  %v8401_v11 = vld [vmem:[#allocation11_spill] sm:$0xff] }
 0x195   : > { %v6565_v29 = vmul.f32 %v8399_v31, %v480_v26  ;;  %v6571_v19 = vrot.slane %v6440_v55, %v4177_v6  ;;  %v2694_v40 = vadd.f32 %v2693_v5, %v6286_v4  ;;  %v6576_v12 = vmul.f32 %v8400_v25, %v481_v57  ;;  %v3723_v16 = vld [vmem:[%s4155_s26 + $0x328] sm:$0xff]  ;;  %v483_v4 = vld [vmem:[%s4155_s26 + $0x6b8] sm:$0x3] }
 0x196   : > { %v3107_v54 = vadd.f32 %v3106_v44, %v8398_v15  ;;  %v3253_v51 = vadd.f32 %v3252_v28, %v3251_v20  ;;  %v6581_v26 = vmul.f32 %v3723_v16, %v6276_v23  ;;  %v3256_v43 = vsel %vm2734_vm1, %v6397_v56, 0.0  ;;  %v3724_v53 = vld [vmem:[%s4155_s26 + $0x438] sm:$0x3]  ;;  %v8402_v57 = vld [vmem:[#allocation198_spill] sm:$0xff]  ;;  %v8408_v16 = vld [vmem:[#allocation143_spill] sm:$0xff] }
 0x197   : > { %v2745_v44 = vadd.f32 %v2744_v0, %v2743_v14  ;;  %v2695_v38 = vadd.f32 %v2694_v40, %v6294_v48  ;;  %v2227_v15 = vmul.f32 %v3724_v53, %v8402_v57  ;;  %v2746_v28 = vsel %vm2734_vm1, %v2226_v37, 0.0  ;;  %v8403_v20 = vld [vmem:[#allocation12_spill] sm:$0xff]  ;;  %v8404_v31 = vld [vmem:[#allocation118_spill] sm:$0xff]  ;;  %v3725_v14 = vld [vmem:[%s4155_s26 + $0x330] sm:$0xff] }
 0x198   : > { %v3108_v46 = vadd.f32 %v3107_v54, %v8401_v11  ;;  %v3255_v5 = vadd.f32 %v3254_v10, %v3253_v51  ;;  %v6593_v45 = vrot.slane %v6440_v55, %v4180_v7  ;;  %v6596_v56 = vmul.f32 %v8404_v31, %v482_v60  ;;  %v8405_v0 = vld [vmem:[#allocation219_spill] sm:$0xff]  ;;  %v8406_v40 = vld [vmem:[#allocation58_spill] sm:$0xff]  ;;  %v3726_v51 = vld [vmem:[%s4155_s26 + $0x440] sm:$0x3] }
 0x199   : > { %v3258_v48 = vsel %vm2734_vm1, %v6419_v32, 0.0  ;;  %v6602_v10 = vmul.f32 %v3725_v14, %v8405_v0  ;;  %v2696_v37 = vadd.f32 %v2695_v38, %v8406_v40  ;;  %v8407_v11 = vld [vmem:[#allocation15_spill] sm:$0xff]  ;;  %v3260_v32 = vsel %vm2734_vm1, %v6422_v35, 0.0  ;;  %v484_v14 = vld [vmem:[%s4155_s26 + $0x6c0] sm:$0x3] }
 0x19a   : > { %v3109_v54 = vadd.f32 %v3108_v46, %v8403_v20  ;;  %v3257_v25 = vadd.f32 %v3256_v43, %v3255_v5  ;;  %v2228_v46 = vmul.f32 %v3726_v51, %v8407_v11  ;;  %v8409_v57 = vld [vmem:[#allocation119_spill] sm:$0xff]  ;;  %v2747_v60 = vadd.f32 %v2746_v28, %v2745_v44  ;;  %v3727_v38 = vld [vmem:[%s4155_s26 + $0x448] sm:$0x3]  ;;  %v8410_v40 = vld [vmem:[#allocation205_spill] sm:$0xff] }
 0x19b   : > { %v6609_v20 = vmul.f32 %v8409_v57, %v483_v4  ;;  %v2697_v31 = vadd.f32 %v2696_v37, %v6327_v13  ;;  %v2229_v43 = vmul.f32 %v3727_v38, %v8410_v40  ;;  %v2748_v5 = vsel %vm2734_vm1, %v2227_v15, 0.0  ;;  %v8411_v51 = vld [vmem:[#allocation201_spill] sm:$0xff]  ;;  %v8415_v38 = vld [vmem:[#allocation120_spill] sm:$0xff] }
 0x19c   : > { %v3110_v53 = vadd.f32 %v3109_v54, %v8408_v16  ;;  %v3259_v0 = vadd.f32 %v3258_v48, %v3257_v25  ;;  %v6621_v4 = vrot.slane %v6440_v55, %v4183_v8  ;;  %v3728_v54 = vld [vmem:[%s4155_s26 + $0x338] sm:$0xff]  ;;  %v8412_v16 = vld [vmem:[#allocation57_spill] sm:$0xff]  ;;  %v3262_v13 = vsel %vm2734_vm1, %v6426_v1, 0.0  ;;  %v3729_v48 = vld [vmem:[%s4155_s26 + $0x450] sm:$0x3] }
 0x19d   : > { %v6625_v35 = vmul.f32 %v3728_v54, %v8412_v16  ;;  %v2698_v44 = vadd.f32 %v2697_v31, %v6351_v3  ;;  %v8413_v37 = vld [vmem:[#allocation209_spill] sm:$0xff]  ;;  %v2750_v25 = vsel %vm2734_vm1, %v2228_v46, 0.0  ;;  %v6635_v40 = vmul.f32 %v8415_v38, %v484_v14  ;;  %v8417_v46 = vld [vmem:[#allocation16_spill] sm:$0xff]  ;;  %v8419_v14 = vld [vmem:[#allocation62_spill] sm:$0xff] }
 0x19e   : > { %v3111_v11 = vadd.f32 %v3110_v53, %v8411_v51  ;;  %v3261_v28 = vadd.f32 %v3260_v32, %v3259_v0  ;;  %v2230_v15 = vmul.f32 %v3729_v48, %v8413_v37  ;;  %v8414_v53 = vld [vmem:[#allocation150_spill] sm:$0xff]  ;;  %v3264_v51 = vsel %vm2734_vm1, %v6429_v34, 0.0  ;;  %v3730_v0 = vld [vmem:[%s4155_s26 + $0x458] sm:$0x3]  ;;  %v8416_v32 = vld [vmem:[#allocation211_spill] sm:$0xff] }
 0x19f   : > { %v2749_v54 = vadd.f32 %v2748_v5, %v2747_v60  ;;  %v2699_v1 = vadd.f32 %v2698_v44, %v6380_v59  ;;  %v2231_v31 = vmul.f32 %v3730_v0, %v8416_v32  ;;  %v2752_v48 = vsel %vm2734_vm1, %v2229_v43, 0.0  ;;  %v6652_v5 = vld [vmem:[%s4155_s26 + $0x6c8] sm:$0x3]  ;;  %v3731_v44 = vld [vmem:[%s4155_s26 + $0x460] sm:$0x3] }
 0x1a0   : > { %v3112_v57 = vadd.f32 %v3111_v11, %v8414_v53  ;;  %v3263_v3 = vadd.f32 %v3262_v13, %v3261_v28  ;;  %v8418_v11 = vld [vmem:[#allocation10_spill] sm:$0xff]  ;;  %v3266_v34 = vsel %vm2734_vm1, %v6458_v41, 0.0  ;;  %v8420_v28 = vld [vmem:[#allocation213_spill] sm:$0xff]  ;;  %v2754_v43 = vsel %vm2734_vm1, %v2230_v15, 0.0 }
 0x1a1   : > { %v6646_v53 = vrot.slane %v6440_v55, %v8418_v11  ;;  %v2751_v60 = vadd.f32 %v2750_v25, %v2749_v54  ;;  %v2700_v59 = vadd.f32 %v2699_v1, %v8419_v14  ;;  %v2232_v38 = vmul.f32 %v3731_v44, %v8420_v28  ;;  %v3732_v32 = vld [vmem:[%s4155_s26 + $0x340] sm:$0xff]  ;;  %v3733_v1 = vld [vmem:[%s4155_s26 + $0x468] sm:$0x3] }
 0x1a2   : > { %v3113_v37 = vadd.f32 %v3112_v57, %v8417_v46  ;;  %v3265_v13 = vadd.f32 %v3264_v51, %v3263_v3  ;;  %v8421_v57 = vld [vmem:[#allocation20_spill] sm:$0xff]  ;;  %v3268_v41 = vsel %vm2734_vm1, %v6469_v58, 0.0  ;;  %v8423_v3 = vld [vmem:[#allocation214_spill] sm:$0xff]  ;;  %v2756_v15 = vsel %vm2734_vm1, %v2231_v31, 0.0  ;;  %v8425_v28 = vld [vmem:[#allocation121_spill] sm:$0xff] }
 0x1a3   : > { %v8422_v46 = vld [vmem:[#allocation60_spill] sm:$0xff]  ;;  %v2753_v25 = vadd.f32 %v2752_v48, %v2751_v60  ;;  %v2701_v54 = vadd.f32 %v2700_v59, %v6451_v42  ;;  %v2233_v14 = vmul.f32 %v3733_v1, %v8423_v3  ;;  %v3270_v58 = vsel %vm2734_vm1, %v6472_v39, 0.0  ;;  %v8426_v59 = vld [vmem:[#allocation217_spill] sm:$0xff] }
 0x1a4   : > { %v3114_v0 = vadd.f32 %v3113_v37, %v8421_v57  ;;  %v6660_v16 = vmul.f32 %v3732_v32, %v8422_v46  ;;  %v3267_v51 = vadd.f32 %v3266_v34, %v3265_v13  ;;  %v8424_v37 = vld [vmem:[#allocation22_spill] sm:$0xff]  ;;  %v6671_v57 = vmul.f32 %v8425_v28, %v6652_v5  ;;  %v3734_v34 = vld [vmem:[%s4155_s26 + $0x470] sm:$0x3]  ;;  %v8427_v31 = vld [vmem:[#allocation25_spill] sm:$0xff] }
 0x1a5   : > { %v2755_v48 = vadd.f32 %v2754_v43, %v2753_v25  ;;  %v2702_v42 = vadd.f32 %v2701_v54, %v6482_v63  ;;  %v2234_v13 = vmul.f32 %v3734_v34, %v8426_v59  ;;  %v2758_v32 = vsel %vm2734_vm1, %v2232_v38, 0.0  ;;  %v3736_v3 = vld.sshfl [vmem:[%s4149_s17 + $0xf8] sm:$0xff pattern:$0x75316420]  ;;  %v8428_v54 = vld [vmem:[#allocation59_spill] sm:$0xff] }
 0x1a6   : > { %v3115_v44 = vadd.f32 %v3114_v0, %v8424_v37  ;;  %v3269_v60 = vadd.f32 %v3268_v41, %v3267_v51  ;;  %v3735_v0 = vld.sshfl [vmem:[%s4149_s17 + $0xf0] sm:$0xff pattern:$0x75316420]  ;;  %v3272_v39 = vsel %vm2734_vm1, %v6490_v24, 0.0  ;;  %v3737_v25 = vld [vmem:[%s4155_s26 + $0x478] sm:$0x3]  ;;  %v6693_v34 = vrot.slane %v6440_v55, %v4210_v21 }
 0x1a7   : > { %v6682_v37 = vcombine.low %v3735_v0, %v3736_v3  ;;  %v2757_v43 = vadd.f32 %v2756_v15, %v2755_v48  ;;  %v2703_v63 = vadd.f32 %v2702_v42, %v6520_v30  ;;  %v2235_v51 = vmul.f32 %v3737_v25, %v8428_v54  ;;  %v3738_v42 = vld [vmem:[%s4155_s26 + $0x480] sm:$0x3]  ;;  %v3739_v0 = vld [vmem:[%s4155_s26 + $0x348] sm:$0xff] }
 0x1a8   : > { %v3116_v1 = vadd.f32 %v3115_v44, %v8427_v31  ;;  %v3271_v41 = vadd.f32 %v3270_v58, %v3269_v60  ;;  %v2760_v38 = vsel %vm2734_vm1, %v2233_v14, 0.0  ;;  %v8429_v44 = vld [vmem:[#allocation23_spill] sm:$0xff]  ;;  %8430 = vst [vmem:[#allocation222_spill] sm:$0xff] %v6693_v34  ;;  %v3274_v24 = vsel %vm2734_vm1, %v6500_v62, 0.0  ;;  %v8431_v60 = vld [vmem:[#allocation18_spill] sm:$0xff]  ;;  %v8432_v31 = vld [vmem:[#allocation24_spill] sm:$0xff] }
 0x1a9   : > { %v2759_v15 = vadd.f32 %v2758_v32, %v2757_v43  ;;  %v2704_v30 = vadd.f32 %v2703_v63, %v6562_v52  ;;  %v6699_v58 = vld [vmem:[%s4155_s26 + $0x6d0] sm:$0x3]  ;;  %v2236_v14 = vmul.f32 %v3738_v42, %v8431_v60  ;;  %v2762_v59 = vsel %vm2734_vm1, %v2234_v13, 0.0  ;;  %v8433_v3 = vld [vmem:[#allocation73_spill] sm:$0xff]  ;;  %v6711_v43 = vld [vmem:[%s4155_s26 + $0x6d8] sm:$0x3] }
 0x1aa   : > { %v3117_v28 = vadd.f32 %v3116_v1, %v8429_v44  ;;  %v3273_v48 = vadd.f32 %v3272_v39, %v3271_v41  ;;  %v2197_v25 = vmul.f32 %v3739_v0, %v8433_v3  ;;  %v3276_v62 = vsel %vm2734_vm1, %v6503_v18, 0.0  ;;  %v3740_v63 = vld [vmem:[%s4155_s26 + $0x488] sm:$0x3]  ;;  %v8434_v41 = vld [vmem:[#allocation221_spill] sm:$0xff]  ;;  %v8436_v18 = vld [vmem:[#allocation123_spill] sm:$0xff] }
 0x1ab   : > { %v2761_v32 = vadd.f32 %v2760_v38, %v2759_v15  ;;  %v2705_v52 = vadd.f32 %v2704_v30, %v6581_v26  ;;  %v2237_v54 = vmul.f32 %v3740_v63, %v8434_v41  ;;  %v2764_v13 = vsel %vm2734_vm1, %v2235_v51, 0.0  ;;  %v3741_v51 = vld [vmem:[%s4155_s26 + $0x490] sm:$0x3]  ;;  %v8437_v30 = vld [vmem:[#allocation224_spill] sm:$0xff] }
 0x1ac   : > { %v3118_v1 = vadd.f32 %v3117_v28, %v8432_v31  ;;  %v3275_v39 = vadd.f32 %v3274_v24, %v3273_v48  ;;  %v6718_v44 = vrot.slane %v6440_v55, %v4229_v33  ;;  %v6722_v38 = vmul.f32 %v8436_v18, %v6699_v58  ;;  %v3742_v60 = vld [vmem:[%s4155_s26 + $0x350] sm:$0xff]  ;;  %v8438_v31 = vld [vmem:[#allocation61_spill] sm:$0xff]  ;;  %v8439_v0 = vld [vmem:[#allocation124_spill] sm:$0xff] }
 0x1ad   : > { %v3278_v26 = vsel %vm2734_vm1, %v6515_v9, 0.0  ;;  %v2763_v28 = vadd.f32 %v2762_v59, %v2761_v32  ;;  %v2706_v24 = vadd.f32 %v2705_v52, %v6602_v10  ;;  %v2238_v48 = vmul.f32 %v3741_v51, %v8437_v30  ;;  %v3743_v52 = vld [vmem:[%s4155_s26 + $0x498] sm:$0x3] }
 0x1ae   : > { %3119 = vadd.xlane.f32.xlu1 %v3118_v1  ;;  %8435 = vst [vmem:[#allocation65_spill] sm:$0xff] %v6718_v44  ;;  %v3277_v15 = vadd.f32 %v3276_v62, %v3275_v39  ;;  %v2766_v42 = vsel %vm2734_vm1, %v2236_v14, 0.0  ;;  %v2198_v1 = vmul.f32 %v3742_v60, %v8438_v31  ;;  %v6734_v63 = vmul.f32 %v8439_v0, %v6711_v43  ;;  %v6740_v62 = vld [vmem:[%s4155_s26 + $0x6e0] sm:$0x3]  ;;  %v8440_v14 = vld [vmem:[#allocation228_spill] sm:$0xff] }
 0x1af   : > { %v3280_v9 = vsel %vm2734_vm1, %v6532_v47, 0.0  ;;  %v2765_v10 = vadd.f32 %v2764_v13, %v2763_v28  ;;  %v2707_v59 = vadd.f32 %v2706_v24, %v6625_v35  ;;  %v2239_v39 = vmul.f32 %v3743_v52, %v8440_v14  ;;  %v3744_v51 = vld [vmem:[%s4155_s26 + $0x358] sm:$0xff]  ;;  %v6755_v28 = vld [vmem:[%s4155_s26 + $0x6e8] sm:$0x3]  ;;  %v8445_v14 = vld [vmem:[#allocation125_spill] sm:$0xff] }
 0x1b0   : > { %v3279_v32 = vadd.f32 %v3278_v26, %v3277_v15  ;;  %v2768_v41 = vsel %vm2734_vm1, %v2237_v54, 0.0  ;;  %v6747_v18 = vrot.slane %v6440_v55, %v4255_v50  ;;  %v8442_v30 = vld [vmem:[#allocation220_spill] sm:$0xff]  ;;  %v3282_v13 = vsel %vm2734_vm1, %v6535_v27, 0.0  ;;  %v3745_v15 = vld [vmem:[%s4155_s26 + $0x4a0] sm:$0x3] }
 0x1b1   : > { %v2199_v47 = vmul.f32 %v3744_v51, %v8442_v30  ;;  %v2767_v35 = vadd.f32 %v2766_v42, %v2765_v10  ;;  %v2708_v26 = vadd.f32 %v2707_v59, %v6660_v16  ;;  %v8443_v54 = vld [vmem:[#allocation232_spill] sm:$0xff]  ;;  %v2770_v0 = vsel %vm2734_vm1, %v2238_v48, 0.0  ;;  %v3746_v59 = vld [vmem:[%s4155_s26 + $0x4a8] sm:$0x3]  ;;  %v8453_v30 = vld [vmem:[#allocation127_spill] sm:$0xff] }
 0x1b2   : > { %8441 = vst [vmem:[#allocation223_spill] sm:$0xff] %v6747_v18  ;;  %v3281_v24 = vadd.f32 %v3280_v9, %v3279_v32  ;;  %v2240_v60 = vmul.f32 %v3745_v15, %v8443_v54  ;;  %v6762_v52 = vrot.slane %v6440_v55, %v4278_v61  ;;  %v6766_v27 = vmul.f32 %v8445_v14, %v6740_v62  ;;  %v8446_v32 = vld [vmem:[#allocation236_spill] sm:$0xff]  ;;  %v3747_v15 = vld [vmem:[%s4155_s26 + $0x360] sm:$0xff]  ;;  %v8447_v54 = vld [vmem:[#allocation126_spill] sm:$0xff] }
 0x1b3   : > { %v3284_v16 = vsel %vm2734_vm1, %v6542_v49, 0.0  ;;  %v2769_v42 = vadd.f32 %v2768_v41, %v2767_v35  ;;  %v2709_v9 = vadd.f32 %v2708_v26, %v2197_v25  ;;  %v2241_v48 = vmul.f32 %v3746_v59, %v8446_v32  ;;  %v3748_v26 = vld [vmem:[%s4155_s26 + $0x4b0] sm:$0x3] }
 0x1b4   : > { %8444 = vst [vmem:[#allocation67_spill] sm:$0xff] %v6762_v52  ;;  %v3283_v10 = vadd.f32 %v3282_v13, %v3281_v24  ;;  %v2772_v51 = vsel %vm2734_vm1, %v2239_v39, 0.0  ;;  %v2200_v55 = vmul.f32 %v3747_v15, %v6447_v17  ;;  %v6777_v14 = vmul.f32 %v8447_v54, %v6755_v28  ;;  %v6782_v13 = vld [vmem:[%s4155_s26 + $0x6f0] sm:$0x3]  ;;  %v8448_v24 = vld [vmem:[#allocation240_spill] sm:$0xff]  ;;  %v3749_v15 = vld [vmem:[%s4155_s26 + $0x368] sm:$0xff] }
 0x1b5   : > { %v3286_v49 = vsel %vm2734_vm1, %v6545_v22, 0.0  ;;  %v2771_v41 = vadd.f32 %v2770_v0, %v2769_v42  ;;  %v2710_v25 = vadd.f32 %v2709_v9, %v2198_v1  ;;  %v2242_v39 = vmul.f32 %v3748_v26, %v8448_v24  ;;  %v8450_v54 = vld [vmem:[#allocation80_spill] sm:$0xff]  ;;  %v3751_v26 = vld [vmem:[%s4155_s26 + $0x370] sm:$0xff] }
 0x1b6   : > { %v3285_v35 = vadd.f32 %v3284_v16, %v3283_v10  ;;  %v2774_v59 = vsel %vm2734_vm1, %v2240_v60, 0.0  ;;  %v6789_v32 = vrot.slane %v6682_v37, %v4177_v6  ;;  %v2201_v17 = vmul.f32 %v3749_v15, %v8450_v54  ;;  %v3750_v42 = vld [vmem:[%s4155_s26 + $0x4b8] sm:$0x3] }
 0x1b7   : > { %v3288_v22 = vsel %vm2734_vm1, %v6565_v29, 0.0  ;;  %v2773_v1 = vadd.f32 %v2772_v51, %v2771_v41  ;;  %v2711_v0 = vadd.f32 %v2710_v25, %v2199_v47  ;;  %v8451_v9 = vld [vmem:[#allocation244_spill] sm:$0xff]  ;;  %v2776_v60 = vsel %vm2734_vm1, %v2241_v48, 0.0  ;;  %v3752_v25 = vld [vmem:[%s4155_s26 + $0x4c0] sm:$0x3] }
 0x1b8   : > { %8449 = vst [vmem:[#allocation87_spill] sm:$0xff] %v6789_v32  ;;  %v3287_v16 = vadd.f32 %v3286_v49, %v3285_v35  ;;  %v2243_v10 = vmul.f32 %v3750_v42, %v8451_v9  ;;  %v8452_v6 = vld [vmem:[#allocation64_spill] sm:$0xff]  ;;  %v6802_v31 = vmul.f32 %v8453_v30, %v6782_v13  ;;  %v3290_v29 = vsel %vm2734_vm1, %v6576_v12, 0.0  ;;  %v8454_v35 = vld [vmem:[#allocation19_spill] sm:$0xff] }
 0x1b9   : > { %v2202_v24 = vmul.f32 %v3751_v26, %v8452_v6  ;;  %v2775_v51 = vadd.f32 %v2774_v59, %v2773_v1  ;;  %v2712_v47 = vadd.f32 %v2711_v0, %v2200_v55  ;;  %v6807_v49 = vld [vmem:[%s4155_s26 + $0x6f8] sm:$0x3]  ;;  %v2244_v48 = vmul.f32 %v3752_v25, %v8454_v35  ;;  %v3754_v1 = vld [vmem:[%s4155_s26 + $0x4c8] sm:$0x3]  ;;  %v8456_v0 = vld [vmem:[#allocation199_spill] sm:$0xff] }
 0x1ba   : > { %v3289_v41 = vadd.f32 %v3288_v22, %v3287_v16  ;;  %v2778_v15 = vsel %vm2734_vm1, %v2242_v39, 0.0  ;;  %v6814_v42 = vrot.slane %v6682_v37, %v4180_v7  ;;  %v3753_v30 = vld [vmem:[%s4155_s26 + $0x378] sm:$0xff]  ;;  %v3292_v12 = vsel %vm2734_vm1, %v6596_v56, 0.0  ;;  %v3755_v26 = vld [vmem:[%s4155_s26 + $0x380] sm:$0xff] }
 0x1bb   : > { %v2203_v9 = vmul.f32 %v3753_v30, %v6550_v2  ;;  %v2777_v55 = vadd.f32 %v2776_v60, %v2775_v51  ;;  %v2713_v59 = vadd.f32 %v2712_v47, %v2201_v17  ;;  %v2245_v16 = vmul.f32 %v3754_v1, %v8456_v0  ;;  %v8457_v25 = vld [vmem:[#allocation128_spill] sm:$0xff]  ;;  %v3756_v47 = vld [vmem:[%s4155_s26 + $0x4d0] sm:$0x3]  ;;  %v3757_v0 = vld [vmem:[%s4155_s26 + $0x388] sm:$0xff] }
 0x1bc   : > { %8455 = vst [vmem:[#allocation68_spill] sm:$0xff] %v6814_v42  ;;  %v3291_v22 = vadd.f32 %v3290_v29, %v3289_v41  ;;  %v2780_v39 = vsel %vm2734_vm1, %v2243_v10, 0.0  ;;  %v2204_v7 = vmul.f32 %v3755_v26, %v6571_v19  ;;  %v6827_v35 = vmul.f32 %v8457_v25, %v6807_v49  ;;  %v6832_v29 = vld [vmem:[%s4155_s26 + $0x700] sm:$0x3]  ;;  %v8458_v41 = vld [vmem:[#allocation200_spill] sm:$0xff]  ;;  %v3759_v25 = vld [vmem:[%s4155_s26 + $0x390] sm:$0xff] }
 0x1bd   : > { %v3294_v56 = vsel %vm2734_vm1, %v6609_v20, 0.0  ;;  %v2779_v60 = vadd.f32 %v2778_v15, %v2777_v55  ;;  %v2714_v17 = vadd.f32 %v2713_v59, %v2202_v24  ;;  %v2246_v10 = vmul.f32 %v3756_v47, %v8458_v41  ;;  %v3758_v55 = vld [vmem:[%s4155_s26 + $0x4d8] sm:$0x3]  ;;  %v8460_v59 = vld [vmem:[#allocation13_spill] sm:$0xff]  ;;  %v8461_v47 = vld [vmem:[#allocation130_spill] sm:$0xff] }
 0x1be   : > { %v3293_v51 = vadd.f32 %v3292_v12, %v3291_v22  ;;  %v2782_v30 = vsel %vm2734_vm1, %v2244_v48, 0.0  ;;  %v6839_v1 = vrot.slane %v6682_v37, %v4183_v8  ;;  %v2205_v26 = vmul.f32 %v3757_v0, %v6593_v45 }
 0x1bf   : > { %v3296_v20 = vsel %vm2734_vm1, %v6635_v40, 0.0  ;;  %v2781_v24 = vadd.f32 %v2780_v39, %v2779_v60  ;;  %v2715_v15 = vadd.f32 %v2714_v17, %v2203_v9  ;;  %v2247_v22 = vmul.f32 %v3758_v55, %v8460_v59  ;;  %v3760_v17 = vld [vmem:[%s4155_s26 + $0x4e0] sm:$0x3]  ;;  %v3761_v59 = vld [vmem:[%s4155_s26 + $0x398] sm:$0xff] }
 0x1c0   : > { %8459 = vst [vmem:[#allocation225_spill] sm:$0xff] %v6839_v1  ;;  %v3295_v12 = vadd.f32 %v3294_v56, %v3293_v51  ;;  %v2784_v48 = vsel %vm2734_vm1, %v2245_v16, 0.0  ;;  %v2206_v8 = vmul.f32 %v3759_v25, %v6621_v4  ;;  %v6852_v41 = vmul.f32 %v8461_v47, %v6832_v29  ;;  %v6857_v56 = vld [vmem:[%s4155_s26 + $0x708] sm:$0x3]  ;;  %v3763_v47 = vld [vmem:[%s4155_s26 + $0x3a0] sm:$0xff] }
 0x1c1   : > { %v3298_v40 = vsel %vm2734_vm1, %v6671_v57, 0.0  ;;  %v2783_v39 = vadd.f32 %v2782_v30, %v2781_v24  ;;  %v2716_v9 = vadd.f32 %v2715_v15, %v2204_v7  ;;  %v8462_v51 = vld [vmem:[#allocation14_spill] sm:$0xff]  ;;  %v2786_v0 = vsel %vm2734_vm1, %v2246_v10, 0.0  ;;  %v8464_v15 = vld [vmem:[#allocation204_spill] sm:$0xff] }
 0x1c2   : > { %v3297_v60 = vadd.f32 %v3296_v20, %v3295_v12  ;;  %v2248_v16 = vmul.f32 %v3760_v17, %v8462_v51  ;;  %v6864_v55 = vrot.slane %v6682_v37, %v8418_v11  ;;  %v2207_v25 = vmul.f32 %v3761_v59, %v6646_v53  ;;  %v3762_v24 = vld [vmem:[%s4155_s26 + $0x4e8] sm:$0x3]  ;;  %v8465_v17 = vld [vmem:[#allocation131_spill] sm:$0xff] }
 0x1c3   : > { %v3300_v57 = vsel %vm2734_vm1, %v6722_v38, 0.0  ;;  %v2785_v7 = vadd.f32 %v2784_v48, %v2783_v39  ;;  %v2717_v30 = vadd.f32 %v2716_v9, %v2205_v26  ;;  %v2249_v12 = vmul.f32 %v3762_v24, %v8464_v15  ;;  %v3764_v9 = vld [vmem:[%s4155_s26 + $0x4f0] sm:$0x3]  ;;  %v3765_v15 = vld [vmem:[%s4155_s26 + $0x3a8] sm:$0xff] }
 0x1c4   : > { %8463 = vst [vmem:[#allocation69_spill] sm:$0xff] %v6864_v55  ;;  %v3299_v20 = vadd.f32 %v3298_v40, %v3297_v60  ;;  %v2788_v10 = vsel %vm2734_vm1, %v2247_v22, 0.0  ;;  %v2208_v11 = vmul.f32 %v3763_v47, %v6693_v34  ;;  %v6877_v51 = vmul.f32 %v8465_v17, %v6857_v56  ;;  %v6882_v40 = vld [vmem:[%s4155_s26 + $0x710] sm:$0x3]  ;;  %v8466_v60 = vld [vmem:[#allocation157_spill] sm:$0xff] }
 0x1c5   : > { %v3302_v38 = vsel %vm2734_vm1, %v6734_v63, 0.0  ;;  %v2787_v48 = vadd.f32 %v2786_v0, %v2785_v7  ;;  %v2718_v26 = vadd.f32 %v2717_v30, %v2206_v8  ;;  %v2250_v22 = vmul.f32 %v3764_v9, %v8466_v60  ;;  %v3766_v7 = vld [vmem:[%s4155_s26 + $0x4f8] sm:$0x3]  ;;  %v8468_v30 = vld [vmem:[#allocation158_spill] sm:$0xff]  ;;  %v3767_v17 = vld [vmem:[%s4155_s26 + $0x3b0] sm:$0xff] }
 0x1c6   : > { %v3301_v39 = vadd.f32 %v3300_v57, %v3299_v20  ;;  %v2790_v59 = vsel %vm2734_vm1, %v2248_v16, 0.0  ;;  %v6889_v24 = vrot.slane %v6682_v37, %v4210_v21  ;;  %v2209_v47 = vmul.f32 %v3765_v15, %v6718_v44  ;;  %v8469_v9 = vld [vmem:[#allocation132_spill] sm:$0xff] }
 0x1c7   : > { %v3304_v63 = vsel %vm2734_vm1, %v6766_v27, 0.0  ;;  %v2789_v8 = vadd.f32 %v2788_v10, %v2787_v48  ;;  %v2719_v0 = vadd.f32 %v2718_v26, %v2207_v25  ;;  %v2251_v20 = vmul.f32 %v3766_v7, %v8468_v30  ;;  %v6905_v25 = vld [vmem:[%s4155_s26 + $0x718] sm:$0x3]  ;;  %v3768_v48 = vld [vmem:[%s4155_s26 + $0x500] sm:$0x3]  ;;  %v8470_v26 = vld [vmem:[#allocation163_spill] sm:$0xff] }
 0x1c8   : > { %8467 = vst [vmem:[#allocation226_spill] sm:$0xff] %v6889_v24  ;;  %v3303_v57 = vadd.f32 %v3302_v38, %v3301_v39  ;;  %v2792_v16 = vsel %vm2734_vm1, %v2249_v12, 0.0  ;;  %v2210_v21 = vmul.f32 %v3767_v17, %v6747_v18  ;;  %v2574_v60 = vmul.f32 %v8469_v9, %v6882_v40  ;;  %v3769_v30 = vld [vmem:[%s4155_s26 + $0x3b8] sm:$0xff]  ;;  %v3771_v9 = vld [vmem:[%s4155_s26 + $0x3c0] sm:$0xff] }
 0x1c9   : > { %v3306_v15 = vsel %vm2734_vm1, %v6777_v14, 0.0  ;;  %v2791_v27 = vadd.f32 %v2790_v59, %v2789_v8  ;;  %v2720_v10 = vadd.f32 %v2719_v0, %v2208_v11  ;;  %v2252_v39 = vmul.f32 %v3768_v48, %v8470_v26  ;;  %v3770_v8 = vld [vmem:[%s4155_s26 + $0x508] sm:$0x3]  ;;  %v8473_v48 = vld [vmem:[#allocation133_spill] sm:$0xff] }
 0x1ca   : > { %v3305_v38 = vadd.f32 %v3304_v63, %v3303_v57  ;;  %v2794_v12 = vsel %vm2734_vm1, %v2250_v22, 0.0  ;;  %v6912_v7 = vrot.slane %v6682_v37, %v4229_v33  ;;  %v2211_v17 = vmul.f32 %v3769_v30, %v6762_v52  ;;  %v8472_v0 = vld [vmem:[#allocation166_spill] sm:$0xff] }
 0x1cb   : > { %v3308_v14 = vsel %vm2734_vm1, %v6802_v31, 0.0  ;;  %v2793_v11 = vadd.f32 %v2792_v16, %v2791_v27  ;;  %v2721_v59 = vadd.f32 %v2720_v10, %v2209_v47  ;;  %v2253_v57 = vmul.f32 %v3770_v8, %v8472_v0  ;;  %v6928_v47 = vld [vmem:[%s4155_s26 + $0x720] sm:$0x3]  ;;  %v3772_v27 = vld [vmem:[%s4155_s26 + $0x510] sm:$0x3]  ;;  %v3773_v0 = vld [vmem:[%s4155_s26 + $0x3c8] sm:$0xff] }
 0x1cc   : > { %8471 = vst [vmem:[#allocation70_spill] sm:$0xff] %v6912_v7  ;;  %v3307_v63 = vadd.f32 %v3306_v15, %v3305_v38  ;;  %v2796_v22 = vsel %vm2734_vm1, %v2251_v20, 0.0  ;;  %v2212_v33 = vmul.f32 %v3771_v9, %v6789_v32  ;;  %v2575_v26 = vmul.f32 %v8473_v48, %v6905_v25  ;;  %v8474_v10 = vld [vmem:[#allocation27_spill] sm:$0xff] }
 0x1cd   : > { %v3310_v30 = vsel %vm2734_vm1, %v6827_v35, 0.0  ;;  %v2795_v31 = vadd.f32 %v2794_v12, %v2793_v11  ;;  %v2722_v16 = vadd.f32 %v2721_v59, %v2210_v21  ;;  %v2254_v38 = vmul.f32 %v3772_v27, %v8474_v10  ;;  %v3774_v11 = vld [vmem:[%s4155_s26 + $0x518] sm:$0x3]  ;;  %v8476_v59 = vld [vmem:[#allocation167_spill] sm:$0xff]  ;;  %v8477_v27 = vld [vmem:[#allocation134_spill] sm:$0xff] }
 0x1ce   : > { %v3309_v15 = vadd.f32 %v3308_v14, %v3307_v63  ;;  %v2798_v20 = vsel %vm2734_vm1, %v2252_v39, 0.0  ;;  %v6935_v8 = vrot.slane %v6682_v37, %v4255_v50  ;;  %v2213_v9 = vmul.f32 %v3773_v0, %v6814_v42  ;;  %v3775_v48 = vld [vmem:[%s4155_s26 + $0x3d0] sm:$0xff] }
 0x1cf   : > { %v3312_v35 = vsel %vm2734_vm1, %v6852_v41, 0.0  ;;  %v2797_v21 = vadd.f32 %v2796_v22, %v2795_v31  ;;  %v2723_v12 = vadd.f32 %v2722_v16, %v2211_v17  ;;  %v2255_v63 = vmul.f32 %v3774_v11, %v8476_v59  ;;  %v6951_v22 = vld [vmem:[%s4155_s26 + $0x728] sm:$0x3]  ;;  %v3776_v31 = vld [vmem:[%s4155_s26 + $0x520] sm:$0x3]  ;;  %v3777_v59 = vld [vmem:[%s4155_s26 + $0x3d8] sm:$0xff] }
 0x1d0   : > { %8475 = vst [vmem:[#allocation227_spill] sm:$0xff] %v6935_v8  ;;  %v3311_v14 = vadd.f32 %v3310_v30, %v3309_v15  ;;  %v2800_v39 = vsel %vm2734_vm1, %v2253_v57, 0.0  ;;  %v2214_v50 = vmul.f32 %v3775_v48, %v6839_v1  ;;  %v2576_v10 = vmul.f32 %v8477_v27, %v6928_v47  ;;  %v8478_v16 = vld [vmem:[#allocation26_spill] sm:$0xff]  ;;  %v8480_v48 = vld [vmem:[#allocation28_spill] sm:$0xff] }
 0x1d1   : > { %v3314_v0 = vsel %vm2734_vm1, %v6877_v51, 0.0  ;;  %v2799_v41 = vadd.f32 %v2798_v20, %v2797_v21  ;;  %v2724_v17 = vadd.f32 %v2723_v12, %v2212_v33  ;;  %v2256_v57 = vmul.f32 %v3776_v31, %v8478_v16  ;;  %v6964_v12 = vld [vmem:[%s4155_s26 + $0x730] sm:$0x3] }
 0x1d2   : > { %v3313_v30 = vadd.f32 %v3312_v35, %v3311_v14  ;;  %v2802_v15 = vsel %vm2734_vm1, %v2254_v38, 0.0  ;;  %v6958_v11 = vrot.slane %v6682_v37, %v4278_v61  ;;  %v2215_v51 = vmul.f32 %v3777_v59, %v6864_v55  ;;  %v3778_v14 = vld [vmem:[%s4155_s26 + $0x528] sm:$0x3]  ;;  %v3779_v61 = vld [vmem:[%s4155_s26 + $0x3e0] sm:$0xff]  ;;  %v8481_v31 = vld [vmem:[#allocation135_spill] sm:$0xff] }
 0x1d3   : > { %v3316_v20 = vsel %vm2734_vm1, %v2574_v60, 0.0  ;;  %v2801_v33 = vadd.f32 %v2800_v39, %v2799_v41  ;;  %v2725_v21 = vadd.f32 %v2724_v17, %v2213_v9  ;;  %v2257_v38 = vmul.f32 %v3778_v14, %v8480_v48  ;;  %v6975_v41 = vld [vmem:[%s4155_s26 + $0x738] sm:$0x3]  ;;  %v3780_v17 = vld [vmem:[%s4155_s26 + $0x530] sm:$0x3]  ;;  %v3781_v14 = vld [vmem:[%s4155_s26 + $0x3e8] sm:$0xff] }
 0x1d4   : > { %8479 = vst [vmem:[#allocation71_spill] sm:$0xff] %v6958_v11  ;;  %v3315_v35 = vadd.f32 %v3314_v0, %v3313_v30  ;;  %v2804_v27 = vsel %vm2734_vm1, %v2255_v63, 0.0  ;;  %v2216_v37 = vmul.f32 %v3779_v61, %v6889_v24  ;;  %v2577_v16 = vmul.f32 %v8481_v31, %v6951_v22  ;;  %v8482_v30 = vld [vmem:[#allocation168_spill] sm:$0xff]  ;;  %v8483_v61 = vld [vmem:[#allocation137_spill] sm:$0xff] }
 0x1d5   : > { %v3318_v60 = vsel %vm2734_vm1, %v2575_v26, 0.0  ;;  %v2803_v9 = vadd.f32 %v2802_v15, %v2801_v33  ;;  %v2726_v39 = vadd.f32 %v2725_v21, %v2214_v50  ;;  %v2258_v59 = vmul.f32 %v3780_v17, %v8482_v30  ;;  %v6986_v33 = vld [vmem:[%s4155_s26 + $0x740] sm:$0x3]  ;;  %v3782_v21 = vld [vmem:[%s4155_s26 + $0x538] sm:$0x3]  ;;  %v3783_v30 = vld [vmem:[%s4155_s26 + $0x3f0] sm:$0xff] }
 0x1d6   : > { %v3317_v0 = vadd.f32 %v3316_v20, %v3315_v35  ;;  %v2806_v63 = vsel %vm2734_vm1, %v2256_v57, 0.0  ;;  %v2217_v48 = vmul.f32 %v3781_v14, %v6912_v7  ;;  %v2578_v31 = vmul.f32 %v8483_v61, %v6964_v12  ;;  %v8484_v35 = vld [vmem:[#allocation206_spill] sm:$0xff] }
 0x1d7   : > { %v3320_v26 = vsel %vm2734_vm1, %v2576_v10, 0.0  ;;  %v2805_v50 = vadd.f32 %v2804_v27, %v2803_v9  ;;  %v2727_v15 = vadd.f32 %v2726_v39, %v2215_v51  ;;  %v2259_v17 = vmul.f32 %v3782_v21, %v8484_v35  ;;  %v8485_v7 = vld [vmem:[#allocation138_spill] sm:$0xff]  ;;  %v3784_v39 = vld [vmem:[%s4155_s26 + $0x540] sm:$0x3]  ;;  %v3785_v35 = vld [vmem:[%s4155_s26 + $0x3f8] sm:$0xff] }
 0x1d8   : > { %v3319_v20 = vadd.f32 %v3318_v60, %v3317_v0  ;;  %v2808_v57 = vsel %vm2734_vm1, %v2257_v38, 0.0  ;;  %v2218_v14 = vmul.f32 %v3783_v30, %v6935_v8  ;;  %v2579_v61 = vmul.f32 %v8485_v7, %v6975_v41  ;;  %v6997_v9 = vld [vmem:[%s4155_s26 + $0x748] sm:$0x3]  ;;  %v8486_v0 = vld [vmem:[#allocation29_spill] sm:$0xff]  ;;  %v8487_v8 = vld [vmem:[#allocation139_spill] sm:$0xff] }
 0x1d9   : > { %v3322_v10 = vsel %vm2734_vm1, %v2577_v16, 0.0  ;;  %v2807_v51 = vadd.f32 %v2806_v63, %v2805_v50  ;;  %v2728_v27 = vadd.f32 %v2727_v15, %v2216_v37  ;;  %v2260_v21 = vmul.f32 %v3784_v39, %v8486_v0  ;;  %v7008_v50 = vld [vmem:[%s4155_s26 + $0x750] sm:$0x3]  ;;  %v3786_v15 = vld [vmem:[%s4155_s26 + $0x548] sm:$0x3]  ;;  %v8489_v0 = vld [vmem:[#allocation140_spill] sm:$0xff] }
 0x1da   : > { %v3321_v60 = vadd.f32 %v3320_v26, %v3319_v20  ;;  %v2810_v38 = vsel %vm2734_vm1, %v2258_v59, 0.0  ;;  %v2219_v30 = vmul.f32 %v3785_v35, %v6958_v11  ;;  %v2580_v7 = vmul.f32 %v8487_v8, %v6986_v33  ;;  %v8488_v20 = vld [vmem:[#allocation173_spill] sm:$0xff] }
 0x1db   : > { %v3324_v16 = vsel %vm2734_vm1, %v2578_v31, 0.0  ;;  %v2809_v63 = vadd.f32 %v2808_v57, %v2807_v51  ;;  %v2729_v37 = vadd.f32 %v2728_v27, %v2217_v48  ;;  %v2261_v39 = vmul.f32 %v3786_v15, %v8488_v20  ;;  %v7017_v31 = vld [vmem:[%s4155_s26 + $0x758] sm:$0x3]  ;;  %v3787_v57 = vld [vmem:[%s4155_s26 + $0x550] sm:$0x3] }
 0x1dc   : > { %v3323_v26 = vadd.f32 %v3322_v10, %v3321_v60  ;;  %v2812_v59 = vsel %vm2734_vm1, %v2259_v17, 0.0  ;;  %v2581_v35 = vmul.f32 %v8489_v0, %v6997_v9  ;;  %v3326_v11 = vsel %vm2734_vm1, %v2579_v61, 0.0  ;;  %v8490_v51 = vld [vmem:[#allocation207_spill] sm:$0xff]  ;;  %v8491_v60 = vld [vmem:[#allocation141_spill] sm:$0xff] }
 0x1dd   : > { %v2811_v8 = vadd.f32 %v2810_v38, %v2809_v63  ;;  %v2730_v24 = vadd.f32 %v2729_v37, %v2218_v14  ;;  %v2262_v10 = vmul.f32 %v3787_v57, %v8490_v51  ;;  %v2814_v27 = vsel %vm2734_vm1, %v2260_v21, 0.0  ;;  %v7026_v61 = vld [vmem:[%s4155_s26 + $0x760] sm:$0x3]  ;;  %v3788_v38 = vld [vmem:[%s4155_s26 + $0x558] sm:$0x3]  ;;  %v8493_v21 = vld [vmem:[#allocation142_spill] sm:$0xff] }
 0x1de   : > { %v3325_v48 = vadd.f32 %v3324_v16, %v3323_v26  ;;  %v2582_v17 = vmul.f32 %v8491_v60, %v7008_v50  ;;  %v3328_v15 = vsel %vm2734_vm1, %v2580_v7, 0.0  ;;  %v8492_v16 = vld [vmem:[#allocation30_spill] sm:$0xff]  ;;  %v2816_v37 = vsel %vm2734_vm1, %v2261_v39, 0.0 }
 0x1df   : > { %v2813_v20 = vadd.f32 %v2812_v59, %v2811_v8  ;;  %v2731_v0 = vadd.f32 %v2730_v24, %v2219_v30  ;;  %v2263_v63 = vmul.f32 %v3788_v38, %v8492_v16  ;;  %v2583_v26 = vmul.f32 %v8493_v21, %v7017_v31  ;;  %v7035_v7 = vld [vmem:[%s4155_s26 + $0x768] sm:$0x3]  ;;  %v3789_v30 = vld [vmem:[%s4155_s26 + $0x560] sm:$0x3]  ;;  %v7044_v16 = vld [vmem:[%s4155_s26 + $0x770] sm:$0x3] }
 0x1e0   : > { %v3327_v14 = vadd.f32 %v3326_v11, %v3325_v48  ;;  %v3330_v57 = vsel %vm2734_vm1, %v2581_v35, 0.0  ;;  %v8494_v11 = vld [vmem:[#allocation174_spill] sm:$0xff]  ;;  %v2818_v8 = vsel %vm2734_vm1, %v2262_v10, 0.0  ;;  %v8495_v48 = vld [vmem:[#allocation144_spill] sm:$0xff]  ;;  %v3332_v60 = vsel %vm2734_vm1, %v2582_v17, 0.0 }
 0x1e1   : > { %v2815_v51 = vadd.f32 %v2814_v27, %v2813_v20  ;;  %2732 = vadd.xlane.f32.xlu0 %v2731_v0  ;;  %v2264_v59 = vmul.f32 %v3789_v30, %v8494_v11  ;;  %v2584_v39 = vmul.f32 %v8495_v48, %v7026_v61  ;;  %v3790_v27 = vld [vmem:[%s4155_s26 + $0x568] sm:$0x3]  ;;  %v8496_v20 = vld [vmem:[#allocation208_spill] sm:$0xff]  ;;  %v2820_v0 = vsel %vm2734_vm1, %v2263_v63, 0.0 }
 0x1e2   : > { %v3329_v24 = vadd.f32 %v3328_v15, %v3327_v14  ;;  %v2265_v15 = vmul.f32 %v3790_v27, %v8496_v20  ;;  %v8497_v14 = vld [vmem:[#allocation145_spill] sm:$0xff]  ;;  %v3334_v10 = vsel %vm2734_vm1, %v2583_v26, 0.0  ;;  %v7053_v11 = vld [vmem:[%s4155_s26 + $0x778] sm:$0x3]  ;;  %v8499_v48 = vld [vmem:[#allocation146_spill] sm:$0xff] }
 0x1e3   : > { %v2817_v38 = vadd.f32 %v2816_v37, %v2815_v51  ;;  %v2585_v21 = vmul.f32 %v8497_v14, %v7035_v7  ;;  %v3791_v37 = vld [vmem:[%s4155_s26 + $0x570] sm:$0x3]  ;;  %v8498_v51 = vld [vmem:[#allocation32_spill] sm:$0xff]  ;;  %v2586_v27 = vmul.f32 %v8499_v48, %v7044_v16  ;;  %v3336_v63 = vsel %vm2734_vm1, %v2584_v39, 0.0  ;;  %v7062_v14 = vld [vmem:[%s4155_s26 + $0x780] sm:$0x3] }
 0x1e4   : > { %v3331_v35 = vadd.f32 %v3330_v57, %v3329_v24  ;;  %v2266_v57 = vmul.f32 %v3791_v37, %v8498_v51  ;;  %v2822_v24 = vsel %vm2734_vm1, %v2264_v59, 0.0  ;;  %v8501_v37 = vld [vmem:[#allocation147_spill] sm:$0xff]  ;;  %v7071_v48 = vld [vmem:[%s4155_s26 + $0x788] sm:$0x3] }
 0x1e5   : > { %v2819_v30 = vadd.f32 %v2818_v8, %v2817_v38  ;;  %v3792_v8 = vld [vmem:[%s4155_s26 + $0x578] sm:$0x3]  ;;  %v2587_v51 = vmul.f32 %v8501_v37, %v7053_v11  ;;  %v3338_v59 = vsel %vm2734_vm1, %v2585_v21, 0.0  ;;  %v7080_v37 = vld [vmem:[%s4155_s26 + $0x790] sm:$0x3] }
 0x1e6   : > { %v3333_v17 = vadd.f32 %v3332_v60, %v3331_v35  ;;  %v8500_v38 = vld [vmem:[#allocation176_spill] sm:$0xff]  ;;  %v2824_v35 = vsel %vm2734_vm1, %v2265_v15, 0.0  ;;  %v3340_v15 = vsel %vm2734_vm1, %v2586_v27, 0.0  ;;  %v3795_v27 = vld [vmem:[%s4155_s26 + $0x590] sm:$0x3] }
 0x1e7   : > { %v2821_v20 = vadd.f32 %v2820_v0, %v2819_v30  ;;  %v2267_v60 = vmul.f32 %v3792_v8, %v8500_v38  ;;  %v3793_v0 = vld [vmem:[%s4155_s26 + $0x580] sm:$0x3]  ;;  %v8503_v8 = vld [vmem:[#allocation148_spill] sm:$0xff] }
 0x1e8   : > { %v3335_v26 = vadd.f32 %v3334_v10, %v3333_v17  ;;  %v8502_v30 = vld [vmem:[#allocation33_spill] sm:$0xff]  ;;  %v2826_v17 = vsel %vm2734_vm1, %v2266_v57, 0.0  ;;  %v2588_v38 = vmul.f32 %v8503_v8, %v7062_v14  ;;  %v3342_v57 = vsel %vm2734_vm1, %v2587_v51, 0.0  ;;  %v7089_v8 = vld [vmem:[%s4155_s26 + $0x798] sm:$0x3] }
 0x1e9   : > { %v2823_v55 = vadd.f32 %v2822_v24, %v2821_v20  ;;  %v2268_v10 = vmul.f32 %v3793_v0, %v8502_v30  ;;  %v3794_v24 = vld [vmem:[%s4155_s26 + $0x588] sm:$0x3]  ;;  %v8504_v20 = vld [vmem:[#allocation177_spill] sm:$0xff]  ;;  %v3796_v51 = vld [vmem:[%s4155_s26 + $0x598] sm:$0x3] }
 0x1ea   : > { %v3337_v39 = vadd.f32 %v3336_v63, %v3335_v26  ;;  %v2269_v63 = vmul.f32 %v3794_v24, %v8504_v20  ;;  %v2828_v26 = vsel %vm2734_vm1, %v2267_v60, 0.0  ;;  %v8505_v0 = vld [vmem:[#allocation149_spill] sm:$0xff]  ;;  %v8507_v24 = vld [vmem:[#allocation151_spill] sm:$0xff]  ;;  %v3344_v60 = vsel %vm2734_vm1, %v2588_v38, 0.0 }
 0x1eb   : > { %v2825_v1 = vadd.f32 %v2824_v35, %v2823_v55  ;;  %v2589_v30 = vmul.f32 %v8505_v0, %v7071_v48  ;;  %v8506_v35 = vld [vmem:[#allocation34_spill] sm:$0xff]  ;;  %v2590_v20 = vmul.f32 %v8507_v24, %v7080_v37  ;;  %v7098_v0 = vld [vmem:[%s4155_s26 + $0x7a0] sm:$0x3] }
 0x1ec   : > { %v3339_v21 = vadd.f32 %v3338_v59, %v3337_v39  ;;  %v2270_v59 = vmul.f32 %v3795_v27, %v8506_v35  ;;  %v2830_v39 = vsel %vm2734_vm1, %v2268_v10, 0.0  ;;  %8508 = vst [vmem:[#allocation94_spill] sm:$0xff] %v7098_v0  ;;  %v8510_v27 = vld [vmem:[#allocation152_spill] sm:$0xff]  ;;  %v7107_v24 = vld [vmem:[%s4155_s26 + $0x7a8] sm:$0x3] }
 0x1ed   : > { %v2827_v42 = vadd.f32 %v2826_v17, %v2825_v1  ;;  %v8509_v17 = vld [vmem:[#allocation178_spill] sm:$0xff]  ;;  %v2591_v35 = vmul.f32 %v8510_v27, %v7089_v8  ;;  %v3346_v10 = vsel %vm2734_vm1, %v2589_v30, 0.0  ;;  %8511 = vst [vmem:[#allocation72_spill] sm:$0xff] %v7107_v24  ;;  %v3797_v38 = vld [vmem:[%s4155_s26 + $0x5a0] sm:$0x3] }
 0x1ee   : > { %v3341_v55 = vadd.f32 %v3340_v15, %v3339_v21  ;;  %v2271_v15 = vmul.f32 %v3796_v51, %v8509_v17  ;;  %v2832_v21 = vsel %vm2734_vm1, %v2269_v63, 0.0  ;;  %v8513_v51 = vld [vmem:[#allocation153_spill] sm:$0xff]  ;;  %v3348_v63 = vsel %vm2734_vm1, %v2590_v20, 0.0  ;;  %v7116_v27 = vld [vmem:[%s4155_s26 + $0x7b0] sm:$0x3] }
 0x1ef   : > { %v2829_v32 = vadd.f32 %v2828_v26, %v2827_v42  ;;  %v8512_v26 = vld [vmem:[#allocation31_spill] sm:$0xff]  ;;  %v2592_v17 = vmul.f32 %v8513_v51, %v7098_v0  ;;  %8514 = vst [vmem:[#allocation229_spill] sm:$0xff] %v7116_v27  ;;  %v3798_v30 = vld [vmem:[%s4155_s26 + $0x5a8] sm:$0x3]  ;;  %v7125_v51 = vld [vmem:[%s4155_s26 + $0x7b8] sm:$0x3] }
 0x1f0   : > { %v3343_v1 = vadd.f32 %v3342_v57, %v3341_v55  ;;  %v2272_v57 = vmul.f32 %v3797_v38, %v8512_v26  ;;  %v2834_v55 = vsel %vm2734_vm1, %v2270_v59, 0.0  ;;  %v8516_v38 = vld [vmem:[#allocation154_spill] sm:$0xff]  ;;  %v3350_v59 = vsel %vm2734_vm1, %v2591_v35, 0.0  ;;  %8517 = vst [vmem:[#allocation74_spill] sm:$0xff] %v7125_v51  ;;  %v3799_v20 = vld [vmem:[%s4155_s26 + $0x5b0] sm:$0x3] }
 0x1f1   : > { %v2831_v52 = vadd.f32 %v2830_v39, %v2829_v32  ;;  %v8515_v39 = vld [vmem:[#allocation180_spill] sm:$0xff]  ;;  %v2593_v26 = vmul.f32 %v8516_v38, %v7107_v24  ;;  %v7134_v38 = vld [vmem:[%s4155_s26 + $0x7c0] sm:$0x3] }
 0x1f2   : > { %v3345_v42 = vadd.f32 %v3344_v60, %v3343_v1  ;;  %v2273_v60 = vmul.f32 %v3798_v30, %v8515_v39  ;;  %v2836_v1 = vsel %vm2734_vm1, %v2271_v15, 0.0  ;;  %v8519_v30 = vld [vmem:[#allocation155_spill] sm:$0xff]  ;;  %v3352_v15 = vsel %vm2734_vm1, %v2592_v17, 0.0  ;;  %8520 = vst [vmem:[#allocation230_spill] sm:$0xff] %v7134_v38  ;;  %v3800_v35 = vld [vmem:[%s4155_s26 + $0x5b8] sm:$0x3] }
 0x1f3   : > { %v2833_v18 = vadd.f32 %v2832_v21, %v2831_v52  ;;  %v8518_v21 = vld [vmem:[#allocation210_spill] sm:$0xff]  ;;  %v2594_v39 = vmul.f32 %v8519_v30, %v7116_v27  ;;  %v3801_v17 = vld [vmem:[%s4155_s26 + $0x5c0] sm:$0x3]  ;;  %v7197_v0 = vld [vmem:[%s4155_s26 + $0x7f8] sm:$0x3] }
 0x1f4   : > { %v3347_v32 = vadd.f32 %v3346_v10, %v3345_v42  ;;  %v2274_v10 = vmul.f32 %v3799_v20, %v8518_v21  ;;  %v2838_v42 = vsel %vm2734_vm1, %v2272_v57, 0.0  ;;  %v8522_v20 = vld [vmem:[#allocation156_spill] sm:$0xff]  ;;  %v3354_v57 = vsel %vm2734_vm1, %v2593_v26, 0.0  ;;  %v7143_v30 = vld [vmem:[%s4155_s26 + $0x7c8] sm:$0x3] }
 0x1f5   : > { %v2835_v44 = vadd.f32 %v2834_v55, %v2833_v18  ;;  %v8521_v55 = vld [vmem:[#allocation35_spill] sm:$0xff]  ;;  %v2595_v21 = vmul.f32 %v8522_v20, %v7125_v51  ;;  %8523 = vst [vmem:[#allocation75_spill] sm:$0xff] %v7143_v30  ;;  %v3802_v26 = vld [vmem:[%s4155_s26 + $0x5c8] sm:$0x3] }
 0x1f6   : > { %v3349_v52 = vadd.f32 %v3348_v63, %v3347_v32  ;;  %v2275_v63 = vmul.f32 %v3800_v35, %v8521_v55  ;;  %v2840_v32 = vsel %vm2734_vm1, %v2273_v60, 0.0  ;;  %v8525_v35 = vld [vmem:[#allocation159_spill] sm:$0xff]  ;;  %v3356_v60 = vsel %vm2734_vm1, %v2594_v39, 0.0 }
 0x1f7   : > { %v2837_v34 = vadd.f32 %v2836_v1, %v2835_v44  ;;  %v8524_v1 = vld [vmem:[#allocation181_spill] sm:$0xff]  ;;  %v2596_v55 = vmul.f32 %v8525_v35, %v7134_v38  ;;  %v7152_v20 = vld [vmem:[%s4155_s26 + $0x7d0] sm:$0x3]  ;;  %v7161_v35 = vld [vmem:[%s4155_s26 + $0x7d8] sm:$0x3] }
 0x1f8   : > { %v3351_v18 = vadd.f32 %v3350_v59, %v3349_v52  ;;  %v2276_v59 = vmul.f32 %v3801_v17, %v8524_v1  ;;  %v2842_v52 = vsel %vm2734_vm1, %v2274_v10, 0.0  ;;  %8526 = vst [vmem:[#allocation231_spill] sm:$0xff] %v7152_v20  ;;  %v8528_v17 = vld [vmem:[#allocation160_spill] sm:$0xff]  ;;  %v3358_v10 = vsel %vm2734_vm1, %v2595_v21, 0.0  ;;  %8529 = vst [vmem:[#allocation76_spill] sm:$0xff] %v7161_v35 }
 0x1f9   : > { %v2839_v24 = vadd.f32 %v2838_v42, %v2837_v34  ;;  %v8527_v42 = vld [vmem:[#allocation36_spill] sm:$0xff]  ;;  %v2597_v1 = vmul.f32 %v8528_v17, %v7143_v30  ;;  %v3803_v39 = vld [vmem:[%s4155_s26 + $0x5d0] sm:$0x3]  ;;  %v7170_v17 = vld [vmem:[%s4155_s26 + $0x7e0] sm:$0x3] }
 0x1fa   : > { %v3353_v44 = vadd.f32 %v3352_v15, %v3351_v18  ;;  %v2277_v15 = vmul.f32 %v3802_v26, %v8527_v42  ;;  %v2844_v18 = vsel %vm2734_vm1, %v2275_v63, 0.0  ;;  %v8531_v26 = vld [vmem:[#allocation164_spill] sm:$0xff]  ;;  %v3360_v63 = vsel %vm2734_vm1, %v2596_v55, 0.0  ;;  %8532 = vst [vmem:[#allocation101_spill] sm:$0xff] %v7170_v17  ;;  %v3805_v55 = vld [vmem:[%s4155_s26 + $0x5e0] sm:$0x3] }
 0x1fb   : > { %v2841_v27 = vadd.f32 %v2840_v32, %v2839_v24  ;;  %v8530_v32 = vld [vmem:[#allocation182_spill] sm:$0xff]  ;;  %v2598_v42 = vmul.f32 %v8531_v26, %v7152_v20  ;;  %v3804_v21 = vld [vmem:[%s4155_s26 + $0x5d8] sm:$0x3] }
 0x1fc   : > { %v3355_v34 = vadd.f32 %v3354_v57, %v3353_v44  ;;  %v2278_v57 = vmul.f32 %v3803_v39, %v8530_v32  ;;  %v2846_v44 = vsel %vm2734_vm1, %v2276_v59, 0.0  ;;  %v8534_v39 = vld [vmem:[#allocation165_spill] sm:$0xff]  ;;  %v3362_v59 = vsel %vm2734_vm1, %v2597_v1, 0.0  ;;  %v7179_v26 = vld [vmem:[%s4155_s26 + $0x7e8] sm:$0x3] }
 0x1fd   : > { %v2843_v51 = vadd.f32 %v2842_v52, %v2841_v27  ;;  %v8533_v52 = vld [vmem:[#allocation38_spill] sm:$0xff]  ;;  %v2599_v32 = vmul.f32 %v8534_v39, %v7161_v35  ;;  %8535 = vst [vmem:[#allocation77_spill] sm:$0xff] %v7179_v26  ;;  %v7188_v39 = vld [vmem:[%s4155_s26 + $0x7f0] sm:$0x3] }
 0x1fe   : > { %v3357_v24 = vadd.f32 %v3356_v60, %v3355_v34  ;;  %v2279_v60 = vmul.f32 %v3804_v21, %v8533_v52  ;;  %v2848_v34 = vsel %vm2734_vm1, %v2277_v15, 0.0  ;;  %v8537_v21 = vld [vmem:[#allocation169_spill] sm:$0xff]  ;;  %v3364_v15 = vsel %vm2734_vm1, %v2598_v42, 0.0  ;;  %8538 = vst [vmem:[#allocation233_spill] sm:$0xff] %v7188_v39 }
 0x1ff   : > { %v2845_v38 = vadd.f32 %v2844_v18, %v2843_v51  ;;  %v8536_v18 = vld [vmem:[#allocation37_spill] sm:$0xff]  ;;  %v2600_v52 = vmul.f32 %v8537_v21, %v7170_v17 }
 0x200   : > { %v3359_v27 = vadd.f32 %v3358_v10, %v3357_v24  ;;  %v2280_v10 = vmul.f32 %v3805_v55, %v8536_v18  ;;  %v2850_v24 = vsel %vm2734_vm1, %v2278_v57, 0.0  ;;  %v3366_v57 = vsel %vm2734_vm1, %v2599_v32, 0.0  ;;  %v8543_v32 = vld [vmem:[#allocation39_spill] sm:$0xff]  ;;  %v3809_v17 = vld [vmem:[%s4155_s26 + $0x600] sm:$0x3] }
 0x201   : > { %v2847_v30 = vadd.f32 %v2846_v44, %v2845_v38  ;;  %v3806_v38 = vld [vmem:[%s4155_s26 + $0x5e8] sm:$0x3]  ;;  %v8539_v44 = vld [vmem:[#allocation183_spill] sm:$0xff] }
 0x202   : > { %v3361_v51 = vadd.f32 %v3360_v63, %v3359_v27  ;;  %v2281_v35 = vmul.f32 %v3806_v38, %v8539_v44  ;;  %v2852_v63 = vsel %vm2734_vm1, %v2279_v60, 0.0  ;;  %v8540_v27 = vld [vmem:[#allocation170_spill] sm:$0xff]  ;;  %v3368_v60 = vsel %vm2734_vm1, %v2600_v52, 0.0 }
 0x203   : > { %v2849_v20 = vadd.f32 %v2848_v34, %v2847_v30  ;;  %v2601_v55 = vmul.f32 %v8540_v27, %v7179_v26  ;;  %v3807_v30 = vld [vmem:[%s4155_s26 + $0x5f0] sm:$0x3]  ;;  %v8541_v34 = vld [vmem:[#allocation212_spill] sm:$0xff] }
 0x204   : > { %v3363_v1 = vadd.f32 %v3362_v59, %v3361_v51  ;;  %v2282_v21 = vmul.f32 %v3807_v30, %v8541_v34  ;;  %v2854_v59 = vsel %vm2734_vm1, %v2280_v10, 0.0  ;;  %v8542_v51 = vld [vmem:[#allocation171_spill] sm:$0xff]  ;;  %v3808_v26 = vld [vmem:[%s4155_s26 + $0x5f8] sm:$0x3] }
 0x205   : > { %v2851_v18 = vadd.f32 %v2850_v24, %v2849_v20  ;;  %v2602_v38 = vmul.f32 %v8542_v51, %v7188_v39  ;;  %v2283_v20 = vmul.f32 %v3808_v26, %v8543_v32  ;;  %v2856_v24 = vsel %vm2734_vm1, %v2281_v35, 0.0  ;;  %v8545_v51 = vld [vmem:[#allocation185_spill] sm:$0xff]  ;;  %v8546_v35 = vld [vmem:[#allocation40_spill] sm:$0xff] }
 0x206   : > { %v3365_v42 = vadd.f32 %v3364_v15, %v3363_v1  ;;  %v8544_v15 = vld [vmem:[#allocation175_spill] sm:$0xff]  ;;  %v3370_v30 = vsel %vm2734_vm1, %v2601_v55, 0.0  ;;  %v2284_v39 = vmul.f32 %v3809_v17, %v8545_v51  ;;  %v2858_v52 = vsel %vm2734_vm1, %v2282_v21, 0.0  ;;  %v8547_v17 = vld [vmem:[#allocation186_spill] sm:$0xff] }
 0x207   : > { %v2853_v44 = vadd.f32 %v2852_v63, %v2851_v18  ;;  %v2603_v1 = vmul.f32 %v8544_v15, %v7197_v0  ;;  %v3372_v63 = vsel %vm2734_vm1, %v2602_v38, 0.0  ;;  %v3810_v18 = vld [vmem:[%s4155_s26 + $0x608] sm:$0x3]  ;;  %v2860_v32 = vsel %vm2734_vm1, %v2283_v20, 0.0  ;;  %v3812_v15 = vld [vmem:[%s4155_s26 + $0x618] sm:$0x3] }
 0x208   : > { %v3367_v27 = vadd.f32 %v3366_v57, %v3365_v42  ;;  %v2285_v42 = vmul.f32 %v3810_v18, %v8546_v35  ;;  %v2862_v21 = vsel %vm2734_vm1, %v2284_v39, 0.0  ;;  %v8549_v51 = vld [vmem:[#allocation187_spill] sm:$0xff]  ;;  %v8550_v39 = vld [vmem:[#allocation42_spill] sm:$0xff] }
 0x209   : > { %v2855_v10 = vadd.f32 %v2854_v59, %v2853_v44  ;;  %v3374_v55 = vsel %vm2734_vm1, %v2603_v1, 0.0  ;;  %v3811_v44 = vld [vmem:[%s4155_s26 + $0x610] sm:$0x3]  ;;  %v3813_v1 = vld [vmem:[%s4155_s26 + $0x620] sm:$0x3] }
 0x20a   : > { %v3369_v34 = vadd.f32 %v3368_v60, %v3367_v27  ;;  %v2286_v27 = vmul.f32 %v3811_v44, %v8547_v17  ;;  %v3816_v17 = vld [vmem:[%s4155_s26 + $0x638] sm:$0x3] }
 0x20b   : > { %v2857_v57 = vadd.f32 %v2856_v24, %v2855_v10 }
 0x20c   : > { %v3371_v26 = vadd.f32 %v3370_v30, %v3369_v34  ;;  %v8548_v30 = vld [vmem:[#allocation41_spill] sm:$0xff]  ;;  %v2864_v34 = vsel %vm2734_vm1, %v2285_v42, 0.0 }
 0x20d   : > { %v2859_v59 = vadd.f32 %v2858_v52, %v2857_v57  ;;  %v2287_v10 = vmul.f32 %v3812_v15, %v8548_v30  ;;  %v2288_v52 = vmul.f32 %v3813_v1, %v8549_v51  ;;  %v3817_v15 = vld [vmem:[%s4155_s26 + $0x640] sm:$0x3]  ;;  %v8553_v30 = vld [vmem:[#allocation43_spill] sm:$0xff]  ;;  %v3818_v1 = vld [vmem:[%s4155_s26 + $0x648] sm:$0x3] }
 0x20e   : > { %v3373_v60 = vadd.f32 %v3372_v63, %v3371_v26  ;;  %v2866_v63 = vsel %vm2734_vm1, %v2286_v27, 0.0  ;;  %v3814_v26 = vld [vmem:[%s4155_s26 + $0x628] sm:$0x3] }
 0x20f   : > { %v2861_v38 = vadd.f32 %v2860_v32, %v2859_v59  ;;  %v2289_v18 = vmul.f32 %v3814_v26, %v8550_v39  ;;  %v2868_v35 = vsel %vm2734_vm1, %v2287_v10, 0.0  ;;  %v8551_v59 = vld [vmem:[#allocation188_spill] sm:$0xff]  ;;  %v8554_v51 = vld [vmem:[#allocation190_spill] sm:$0xff]  ;;  %v3819_v26 = vld [vmem:[%s4155_s26 + $0x650] sm:$0x3] }
 0x210   : > { %v3375_v24 = vadd.f32 %v3374_v55, %v3373_v60  ;;  %v3815_v55 = vld [vmem:[%s4155_s26 + $0x630] sm:$0x3]  ;;  %v2870_v60 = vsel %vm2734_vm1, %v2288_v52, 0.0  ;;  %v8555_v39 = vld [vmem:[#allocation44_spill] sm:$0xff] }
 0x211   : > { %v2863_v20 = vadd.f32 %v2862_v21, %v2861_v38  ;;  %v2290_v42 = vmul.f32 %v3815_v55, %v8551_v59  ;;  %v8552_v21 = vld [vmem:[#allocation45_spill] sm:$0xff]  ;;  %v2872_v27 = vsel %vm2734_vm1, %v2289_v18, 0.0  ;;  %v3820_v55 = vld [vmem:[%s4155_s26 + $0x658] sm:$0x3]  ;;  %v8556_v59 = vld [vmem:[#allocation191_spill] sm:$0xff] }
 0x212   : > { %3376 = vadd.xlane.f32.xlu1 %v3375_v24  ;;  %v2291_v38 = vmul.f32 %v3816_v17, %v8552_v21  ;;  %v3821_v17 = vld [vmem:[%s4155_s26 + $0x660] sm:$0x3]  ;;  %v8557_v21 = vld [vmem:[#allocation52_spill] sm:$0xff] }
 0x213   : > { %v2865_v57 = vadd.f32 %v2864_v34, %v2863_v20  ;;  %v2292_v34 = vmul.f32 %v3817_v15, %v8553_v30  ;;  %v2874_v10 = vsel %vm2734_vm1, %v2290_v42, 0.0  ;;  %v3822_v15 = vld [vmem:[%s4155_s26 + $0x668] sm:$0x3] }
 0x214   : > { %v2876_v52 = vsel %vm2734_vm1, %v2291_v38, 0.0  ;;  %v8558_v30 = vld [vmem:[#allocation46_spill] sm:$0xff] }
 0x215   : > { %v2867_v32 = vadd.f32 %v2866_v63, %v2865_v57  ;;  %v2293_v63 = vmul.f32 %v3818_v1, %v8554_v51  ;;  %v2878_v18 = vsel %vm2734_vm1, %v2292_v34, 0.0  ;;  %v3823_v1 = vld [vmem:[%s4155_s26 + $0x670] sm:$0x3]  ;;  %v8559_v51 = vld [vmem:[#allocation192_spill] sm:$0xff] }
 0x217   : > { %v2869_v44 = vadd.f32 %v2868_v35, %v2867_v32  ;;  %v2294_v35 = vmul.f32 %v3819_v26, %v8555_v39  ;;  %v2880_v42 = vsel %vm2734_vm1, %v2293_v63, 0.0  ;;  %v3824_v26 = vld [vmem:[%s4155_s26 + $0x678] sm:$0x3]  ;;  %v8560_v39 = vld [vmem:[#allocation215_spill] sm:$0xff] }
 0x219   : > { %v2871_v24 = vadd.f32 %v2870_v60, %v2869_v44  ;;  %v2295_v60 = vmul.f32 %v3820_v55, %v8556_v59  ;;  %v2882_v38 = vsel %vm2734_vm1, %v2294_v35, 0.0  ;;  %v3825_v55 = vld [vmem:[%s4155_s26 + $0x680] sm:$0x3]  ;;  %v8561_v59 = vld [vmem:[#allocation47_spill] sm:$0xff] }
 0x21b   : > { %v2873_v20 = vadd.f32 %v2872_v27, %v2871_v24  ;;  %v2296_v27 = vmul.f32 %v3821_v17, %v8557_v21  ;;  %v2884_v34 = vsel %vm2734_vm1, %v2295_v60, 0.0  ;;  %v3826_v17 = vld [vmem:[%s4155_s26 + $0x688] sm:$0x3]  ;;  %v8562_v21 = vld [vmem:[#allocation193_spill] sm:$0xff] }
 0x21d   : > { %v2875_v57 = vadd.f32 %v2874_v10, %v2873_v20  ;;  %v2297_v10 = vmul.f32 %v3822_v15, %v8558_v30  ;;  %v2886_v63 = vsel %vm2734_vm1, %v2296_v27, 0.0  ;;  %v3827_v15 = vld [vmem:[%s4155_s26 + $0x690] sm:$0x3]  ;;  %v8563_v30 = vld [vmem:[#allocation216_spill] sm:$0xff] }
 0x21f   : > { %v2877_v32 = vadd.f32 %v2876_v52, %v2875_v57  ;;  %v2298_v52 = vmul.f32 %v3823_v1, %v8559_v51  ;;  %v2888_v35 = vsel %vm2734_vm1, %v2297_v10, 0.0  ;;  %v3828_v1 = vld [vmem:[%s4155_s26 + $0x698] sm:$0x3] }
 0x220   : > { %v8564_v51 = vld [vmem:[#allocation48_spill] sm:$0xff] }
 0x221   : > { %v2879_v44 = vadd.f32 %v2878_v18, %v2877_v32  ;;  %v2299_v18 = vmul.f32 %v3824_v26, %v8560_v39  ;;  %v2890_v60 = vsel %vm2734_vm1, %v2298_v52, 0.0  ;;  %v3829_v26 = vld [vmem:[%s4155_s26 + $0x6a0] sm:$0x3] }
 0x222   : > { %v8565_v39 = vld [vmem:[#allocation17_spill] sm:$0xff] }
 0x223   : > { %v2881_v24 = vadd.f32 %v2880_v42, %v2879_v44  ;;  %v2300_v42 = vmul.f32 %v3825_v55, %v8561_v59  ;;  %v2892_v27 = vsel %vm2734_vm1, %v2299_v18, 0.0  ;;  %v3830_v55 = vld [vmem:[%s4155_s26 + $0x6a8] sm:$0x3]  ;;  %v8566_v59 = vld [vmem:[#allocation49_spill] sm:$0xff] }
 0x225   : > { %v2883_v20 = vadd.f32 %v2882_v38, %v2881_v24  ;;  %v2301_v38 = vmul.f32 %v3826_v17, %v8562_v21  ;;  %v2894_v10 = vsel %vm2734_vm1, %v2300_v42, 0.0  ;;  %v3831_v17 = vld [vmem:[%s4155_s26 + $0x6b0] sm:$0x3] }
 0x226   : > { %v8567_v21 = vld [vmem:[#allocation195_spill] sm:$0xff] }
 0x227   : > { %v2885_v57 = vadd.f32 %v2884_v34, %v2883_v20  ;;  %v2302_v34 = vmul.f32 %v3827_v15, %v8563_v30  ;;  %v2896_v52 = vsel %vm2734_vm1, %v2301_v38, 0.0  ;;  %v3832_v15 = vld [vmem:[%s4155_s26 + $0x6b8] sm:$0x3]  ;;  %v8568_v30 = vld [vmem:[#allocation50_spill] sm:$0xff] }
 0x229   : > { %v2887_v32 = vadd.f32 %v2886_v63, %v2885_v57  ;;  %v2303_v63 = vmul.f32 %v3828_v1, %v8564_v51  ;;  %v2898_v18 = vsel %vm2734_vm1, %v2302_v34, 0.0  ;;  %v3833_v34 = vld [vmem:[%s4155_s26 + $0x6c0] sm:$0x3]  ;;  %v8569_v51 = vld [vmem:[#allocation196_spill] sm:$0xff] }
 0x22b   : > { %v2889_v44 = vadd.f32 %v2888_v35, %v2887_v32  ;;  %v2304_v35 = vmul.f32 %v3829_v26, %v8565_v39  ;;  %v2900_v42 = vsel %vm2734_vm1, %v2303_v63, 0.0  ;;  %v8570_v63 = vld [vmem:[#allocation51_spill] sm:$0xff] }
 0x22c   : > { %v2309_v39 = vmul.f32 %v8570_v63, %v6652_v5 }
 0x22d   : > { %v2891_v24 = vadd.f32 %v2890_v60, %v2889_v44  ;;  %v2305_v60 = vmul.f32 %v3830_v55, %v8566_v59 }
 0x22f   : > { %v2893_v20 = vadd.f32 %v2892_v27, %v2891_v24  ;;  %v2306_v27 = vmul.f32 %v3831_v17, %v8567_v21  ;;  %v2902_v24 = vsel %vm2734_vm1, %v2304_v35, 0.0  ;;  %v8571_v35 = vld [vmem:[#allocation197_spill] sm:$0xff]  ;;  %v2912_v17 = vsel %vm2734_vm1, %v2309_v39, 0.0 }
 0x230   : > { %v2310_v55 = vmul.f32 %v8571_v35, %v6699_v58 }
 0x231   : > { %v2895_v57 = vadd.f32 %v2894_v10, %v2893_v20  ;;  %v2307_v10 = vmul.f32 %v3832_v15, %v8568_v30  ;;  %v2904_v20 = vsel %vm2734_vm1, %v2305_v60, 0.0  ;;  %v8572_v60 = vld [vmem:[#allocation53_spill] sm:$0xff]  ;;  %v8574_v15 = vld [vmem:[#allocation54_spill] sm:$0xff] }
 0x232   : > { %v2914_v5 = vsel %vm2734_vm1, %v2310_v55, 0.0  ;;  %v2313_v30 = vmul.f32 %v8574_v15, %v6755_v28  ;;  %v8579_v55 = vld [vmem:[#allocation218_spill] sm:$0xff] }
 0x233   : > { %v2897_v32 = vadd.f32 %v2896_v52, %v2895_v57  ;;  %v2308_v52 = vmul.f32 %v3833_v34, %v8569_v51  ;;  %v2906_v57 = vsel %vm2734_vm1, %v2306_v27, 0.0  ;;  %v8573_v27 = vld [vmem:[#allocation21_spill] sm:$0xff]  ;;  %v8576_v51 = vld [vmem:[#allocation66_spill] sm:$0xff] }
 0x235   : > { %v2899_v44 = vadd.f32 %v2898_v18, %v2897_v32  ;;  %v2908_v18 = vsel %vm2734_vm1, %v2307_v10, 0.0  ;;  %v2910_v59 = vsel %vm2734_vm1, %v2308_v52, 0.0  ;;  %v2315_v52 = vmul.f32 %v8576_v51, %v6807_v49 }
 0x237   : > { %v2901_v38 = vadd.f32 %v2900_v42, %v2899_v44  ;;  %v2311_v44 = vmul.f32 %v8572_v60, %v6711_v43  ;;  %v8580_v60 = vld [vmem:[#allocation56_spill] sm:$0xff] }
 0x239   : > { %v2903_v1 = vadd.f32 %v2902_v24, %v2901_v38  ;;  %v2312_v24 = vmul.f32 %v8573_v27, %v6740_v62  ;;  %v2916_v58 = vsel %vm2734_vm1, %v2311_v44, 0.0  ;;  %v2920_v62 = vsel %vm2734_vm1, %v2313_v30, 0.0 }
 0x23a   : > { %v2319_v44 = vmul.f32 %v8580_v60, %v6905_v25  ;;  %v8586_v60 = vld [vmem:[#allocation94_spill] sm:$0xff] }
 0x23b   : > { %v2905_v26 = vadd.f32 %v2904_v20, %v2903_v1  ;;  %v8575_v20 = vld [vmem:[#allocation202_spill] sm:$0xff]  ;;  %v2918_v43 = vsel %vm2734_vm1, %v2312_v24, 0.0  ;;  %v2321_v24 = vmul.f32 %v6276_v23, %v6951_v22 }
 0x23c   : > { %v2314_v1 = vmul.f32 %v8575_v20, %v6782_v13  ;;  %v2924_v13 = vsel %vm2734_vm1, %v2315_v52, 0.0  ;;  %v2324_v20 = vmul.f32 %v8422_v46, %v6986_v33 }
 0x23d   : > { %v2907_v32 = vadd.f32 %v2906_v57, %v2905_v26  ;;  %v8577_v26 = vld [vmem:[#allocation55_spill] sm:$0xff] }
 0x23e   : > { %v2316_v63 = vmul.f32 %v8577_v26, %v6832_v29  ;;  %v2922_v28 = vsel %vm2734_vm1, %v2314_v1, 0.0  ;;  %v2325_v1 = vmul.f32 %v8433_v3, %v6997_v9  ;;  %v8585_v26 = vld [vmem:[#allocation63_spill] sm:$0xff] }
 0x23f   : > { %v2909_v42 = vadd.f32 %v2908_v18, %v2907_v32  ;;  %v8578_v18 = vld [vmem:[#allocation203_spill] sm:$0xff] }
 0x240   : > { %v2317_v32 = vmul.f32 %v8578_v18, %v6857_v56  ;;  %v2926_v49 = vsel %vm2734_vm1, %v2316_v63, 0.0  ;;  %v2944_v46 = vsel %vm2734_vm1, %v2325_v1, 0.0  ;;  %v2328_v63 = vmul.f32 %v8585_v26, %v7026_v61 }
 0x241   : > { %v2911_v21 = vadd.f32 %v2910_v59, %v2909_v42  ;;  %v2318_v59 = vmul.f32 %v8579_v55, %v6882_v40  ;;  %v2932_v40 = vsel %vm2734_vm1, %v2319_v44, 0.0  ;;  %v2330_v18 = vmul.f32 %v8452_v6, %v7044_v16  ;;  %v8587_v44 = vld [vmem:[#allocation222_spill] sm:$0xff] }
 0x242   : > { %v2928_v29 = vsel %vm2734_vm1, %v2317_v32, 0.0  ;;  %v2332_v55 = vmul.f32 %v6571_v19, %v7062_v14 }
 0x243   : > { %v2913_v38 = vadd.f32 %v2912_v17, %v2911_v21  ;;  %v2320_v21 = vmul.f32 %v6265_v36, %v6928_v47  ;;  %v2930_v56 = vsel %vm2734_vm1, %v2318_v59, 0.0  ;;  %v2936_v36 = vsel %vm2734_vm1, %v2321_v24, 0.0  ;;  %v8591_v24 = vld [vmem:[#allocation223_spill] sm:$0xff] }
 0x244   : > { %v2333_v59 = vmul.f32 %v6593_v45, %v7071_v48 }
 0x245   : > { %v2915_v10 = vadd.f32 %v2914_v5, %v2913_v38  ;;  %v8581_v38 = vld [vmem:[#allocation219_spill] sm:$0xff]  ;;  %v2934_v25 = vsel %vm2734_vm1, %v2320_v21, 0.0  ;;  %v8589_v21 = vld [vmem:[#allocation65_spill] sm:$0xff] }
 0x246   : > { %v2322_v15 = vmul.f32 %v8581_v38, %v6964_v12  ;;  %v2960_v19 = vsel %vm2734_vm1, %v2333_v59, 0.0  ;;  %v8593_v38 = vld [vmem:[#allocation67_spill] sm:$0xff] }
 0x247   : > { %v2917_v34 = vadd.f32 %v2916_v58, %v2915_v10  ;;  %v8582_v58 = vld [vmem:[#allocation57_spill] sm:$0xff] }
 0x248   : > { %v2323_v10 = vmul.f32 %v8582_v58, %v6975_v41  ;;  %v2938_v23 = vsel %vm2734_vm1, %v2322_v15, 0.0  ;;  %v2942_v41 = vsel %vm2734_vm1, %v2324_v20, 0.0  ;;  %v8594_v58 = vld [vmem:[#allocation230_spill] sm:$0xff] }
 0x249   : > { %v2919_v57 = vadd.f32 %v2918_v43, %v2917_v34  ;;  %v8583_v34 = vld [vmem:[#allocation61_spill] sm:$0xff] }
 0x24a   : > { %v2940_v12 = vsel %vm2734_vm1, %v2323_v10, 0.0  ;;  %v2326_v51 = vmul.f32 %v8583_v34, %v7008_v50  ;;  %v8595_v10 = vld [vmem:[#allocation87_spill] sm:$0xff] }
 0x24b   : > { %v2921_v39 = vadd.f32 %v2920_v62, %v2919_v57  ;;  %v8584_v62 = vld [vmem:[#allocation220_spill] sm:$0xff]  ;;  %v8598_v34 = vld [vmem:[#allocation231_spill] sm:$0xff] }
 0x24c   : > { %v2327_v57 = vmul.f32 %v8584_v62, %v7017_v31  ;;  %v2946_v3 = vsel %vm2734_vm1, %v2326_v51, 0.0  ;;  %v2950_v31 = vsel %vm2734_vm1, %v2328_v63, 0.0  ;;  %v8599_v51 = vld [vmem:[#allocation225_spill] sm:$0xff] }
 0x24d   : > { %v2923_v35 = vadd.f32 %v2922_v28, %v2921_v39  ;;  %v2329_v28 = vmul.f32 %v8450_v54, %v7035_v7  ;;  %v2954_v54 = vsel %vm2734_vm1, %v2330_v18, 0.0  ;;  %v8604_v18 = vld [vmem:[#allocation77_spill] sm:$0xff] }
 0x24e   : > { %v2948_v50 = vsel %vm2734_vm1, %v2327_v57, 0.0  ;;  %v8600_v57 = vld [vmem:[#allocation76_spill] sm:$0xff] }
 0x24f   : > { %v2925_v42 = vadd.f32 %v2924_v13, %v2923_v35  ;;  %v2331_v13 = vmul.f32 %v6550_v2, %v7053_v11  ;;  %v2952_v61 = vsel %vm2734_vm1, %v2329_v28, 0.0  ;;  %v2958_v2 = vsel %vm2734_vm1, %v2332_v55, 0.0  ;;  %v8607_v55 = vld [vmem:[#allocation227_spill] sm:$0xff] }
 0x251   : > { %v2927_v17 = vadd.f32 %v2926_v49, %v2925_v42  ;;  %v2956_v6 = vsel %vm2734_vm1, %v2331_v13, 0.0  ;;  %v2334_v49 = vmul.f32 %v6621_v4, %v7080_v37  ;;  %v2335_v42 = vmul.f32 %v6646_v53, %v7089_v8 }
 0x253   : > { %v2929_v27 = vadd.f32 %v2928_v29, %v2927_v17  ;;  %v2336_v29 = vmul.f32 %v8587_v44, %v8586_v60  ;;  %v2962_v45 = vsel %vm2734_vm1, %v2334_v49, 0.0  ;;  %v8588_v17 = vld [vmem:[#allocation72_spill] sm:$0xff]  ;;  %v2964_v4 = vsel %vm2734_vm1, %v2335_v42, 0.0 }
 0x254   : > { %v8609_v44 = vlaneseq }
 0x255   : > { %v2931_v5 = vadd.f32 %v2930_v56, %v2929_v27  ;;  %v2337_v56 = vmul.f32 %v8589_v21, %v8588_v17  ;;  %v8590_v27 = vld [vmem:[#allocation229_spill] sm:$0xff]  ;;  %v2966_v53 = vsel %vm2734_vm1, %v2336_v29, 0.0 }
 0x256   : > { %v3383_v29 = vand.u32 127, %v8609_v44  ;;  %v8610_v17 = vld [vmem:[#allocation9_spill] sm:$0xff] }
 0x257   : > { %v2933_v30 = vadd.f32 %v2932_v40, %v2931_v5  ;;  %v2338_v40 = vmul.f32 %v8591_v24, %v8590_v27  ;;  %v8592_v5 = vld [vmem:[#allocation74_spill] sm:$0xff] }
 0x258   : > { %v2339_v15 = vmul.f32 %v8593_v38, %v8592_v5  ;;  %v2604_v5 = vld [vmem:[#allocation2] sm:$0x3] }
 0x259   : > { %v2935_v47 = vadd.f32 %v2934_v25, %v2933_v30  ;;  %v2968_v25 = vsel %vm2734_vm1, %v2337_v56, 0.0 }
 0x25b   : > { %v2937_v22 = vadd.f32 %v2936_v36, %v2935_v47  ;;  %v2340_v36 = vmul.f32 %v8595_v10, %v8594_v58  ;;  %v2970_v47 = vsel %vm2734_vm1, %v2338_v40, 0.0 }
 0x25d   : > { %v2939_v43 = vadd.f32 %v2938_v23, %v2937_v22  ;;  %v8596_v23 = vld [vmem:[#allocation75_spill] sm:$0xff]  ;;  %v8597_v22 = vld [vmem:[#allocation68_spill] sm:$0xff] }
 0x25e   : > { %v2341_v1 = vmul.f32 %v8597_v22, %v8596_v23 }
 0x25f   : > { %v2941_v52 = vadd.f32 %v2940_v12, %v2939_v43  ;;  %v2972_v12 = vsel %vm2734_vm1, %v2339_v15, 0.0 }
 0x260   : > { %v2976_v26 = vsel %vm2734_vm1, %v2341_v1, 0.0 }
 0x261   : > { %v2943_v33 = vadd.f32 %v2942_v41, %v2941_v52  ;;  %v2342_v41 = vmul.f32 %v8599_v51, %v8598_v34  ;;  %v2974_v52 = vsel %vm2734_vm1, %v2340_v36, 0.0 }
 0x263   : > { %v2945_v9 = vadd.f32 %v2944_v46, %v2943_v33  ;;  %v8601_v46 = vld [vmem:[#allocation69_spill] sm:$0xff] }
 0x264   : > { %v2343_v33 = vmul.f32 %v8601_v46, %v8600_v57 }
 0x265   : > { %v2947_v39 = vadd.f32 %v2946_v3, %v2945_v9  ;;  %v8602_v3 = vld [vmem:[#allocation101_spill] sm:$0xff]  ;;  %v8603_v9 = vld [vmem:[#allocation226_spill] sm:$0xff] }
 0x266   : > { %v2344_v28 = vmul.f32 %v8603_v9, %v8602_v3  ;;  %v2980_v13 = vsel %vm2734_vm1, %v2343_v33, 0.0 }
 0x267   : > { %v2949_v32 = vadd.f32 %v2948_v50, %v2947_v39  ;;  %v2978_v50 = vsel %vm2734_vm1, %v2342_v41, 0.0 }
 0x269   : > { %v2951_v35 = vadd.f32 %v2950_v31, %v2949_v32  ;;  %v8605_v31 = vld [vmem:[#allocation70_spill] sm:$0xff] }
 0x26a   : > { %v2345_v32 = vmul.f32 %v8605_v31, %v8604_v18 }
 0x26b   : > { %v2953_v7 = vadd.f32 %v2952_v61, %v2951_v35  ;;  %v8606_v35 = vld [vmem:[#allocation233_spill] sm:$0xff] }
 0x26c   : > { %v2984_v49 = vsel %vm2734_vm1, %v2345_v32, 0.0 }
 0x26d   : > { %v2955_v16 = vadd.f32 %v2954_v54, %v2953_v7  ;;  %v2346_v54 = vmul.f32 %v8607_v55, %v8606_v35  ;;  %v2982_v7 = vsel %vm2734_vm1, %v2344_v28, 0.0 }
 0x26e   : > { %v2733_v56 = vpop.xlane.xlu0 %2732 }
 0x26f   : > { %v2957_v11 = vadd.f32 %v2956_v6, %v2955_v16  ;;  %v8608_v6 = vld [vmem:[#allocation71_spill] sm:$0xff] }
 0x270   : > { %v2347_v16 = vmul.f32 %v8608_v6, %v7197_v0  ;;  %v3386_v0 = vsub.s32 %v3383_v29, %v8610_v17 }
 0x271   : > { %v2959_v14 = vadd.f32 %v2958_v2, %v2957_v11  ;;  %v2986_v11 = vsel %vm2734_vm1, %v2346_v54, 0.0 }
 0x272   : > { %v3387_v40 = vrot.slane %v2733_v56, %v3386_v0 }
 0x273   : > { %v2961_v48 = vadd.f32 %v2960_v19, %v2959_v14  ;;  %v2988_v19 = vsel %vm2734_vm1, %v2347_v16, 0.0 }
 0x275   : > { %v2963_v37 = vadd.f32 %v2962_v45, %v2961_v48  ;;  %v3120_v45 = vpop.xlane.xlu1 %3119  ;;  %v3388_v48 = vadd.s32 4294967288, %v3383_v29 }
 0x276   : > { %v3398_v27 = vrot.slane %v3120_v45, %v3386_v0 }
 0x277   : > { %v2965_v8 = vadd.f32 %v2964_v4, %v2963_v37  ;;  %v3391_v21 = vsub.s32 %v3388_v48, %v8610_v17 }
 0x279   : > { %v2967_v30 = vadd.f32 %v2966_v53, %v2965_v8 }
 0x27b   : > { %v2969_v20 = vadd.f32 %v2968_v25, %v2967_v30 }
 0x27d   : > { %v2971_v43 = vadd.f32 %v2970_v47, %v2969_v20 }
 0x27f   : > { %v2973_v62 = vadd.f32 %v2972_v12, %v2971_v43 }
 0x281   : > { %v2975_v63 = vadd.f32 %v2974_v52, %v2973_v62 }
 0x283   : > { %v2977_v39 = vadd.f32 %v2976_v26, %v2975_v63 }
 0x285   : > { %v2979_v61 = vadd.f32 %v2978_v50, %v2977_v39 }
 0x287   : > { %v2981_v59 = vadd.f32 %v2980_v13, %v2979_v61 }
 0x289   : > { %v2983_v2 = vadd.f32 %v2982_v7, %v2981_v59 }
 0x28b   : > { %v2985_v42 = vadd.f32 %v2984_v49, %v2983_v2 }
 0x28d   : > { %v2987_v14 = vadd.f32 %v2986_v11, %v2985_v42 }
 0x28f   : > { %v2989_v60 = vadd.f32 %v2988_v19, %v2987_v14 }
 0x291   : > { %2990 = vadd.xlane.f32.xlu0 %v2989_v60 }
 0x29f   : > { %v3377_v4 = vpop.xlane.xlu1 %3376 }
 0x2a0   : > { %v3402_v37 = vrot.slane %v3377_v4, %v3391_v21 }
 0x2a2   : > { %v3403_v8 = vsel %vm3393_vm2, %v3402_v37, %v3398_v27 }
 0x31e   : > { %v2991_v24 = vpop.xlane.xlu0 %2990 }
 0x31f   : > { %v3392_v53 = vrot.slane %v2991_v24, %v3391_v21  ;;  %3413 = sbr.rel (%p3566_p5) target bundleno = 814 (0x32e), region = 44 }
 0x321   : > { %v3394_v38 = vsel %vm3393_vm2, %v3392_v53, %v3387_v40 }
 0x322   : > { %v3405_v15 = vsel %vm3404_vm3, %v3403_v8, %v3394_v38 }
 0x323   : > { %v3407_v25 = vadd.f32 %v3405_v15, %v2604_v5 }
 0x325   : > { %3409 = vst.msk [vmem:[#allocation2] sm:$0x3] %vm3408_vm4, %v3407_v25 }
 0x32c   : > { %v3414_v30 = vld [vmem:[#allocation2] sm:$0x3] }
 0x32d   : > { %3415 = vst.msk [vmem:[%s4166_s22] sm:$0x3] %vm3408_vm4, %v3414_v30 }
 0x32e PF: > { %s18_s16 = sadd.s32 1, %s3964_s16   ;;  %s8611_s9 = smov %s3940_s10 }
 0x32f   : > { %p15_p9 = scmp.ge.s32.totalorder %s18_s16, 14   ;;  %s8612_s10 = smov %s3944_s11 }
 0x330   : > { %s8613_s11 = smov %s4060_s5  ;;  %s8614_s12 = smov %s3956_s14 }
 0x331   : > { %s8615_s13 = smov %s3960_s15  ;;  %s8616_s14 = smov %s8619_s18 }
 0x332   : > { %s8617_s15 = smov %s8623_s19  ;;  %17 = sbr.rel (!%p15_p9) target bundleno = 7 (0x7), region = 89 }
 0x339   :  { %3435 = vsyncpa [#allocation4], 1 }
 0x33a   :  { %3437 = vsyncpa [#allocation4 + $0x1], 1 }
 0x33b   :  { %3438 = vsyncpa [#allocation6], 1 }
 0x33c   :  { %3440 = vsyncpa [#allocation6 + $0x1], 1 }

</bundles_post_ra>
